<compile_context>
chip_gen: v5e
topology: v5e:2x2
jax: 0.10.0
libtpu: 0.0.40
codegen_flags: <defaults>
</compile_context>

<pallas_src>
import functools
import math
import numpy as np
import jax
import jax.numpy as jnp
from jax import lax
from jax.experimental import pallas as pl
from jax.experimental.pallas import tpu as pltpu


# ----------------------------- Pallas kernel ------------------------------ #
def frame_level_kernel(*refs, has_upper, compute_dtype):
    if has_upper:
        (xc_ref, up_ref, h0_ref, wxc_ref, bxc_ref, wih_ref, whh_ref,
         bif_ref, bhn_ref, wup_ref, bup_ref,
         out_ref, hout_ref, io_scr, gi_scr) = refs
    else:
        (xc_ref, h0_ref, wxc_ref, bxc_ref, wih_ref, whh_ref,
         bif_ref, bhn_ref, wup_ref, bup_ref,
         out_ref, hout_ref, io_scr, gi_scr) = refs
        up_ref = None

    cdt = compute_dtype
    TB, H = io_scr.shape          # T * BT, hidden size
    L = h0_ref.shape[0]           # GRU layers
    bt = h0_ref.shape[1]          # batch rows per program (multiple of 8)
    T = TB // bt                  # time steps

    # Fused x_expand + conds_expand 1x1 convs (+ optional upper conditioning):
    # one (T*BT, IN+CS) x (IN+CS, H) matmul, f32 accumulation.
    inp = (jnp.dot(xc_ref[...], wxc_ref[...],
                   preferred_element_type=jnp.float32) + bxc_ref[...])
    if has_upper:
        inp = inp + up_ref[...]
    io_scr[...] = inp

    # ---------------------- layer-major multi-layer GRU --------------------- #
    for l in range(L):                                  # static, small
        # Hoisted, fused input-to-hidden matmul for all three gates.
        # b_ih and the r/z chunks of b_hh are pre-folded into bif (wrapper).
        gi_scr[...] = (jnp.dot(io_scr[...].astype(cdt), wih_ref[l],
                               preferred_element_type=jnp.float32)
                       + bif_ref[l])

        whh_l = whh_ref[l]                              # (H, 3H), compute dtype
        # Pre-broadcast the n-gate hidden bias once per layer so there is no
        # sublane broadcast on the serial per-step path.
        b_hn = jnp.broadcast_to(bhn_ref[l], (bt, H))

        def step(t, h):                                 # h: (BT, H) f32
            off = pl.multiple_of(t * bt, bt)            # sublane-aligned slice
            gi = gi_scr[pl.ds(off, bt), :]              # (BT, 3H) f32
            gh = jnp.dot(h.astype(cdt), whh_l,          # ONE fused hh matmul
                         preferred_element_type=jnp.float32)
            r = jax.nn.sigmoid(gi[:, :H] + gh[:, :H])
            z = jax.nn.sigmoid(gi[:, H:2 * H] + gh[:, H:2 * H])
            n = jnp.tanh(gi[:, 2 * H:] + r * (gh[:, 2 * H:] + b_hn))
            h_new = (1.0 - z) * n + z * h
            # Layer output overwrites the already-consumed layer input.
            io_scr[pl.ds(off, bt), :] = h_new
            return h_new

        h = h0_ref[l]                                   # (BT, H)
        # fori_loop (full unroll for short T) bounds live ranges while keeping
        # LLO scheduler visibility; larger T uses a partially-unrolled loop.
        h = lax.fori_loop(0, T, step, h, unroll=(True if T <= 32 else 8))
        hout_ref[l] = h

    # ConvTranspose1d(kernel=stride=ratio, bias=False) + flattened bias as a
    # single lane-dense (T*BT, H) x (H, ratio*H) matmul.
    out_ref[...] = (jnp.dot(io_scr[...].astype(cdt), wup_ref[...],
                            preferred_element_type=jnp.float32)
                    + bup_ref[...])


def _vmem_limit_bytes():
    # ~half of physical VMEM: ~64 MiB on v5e/v6e (128 MiB), 32 MiB on v7x.
    try:
        cap = int(pltpu.get_tpu_info().vmem_capacity_bytes)
        return int(min(max(cap // 2, 32 * 1024 * 1024), 100 * 1024 * 1024))
    except Exception:
        return 32 * 1024 * 1024


# ----------------------------- wrapper (glue) ------------------------------ #
def frame_level_forward(params, x, conds, upper_conditioning, rnn_state,
                        compute_dtype=jnp.bfloat16, num_batch_shards=1):
    b, t, in_samples = x.shape
    H = params["wx"].shape[1]
    L = params["wih"].shape[0]
    ratio = params["wup_flat"].shape[1] // H
    cs = params["wc"].shape[0]
    rh = ratio * H
    cdt = compute_dtype

    # Time-upsample conds if needed (broadcast glue, as in the reference).
    if conds.shape[1] != t:
        ur = t // conds.shape[1]
        conds = jnp.broadcast_to(
            conds[:, :, None, :],
            (b, conds.shape[1], ur, conds.shape[2])).reshape(b, t, conds.shape[2])

    has_upper = upper_conditioning is not None

    # Fuse the two 1x1 convs: single [x | conds] @ [wx ; wc] matmul in-kernel.
    xc = jnp.concatenate([x, conds], axis=-1)                    # (B, T, IN+CS)
    wxc = jnp.concatenate([params["wx"], params["wc"]], axis=0).astype(cdt)
    bxc = (params["bx"] + params["bc"]).astype(jnp.float32)      # (1, H)

    # GRU weights stay in the native fused (H, 3H) gate layout [r|z|n].
    wih = params["wih"].astype(cdt)                              # (L, H, 3H)
    whh = params["whh"].astype(cdt)                              # (L, H, 3H)
    bih = params["bih"].astype(jnp.float32)                      # (L, 1, 3H)
    bhh = params["bhh"].astype(jnp.float32)                      # (L, 1, 3H)
    # Fold b_hr / b_hz into the hoisted gi bias; keep b_hn separate.
    bif = bih + jnp.concatenate(
        [bhh[..., :2 * H], jnp.zeros_like(bhh[..., 2 * H:])], axis=-1)
    bhn = bhh[..., 2 * H:]                                       # (L, 1, H)

    wup = params["wup_flat"].astype(cdt)                         # (H, ratio*H)
    bup = params["bup_flat"].astype(jnp.float32)                 # (1, ratio*H)

    # Initial hidden state per batch element: (B, L, H).
    cols = [params["rnn_h0"] if s is None else s for s in rnn_state]
    h0_blh = jnp.stack(cols, axis=0).astype(jnp.float32)

    # Fold (almost) the whole batch into the matmul M dimension: one batch
    # shard per grid program.  nb=1 (default) on v5e/v6e; nb=2 on v7x.
    nb = max(1, int(num_batch_shards))
    b_pad = ((b + 8 * nb - 1) // (8 * nb)) * (8 * nb)
    bt_tile = b_pad // nb                                        # multiple of 8
    pad = b_pad - b

    def to_tiles(a, dtype):                                      # (B,T,C) -> (nb, T*BT, C)
        a = jnp.pad(a.astype(jnp.float32), ((0, pad), (0, 0), (0, 0))).astype(dtype)
        c = a.shape[-1]
        return a.reshape(nb, bt_tile, t, c).transpose(0, 2, 1, 3).reshape(nb, t * bt_tile, c)

    args = [to_tiles(xc, cdt)]
    in_specs = [pl.BlockSpec((None, t * bt_tile, in_samples + cs), lambda i: (i, 0, 0))]
    if has_upper:
        args.append(to_tiles(upper_conditioning, jnp.float32))
        in_specs.append(pl.BlockSpec((None, t * bt_tile, H), lambda i: (i, 0, 0)))

    h0_p = jnp.pad(h0_blh, ((0, pad), (0, 0), (0, 0)))
    h0_t = h0_p.reshape(nb, bt_tile, L, H).transpose(0, 2, 1, 3)  # (nb, L, BT, H)

    args += [h0_t, wxc, bxc, wih, whh, bif, bhn, wup, bup]
    in_specs += [
        pl.BlockSpec((None, L, bt_tile, H), lambda i: (i, 0, 0, 0)),   # h0
        pl.BlockSpec((in_samples + cs, H),  lambda i: (0, 0)),         # wxc
        pl.BlockSpec((1, H),                lambda i: (0, 0)),         # bxc
        pl.BlockSpec((L, H, 3 * H),         lambda i: (0, 0, 0)),      # wih (fused gates)
        pl.BlockSpec((L, H, 3 * H),         lambda i: (0, 0, 0)),      # whh (fused gates)
        pl.BlockSpec((L, 1, 3 * H),         lambda i: (0, 0, 0)),      # bih + bhh_rz
        pl.BlockSpec((L, 1, H),             lambda i: (0, 0, 0)),      # bhh_n
        pl.BlockSpec((H, rh),               lambda i: (0, 0)),         # wup_flat
        pl.BlockSpec((1, rh),               lambda i: (0, 0)),         # bup_flat
    ]
    out_shapes = (jax.ShapeDtypeStruct((nb, t * bt_tile, rh), jnp.float32),
                  jax.ShapeDtypeStruct((nb, L, bt_tile, H), jnp.float32))
    out_specs = (pl.BlockSpec((None, t * bt_tile, rh), lambda i: (i, 0, 0)),
                 pl.BlockSpec((None, L, bt_tile, H),   lambda i: (i, 0, 0, 0)))
    scratch_shapes = [pltpu.VMEM((t * bt_tile, H), jnp.float32),      # layer io (rnn out)
                      pltpu.VMEM((t * bt_tile, 3 * H), jnp.float32)]  # fused gi gates

    kernel = functools.partial(frame_level_kernel,
                               has_upper=has_upper, compute_dtype=cdt)

    out_t, hout_t = pl.pallas_call(
        kernel,
        out_shape=out_shapes,
        grid=(nb,),
        in_specs=in_specs,
        out_specs=out_specs,
        scratch_shapes=scratch_shapes,
        compiler_params=pltpu.CompilerParams(
            dimension_semantics=("parallel",),        # batch shards independent
            vmem_limit_bytes=_vmem_limit_bytes()),
    )(*args)

    # Undo the batch-fold layout (pure reshape/transpose glue).
    out_btr = (out_t.reshape(nb, t, bt_tile, rh).transpose(0, 2, 1, 3)
               .reshape(b_pad, t, rh)[:b])                        # (B, T, ratio*H)
    # (B, T, ratio*H) -> (B, T*ratio, H) contiguous relabel; valid because
    # wup_flat is laid out as [c_in, r*H + c_out].
    upsampling_output = out_btr.reshape(b, t * ratio, H)
    rnn_state_new = (hout_t.transpose(0, 2, 1, 3).reshape(b_pad, L, H)[:b]
                     .transpose(1, 0, 2))                         # (L, B, H)
    return upsampling_output, rnn_state_new


# ------------------------- pure-JAX reference ------------------------------ #
def reference_forward(params, x, conds, upper, rnn_state, compute_dtype=jnp.float32):
    cdt = compute_dtype

    def mm(a, w):   # matmuls with the same operand precision as the kernel
        return jnp.dot(a.astype(cdt), w.astype(cdt),
                       preferred_element_type=jnp.float32)

    b, t, _ = x.shape
    H = params["wx"].shape[1]
    L = params["wih"].shape[0]
    ratio = params["wup_flat"].shape[1] // H
    if conds.shape[1] != t:
        ur = t // conds.shape[1]
        conds = jnp.broadcast_to(
            conds[:, :, None, :],
            (b, conds.shape[1], ur, conds.shape[2])).reshape(b, t, conds.shape[2])
    inp = (mm(x, params["wx"]) + params["bx"]
           + mm(conds, params["wc"]) + params["bc"])
    if upper is not None:
        inp = inp + upper
    cols = [params["rnn_h0"] if s is None else s for s in rnn_state]
    h0 = jnp.stack(cols, axis=1)                                 # (L, B, H)

    def step(h, x_t):
        layer_in = x_t
        hs = []
        for l in range(L):
            gi = mm(layer_in, params["wih"][l]) + params["bih"][l]
            gh = mm(h[l], params["whh"][l]) + params["bhh"][l]
            r = jax.nn.sigmoid(gi[:, :H] + gh[:, :H])
            z = jax.nn.sigmoid(gi[:, H:2 * H] + gh[:, H:2 * H])
            n = jnp.tanh(gi[:, 2 * H:] + r * gh[:, 2 * H:])
            h_new = (1.0 - z) * n + z * h[l]
            hs.append(h_new)
            layer_in = h_new
        return jnp.stack(hs, axis=0), layer_in

    h_final, outs = lax.scan(step, h0, jnp.transpose(inp, (1, 0, 2)))
    rnn_out = jnp.transpose(outs, (1, 0, 2))                     # (B, T, H)
    up = mm(rnn_out.reshape(b * t, H), params["wup_flat"])
    up = up.reshape(b, t, ratio * H) + params["bup_flat"]
    return up.reshape(b, t * ratio, H), h_final


# ----------------------- deterministic parameter init ---------------------- #
def init_params(key, input_samples, conds_size, H, L, ratio):
    ks = jax.random.split(key, 10)

    def uni(k, shape, bound):
        return jax.random.uniform(k, shape, jnp.float32, -bound, bound)

    # Conv1d(k=1) weights (kaiming-uniform-like).  weight_norm at init
    # reproduces the same effective weight, so it is elided.
    wx = uni(ks[0], (input_samples, H), math.sqrt(6.0 / input_samples))
    wc = uni(ks[1], (conds_size, H), math.sqrt(6.0 / conds_size))
    # torch init sets all biases below to 0; we use small non-zero values so
    # the test exercises the bias-fusion paths (bxc=bx+bc, bif=bih+bhh_rz,
    # the n-gate bhh handling, and the flattened upsample bias).
    bx = uni(ks[5], (1, H), 0.1)
    bc = uni(ks[6], (1, H), 0.1)

    # GRU weights: lecun-uniform per gate chunk.
    # TODO(synk): orthogonal init for the hh "n" chunk is approximated with lecun uniform.
    wih = uni(ks[2], (L, H, 3 * H), math.sqrt(3.0 / H))
    whh = uni(ks[3], (L, H, 3 * H), math.sqrt(3.0 / H))
    bih = uni(ks[7], (L, 1, 3 * H), 0.1)
    bhh = uni(ks[8], (L, 1, 3 * H), 0.1)

    # ConvTranspose1d weight (in=H, out=H, k=ratio), flattened so that
    # wup_flat[c_in, r*H + c_out] = W[c_in, c_out, r].
    w_convT = uni(ks[4], (H, H, ratio), math.sqrt(6.0 / H))
    wup_flat = jnp.transpose(w_convT, (0, 2, 1)).reshape(H, ratio * H)
    # upsample_bias flattened as bup_flat[0, r*H + c] = bias[c, r].
    upsample_bias = uni(ks[9], (H, ratio), 0.1)
    bup_flat = jnp.transpose(upsample_bias, (1, 0)).reshape(1, ratio * H)

    rnn_h0 = jnp.zeros((L, H), jnp.float32)   # torch.nn.Parameter(zeros)

    return dict(wx=wx, bx=bx, wc=wc, bc=bc,
                wih=wih, whh=whh, bih=bih, bhh=bhh,
                wup_flat=wup_flat, bup_flat=bup_flat, rnn_h0=rnn_h0)


# ---------------------------------- main ----------------------------------- #
if __name__ == "__main__":
    # Module config: ratios=[4,4], layer_n=1 -> input_samples=16, ratio=4,
    # rnn_layers=2, rnn_hidden_size=32, conds_size=8.
    B, T = 2, 8
    IN, CS, H, L, RATIO = 16, 8, 32, 2, 4

    key = jax.random.PRNGKey(0)
    k_p, k_x, k_c, k_u, k_s = jax.random.split(key, 5)

    params = init_params(k_p, IN, CS, H, L, RATIO)

    x = jax.random.normal(k_x, (B, T, IN), jnp.float32)
    conds = jax.random.normal(k_c, (B, T // 4, CS), jnp.float32)   # exercises upscaling
    upper = jax.random.normal(k_u, (B, T, H), jnp.float32)
    # rnn_state: one real previous state, one None (falls back to rnn_h0).
    rnn_state = [jax.random.normal(k_s, (L, H), jnp.float32), None]

    # 1) f32 compute path: exact check against the f32 reference.
    out, h_new = frame_level_forward(params, x, conds, upper, rnn_state,
                                     compute_dtype=jnp.float32)
    out = jax.block_until_ready(out)
    h_new = jax.block_until_ready(h_new)
    out_ref, h_ref = reference_forward(params, x, conds, upper, rnn_state)
    assert out.shape == (B, T * RATIO, H), out.shape
    assert h_new.shape == (L, B, H), h_new.shape
    np.testing.assert_allclose(np.asarray(out), np.asarray(out_ref),
                               rtol=1e-4, atol=1e-4)
    np.testing.assert_allclose(np.asarray(h_new), np.asarray(h_ref),
                               rtol=1e-4, atol=1e-4)

    # 2) f32, no upper conditioning: exercises the specialized kernel variant
    #    that drops the upper-conditioning input stream entirely.
    out2, h2 = frame_level_forward(params, x, conds, None, rnn_state,
                                   compute_dtype=jnp.float32)
    out2 = jax.block_until_ready(out2)
    out2_ref, h2_ref = reference_forward(params, x, conds, None, rnn_state)
    np.testing.assert_allclose(np.asarray(out2), np.asarray(out2_ref),
                               rtol=1e-4, atol=1e-4)
    np.testing.assert_allclose(np.asarray(h2), np.asarray(h2_ref),
                               rtol=1e-4, atol=1e-4)

    # 3) Default bf16 matmul path (recurrent state / accumulation stay f32),
    #    checked against a matched-precision reference with loose tolerance.
    out3, h3 = frame_level_forward(params, x, conds, upper, rnn_state)
    out3 = jax.block_until_ready(out3)
    out3_ref, h3_ref = reference_forward(params, x, conds, upper, rnn_state,
                                         compute_dtype=jnp.bfloat16)
    np.testing.assert_allclose(np.asarray(out3), np.asarray(out3_ref),
                               rtol=5e-2, atol=5e-2)
    np.testing.assert_allclose(np.asarray(h3), np.asarray(h3_ref),
                               rtol=5e-2, atol=5e-2)

    print("KERNEL_OK")
</pallas_src>

<mosaic_0001>
module attributes {stable_mosaic.version = 11 : i64} {
  func.func @frame_level_kernel(%arg0: i32, %arg1: memref<1x64x24xf32, #tpu.memory_space<vmem>>, %arg2: memref<1x64x32xf32, #tpu.memory_space<vmem>>, %arg3: memref<1x2x8x32xf32, #tpu.memory_space<vmem>>, %arg4: memref<24x32xf32, #tpu.memory_space<vmem>>, %arg5: memref<1x32xf32, #tpu.memory_space<vmem>>, %arg6: memref<2x32x96xf32, #tpu.memory_space<vmem>>, %arg7: memref<2x32x96xf32, #tpu.memory_space<vmem>>, %arg8: memref<2x1x96xf32, #tpu.memory_space<vmem>>, %arg9: memref<2x1x32xf32, #tpu.memory_space<vmem>>, %arg10: memref<32x128xf32, #tpu.memory_space<vmem>>, %arg11: memref<1x128xf32, #tpu.memory_space<vmem>>, %arg12: memref<1x64x128xf32, #tpu.memory_space<vmem>>, %arg13: memref<1x2x8x32xf32, #tpu.memory_space<vmem>>, %arg14: memref<64x32xf32, #tpu.memory_space<vmem>>, %arg15: memref<64x96xf32, #tpu.memory_space<vmem>>) attributes {dimension_semantics = [#tpu.dimension_semantics<parallel>], iteration_bounds = array<i64: 1>, scalar_prefetch = 0 : i64, scratch_operands = 2 : i64, tpu.core_type = #tpu.core_type<tc>, window_params = [{transform_indices = @transform_0, window_bounds = array<i64: 1, 64, 24>}, {transform_indices = @transform_1, window_bounds = array<i64: 1, 64, 32>}, {transform_indices = @transform_2, window_bounds = array<i64: 1, 2, 8, 32>}, {pipeline_mode = #tpu.pipeline_mode<synchronous>, transform_indices = @transform_3, window_bounds = array<i64: 24, 32>}, {pipeline_mode = #tpu.pipeline_mode<synchronous>, transform_indices = @transform_4, window_bounds = array<i64: 1, 32>}, {pipeline_mode = #tpu.pipeline_mode<synchronous>, transform_indices = @transform_5, window_bounds = array<i64: 2, 32, 96>}, {pipeline_mode = #tpu.pipeline_mode<synchronous>, transform_indices = @transform_6, window_bounds = array<i64: 2, 32, 96>}, {pipeline_mode = #tpu.pipeline_mode<synchronous>, transform_indices = @transform_7, window_bounds = array<i64: 2, 1, 96>}, {pipeline_mode = #tpu.pipeline_mode<synchronous>, transform_indices = @transform_8, window_bounds = array<i64: 2, 1, 32>}, {pipeline_mode = #tpu.pipeline_mode<synchronous>, transform_indices = @transform_9, window_bounds = array<i64: 32, 128>}, {pipeline_mode = #tpu.pipeline_mode<synchronous>, transform_indices = @transform_10, window_bounds = array<i64: 1, 128>}, {transform_indices = @transform_11, window_bounds = array<i64: 1, 64, 128>}, {transform_indices = @transform_12, window_bounds = array<i64: 1, 2, 8, 32>}]} {
    %c0 = arith.constant 0 : index
    %c0_0 = arith.constant 0 : index
    %c0_1 = arith.constant 0 : index
    %0 = vector.load %arg1[%c0, %c0_0, %c0_1] : memref<1x64x24xf32, #tpu.memory_space<vmem>>, vector<1x64x24xf32>
    %1 = vector.shape_cast %0 : vector<1x64x24xf32> to vector<64x24xf32>
    %c0_2 = arith.constant 0 : index
    %c0_3 = arith.constant 0 : index
    %2 = vector.load %arg4[%c0_2, %c0_3] : memref<24x32xf32, #tpu.memory_space<vmem>>, vector<24x32xf32>
    %cst = arith.constant dense<0.000000e+00> : vector<64x32xf32>
    %3 = tpu.matmul %1, %2, %cst {dimension_numbers = #tpu.dot_dimension_numbers<[1], [0], [0], [1], [0, 0, 1, 1], [], []>} : vector<64x24xf32>, vector<24x32xf32>, vector<64x32xf32> -> vector<64x32xf32>
    %c0_4 = arith.constant 0 : index
    %c0_5 = arith.constant 0 : index
    %4 = vector.load %arg5[%c0_4, %c0_5] : memref<1x32xf32, #tpu.memory_space<vmem>>, vector<1x32xf32>
    %5 = vector.broadcast %4 : vector<1x32xf32> to vector<64x32xf32>
    %6 = arith.addf %3, %5 : vector<64x32xf32>
    %c0_6 = arith.constant 0 : index
    %c0_7 = arith.constant 0 : index
    %c0_8 = arith.constant 0 : index
    %7 = vector.load %arg2[%c0_6, %c0_7, %c0_8] : memref<1x64x32xf32, #tpu.memory_space<vmem>>, vector<1x64x32xf32>
    %8 = vector.shape_cast %7 : vector<1x64x32xf32> to vector<64x32xf32>
    %9 = arith.addf %6, %8 : vector<64x32xf32>
    %c0_9 = arith.constant 0 : index
    %c0_10 = arith.constant 0 : index
    %10 = vector.load %arg14[%c0_9, %c0_10] : memref<64x32xf32, #tpu.memory_space<vmem>>, vector<64x32xf32>
    tpu.vector_store %arg14[%c0_9, %c0_10], %9 {strides = array<i32>} : memref<64x32xf32, #tpu.memory_space<vmem>>, vector<64x32xf32>,
    %c0_11 = arith.constant 0 : index
    %c0_12 = arith.constant 0 : index
    %11 = vector.load %arg14[%c0_11, %c0_12] : memref<64x32xf32, #tpu.memory_space<vmem>>, vector<64x32xf32>
    %c0_13 = arith.constant 0 : index
    %c0_14 = arith.constant 0 : index
    %c0_15 = arith.constant 0 : index
    %12 = vector.load %arg6[%c0_13, %c0_14, %c0_15] : memref<2x32x96xf32, #tpu.memory_space<vmem>>, vector<1x32x96xf32>
    %13 = vector.shape_cast %12 : vector<1x32x96xf32> to vector<32x96xf32>
    %cst_16 = arith.constant dense<0.000000e+00> : vector<64x96xf32>
    %14 = tpu.matmul %11, %13, %cst_16 {dimension_numbers = #tpu.dot_dimension_numbers<[1], [0], [0], [1], [0, 0, 1, 1], [], []>} : vector<64x32xf32>, vector<32x96xf32>, vector<64x96xf32> -> vector<64x96xf32>
    %c0_17 = arith.constant 0 : index
    %c0_18 = arith.constant 0 : index
    %c0_19 = arith.constant 0 : index
    %15 = vector.load %arg8[%c0_17, %c0_18, %c0_19] : memref<2x1x96xf32, #tpu.memory_space<vmem>>, vector<1x1x96xf32>
    %16 = vector.shape_cast %15 : vector<1x1x96xf32> to vector<1x96xf32>
    %17 = vector.broadcast %16 : vector<1x96xf32> to vector<64x96xf32>
    %18 = arith.addf %14, %17 : vector<64x96xf32>
    %c0_20 = arith.constant 0 : index
    %c0_21 = arith.constant 0 : index
    %19 = vector.load %arg15[%c0_20, %c0_21] : memref<64x96xf32, #tpu.memory_space<vmem>>, vector<64x96xf32>
    tpu.vector_store %arg15[%c0_20, %c0_21], %18 {strides = array<i32>} : memref<64x96xf32, #tpu.memory_space<vmem>>, vector<64x96xf32>,
    %c0_22 = arith.constant 0 : index
    %c0_23 = arith.constant 0 : index
    %c0_24 = arith.constant 0 : index
    %20 = vector.load %arg7[%c0_22, %c0_23, %c0_24] : memref<2x32x96xf32, #tpu.memory_space<vmem>>, vector<1x32x96xf32>
    %21 = vector.shape_cast %20 : vector<1x32x96xf32> to vector<32x96xf32>
    %c0_25 = arith.constant 0 : index
    %c0_26 = arith.constant 0 : index
    %c0_27 = arith.constant 0 : index
    %22 = vector.load %arg9[%c0_25, %c0_26, %c0_27] : memref<2x1x32xf32, #tpu.memory_space<vmem>>, vector<1x1x32xf32>
    %23 = vector.shape_cast %22 : vector<1x1x32xf32> to vector<1x32xf32>
    %24 = vector.shape_cast %23 : vector<1x32xf32> to vector<1x32xf32>
    %25 = vector.broadcast %24 : vector<1x32xf32> to vector<8x32xf32>
    %c0_28 = arith.constant 0 : index
    %c0_29 = arith.constant 0 : index
    %c0_30 = arith.constant 0 : index
    %c0_31 = arith.constant 0 : index
    %26 = vector.load %arg3[%c0_28, %c0_29, %c0_30, %c0_31] : memref<1x2x8x32xf32, #tpu.memory_space<vmem>>, vector<1x1x8x32xf32>
    %27 = vector.shape_cast %26 : vector<1x1x8x32xf32> to vector<8x32xf32>
    %c0_i32 = arith.constant 0 : i32
    %c8_i32 = arith.constant 8 : i32
    %28 = arith.muli %c0_i32, %c8_i32 : i32
    %29 = tpu.assume_multiple %28, 8 : i32
    %30 = arith.index_cast %29 : i32 to index
    %c0_32 = arith.constant 0 : index
    %31 = vector.load %arg15[%30, %c0_32] : memref<64x96xf32, #tpu.memory_space<vmem>>, vector<8x96xf32>
    %cst_33 = arith.constant dense<0.000000e+00> : vector<8x96xf32>
    %32 = tpu.matmul %27, %21, %cst_33 {dimension_numbers = #tpu.dot_dimension_numbers<[1], [0], [0], [1], [0, 0, 1, 1], [], []>} : vector<8x32xf32>, vector<32x96xf32>, vector<8x96xf32> -> vector<8x96xf32>
    %33 = vector.extract_strided_slice %31 {offsets = [0, 0], sizes = [8, 32], strides = [1, 1]} : vector<8x96xf32> to vector<8x32xf32>
    %34 = vector.extract_strided_slice %32 {offsets = [0, 0], sizes = [8, 32], strides = [1, 1]} : vector<8x96xf32> to vector<8x32xf32>
    %35 = arith.addf %33, %34 : vector<8x32xf32>
    %36 = arith.negf %35 : vector<8x32xf32>
    %37 = math.exp %36 : vector<8x32xf32>
    %cst_34 = arith.constant 1.000000e+00 : f32
    %38 = vector.broadcast %cst_34 : f32 to vector<8x32xf32>
    %39 = arith.addf %38, %37 : vector<8x32xf32>
    %40 = arith.divf %38, %39 : vector<8x32xf32>
    %41 = vector.extract_strided_slice %31 {offsets = [0, 32], sizes = [8, 32], strides = [1, 1]} : vector<8x96xf32> to vector<8x32xf32>
    %42 = vector.extract_strided_slice %32 {offsets = [0, 32], sizes = [8, 32], strides = [1, 1]} : vector<8x96xf32> to vector<8x32xf32>
    %43 = arith.addf %41, %42 : vector<8x32xf32>
    %44 = arith.negf %43 : vector<8x32xf32>
    %45 = math.exp %44 : vector<8x32xf32>
    %cst_35 = arith.constant 1.000000e+00 : f32
    %46 = vector.broadcast %cst_35 : f32 to vector<8x32xf32>
    %47 = arith.addf %46, %45 : vector<8x32xf32>
    %48 = arith.divf %46, %47 : vector<8x32xf32>
    %49 = vector.extract_strided_slice %31 {offsets = [0, 64], sizes = [8, 32], strides = [1, 1]} : vector<8x96xf32> to vector<8x32xf32>
    %50 = vector.extract_strided_slice %32 {offsets = [0, 64], sizes = [8, 32], strides = [1, 1]} : vector<8x96xf32> to vector<8x32xf32>
    %51 = arith.addf %50, %25 : vector<8x32xf32>
    %52 = arith.mulf %40, %51 : vector<8x32xf32>
    %53 = arith.addf %49, %52 : vector<8x32xf32>
    %54 = math.tanh %53 : vector<8x32xf32>
    %cst_36 = arith.constant 1.000000e+00 : f32
    %55 = vector.broadcast %cst_36 : f32 to vector<8x32xf32>
    %56 = arith.subf %55, %48 : vector<8x32xf32>
    %57 = arith.mulf %56, %54 : vector<8x32xf32>
    %58 = arith.mulf %48, %27 : vector<8x32xf32>
    %59 = arith.addf %57, %58 : vector<8x32xf32>
    %60 = arith.index_cast %29 : i32 to index
    %c0_37 = arith.constant 0 : index
    %61 = vector.load %arg14[%60, %c0_37] : memref<64x32xf32, #tpu.memory_space<vmem>>, vector<8x32xf32>
    tpu.vector_store %arg14[%60, %c0_37], %59 {strides = array<i32>} : memref<64x32xf32, #tpu.memory_space<vmem>>, vector<8x32xf32>,
    %c1_i32 = arith.constant 1 : i32
    %c8_i32_38 = arith.constant 8 : i32
    %62 = arith.muli %c1_i32, %c8_i32_38 : i32
    %63 = tpu.assume_multiple %62, 8 : i32
    %64 = arith.index_cast %63 : i32 to index
    %c0_39 = arith.constant 0 : index
    %65 = vector.load %arg15[%64, %c0_39] : memref<64x96xf32, #tpu.memory_space<vmem>>, vector<8x96xf32>
    %cst_40 = arith.constant dense<0.000000e+00> : vector<8x96xf32>
    %66 = tpu.matmul %59, %21, %cst_40 {dimension_numbers = #tpu.dot_dimension_numbers<[1], [0], [0], [1], [0, 0, 1, 1], [], []>} : vector<8x32xf32>, vector<32x96xf32>, vector<8x96xf32> -> vector<8x96xf32>
    %67 = vector.extract_strided_slice %65 {offsets = [0, 0], sizes = [8, 32], strides = [1, 1]} : vector<8x96xf32> to vector<8x32xf32>
    %68 = vector.extract_strided_slice %66 {offsets = [0, 0], sizes = [8, 32], strides = [1, 1]} : vector<8x96xf32> to vector<8x32xf32>
    %69 = arith.addf %67, %68 : vector<8x32xf32>
    %70 = arith.negf %69 : vector<8x32xf32>
    %71 = math.exp %70 : vector<8x32xf32>
    %cst_41 = arith.constant 1.000000e+00 : f32
    %72 = vector.broadcast %cst_41 : f32 to vector<8x32xf32>
    %73 = arith.addf %72, %71 : vector<8x32xf32>
    %74 = arith.divf %72, %73 : vector<8x32xf32>
    %75 = vector.extract_strided_slice %65 {offsets = [0, 32], sizes = [8, 32], strides = [1, 1]} : vector<8x96xf32> to vector<8x32xf32>
    %76 = vector.extract_strided_slice %66 {offsets = [0, 32], sizes = [8, 32], strides = [1, 1]} : vector<8x96xf32> to vector<8x32xf32>
    %77 = arith.addf %75, %76 : vector<8x32xf32>
    %78 = arith.negf %77 : vector<8x32xf32>
    %79 = math.exp %78 : vector<8x32xf32>
    %cst_42 = arith.constant 1.000000e+00 : f32
    %80 = vector.broadcast %cst_42 : f32 to vector<8x32xf32>
    %81 = arith.addf %80, %79 : vector<8x32xf32>
    %82 = arith.divf %80, %81 : vector<8x32xf32>
    %83 = vector.extract_strided_slice %65 {offsets = [0, 64], sizes = [8, 32], strides = [1, 1]} : vector<8x96xf32> to vector<8x32xf32>
    %84 = vector.extract_strided_slice %66 {offsets = [0, 64], sizes = [8, 32], strides = [1, 1]} : vector<8x96xf32> to vector<8x32xf32>
    %85 = arith.addf %84, %25 : vector<8x32xf32>
    %86 = arith.mulf %74, %85 : vector<8x32xf32>
    %87 = arith.addf %83, %86 : vector<8x32xf32>
    %88 = math.tanh %87 : vector<8x32xf32>
    %cst_43 = arith.constant 1.000000e+00 : f32
    %89 = vector.broadcast %cst_43 : f32 to vector<8x32xf32>
    %90 = arith.subf %89, %82 : vector<8x32xf32>
    %91 = arith.mulf %90, %88 : vector<8x32xf32>
    %92 = arith.mulf %82, %59 : vector<8x32xf32>
    %93 = arith.addf %91, %92 : vector<8x32xf32>
    %94 = arith.index_cast %63 : i32 to index
    %c0_44 = arith.constant 0 : index
    %95 = vector.load %arg14[%94, %c0_44] : memref<64x32xf32, #tpu.memory_space<vmem>>, vector<8x32xf32>
    tpu.vector_store %arg14[%94, %c0_44], %93 {strides = array<i32>} : memref<64x32xf32, #tpu.memory_space<vmem>>, vector<8x32xf32>,
    %c2_i32 = arith.constant 2 : i32
    %c8_i32_45 = arith.constant 8 : i32
    %96 = arith.muli %c2_i32, %c8_i32_45 : i32
    %97 = tpu.assume_multiple %96, 8 : i32
    %98 = arith.index_cast %97 : i32 to index
    %c0_46 = arith.constant 0 : index
    %99 = vector.load %arg15[%98, %c0_46] : memref<64x96xf32, #tpu.memory_space<vmem>>, vector<8x96xf32>
    %cst_47 = arith.constant dense<0.000000e+00> : vector<8x96xf32>
    %100 = tpu.matmul %93, %21, %cst_47 {dimension_numbers = #tpu.dot_dimension_numbers<[1], [0], [0], [1], [0, 0, 1, 1], [], []>} : vector<8x32xf32>, vector<32x96xf32>, vector<8x96xf32> -> vector<8x96xf32>
    %101 = vector.extract_strided_slice %99 {offsets = [0, 0], sizes = [8, 32], strides = [1, 1]} : vector<8x96xf32> to vector<8x32xf32>
    %102 = vector.extract_strided_slice %100 {offsets = [0, 0], sizes = [8, 32], strides = [1, 1]} : vector<8x96xf32> to vector<8x32xf32>
    %103 = arith.addf %101, %102 : vector<8x32xf32>
    %104 = arith.negf %103 : vector<8x32xf32>
    %105 = math.exp %104 : vector<8x32xf32>
    %cst_48 = arith.constant 1.000000e+00 : f32
    %106 = vector.broadcast %cst_48 : f32 to vector<8x32xf32>
    %107 = arith.addf %106, %105 : vector<8x32xf32>
    %108 = arith.divf %106, %107 : vector<8x32xf32>
    %109 = vector.extract_strided_slice %99 {offsets = [0, 32], sizes = [8, 32], strides = [1, 1]} : vector<8x96xf32> to vector<8x32xf32>
    %110 = vector.extract_strided_slice %100 {offsets = [0, 32], sizes = [8, 32], strides = [1, 1]} : vector<8x96xf32> to vector<8x32xf32>
    %111 = arith.addf %109, %110 : vector<8x32xf32>
    %112 = arith.negf %111 : vector<8x32xf32>
    %113 = math.exp %112 : vector<8x32xf32>
    %cst_49 = arith.constant 1.000000e+00 : f32
    %114 = vector.broadcast %cst_49 : f32 to vector<8x32xf32>
    %115 = arith.addf %114, %113 : vector<8x32xf32>
    %116 = arith.divf %114, %115 : vector<8x32xf32>
    %117 = vector.extract_strided_slice %99 {offsets = [0, 64], sizes = [8, 32], strides = [1, 1]} : vector<8x96xf32> to vector<8x32xf32>
    %118 = vector.extract_strided_slice %100 {offsets = [0, 64], sizes = [8, 32], strides = [1, 1]} : vector<8x96xf32> to vector<8x32xf32>
    %119 = arith.addf %118, %25 : vector<8x32xf32>
    %120 = arith.mulf %108, %119 : vector<8x32xf32>
    %121 = arith.addf %117, %120 : vector<8x32xf32>
    %122 = math.tanh %121 : vector<8x32xf32>
    %cst_50 = arith.constant 1.000000e+00 : f32
    %123 = vector.broadcast %cst_50 : f32 to vector<8x32xf32>
    %124 = arith.subf %123, %116 : vector<8x32xf32>
    %125 = arith.mulf %124, %122 : vector<8x32xf32>
    %126 = arith.mulf %116, %93 : vector<8x32xf32>
    %127 = arith.addf %125, %126 : vector<8x32xf32>
    %128 = arith.index_cast %97 : i32 to index
    %c0_51 = arith.constant 0 : index
    %129 = vector.load %arg14[%128, %c0_51] : memref<64x32xf32, #tpu.memory_space<vmem>>, vector<8x32xf32>
    tpu.vector_store %arg14[%128, %c0_51], %127 {strides = array<i32>} : memref<64x32xf32, #tpu.memory_space<vmem>>, vector<8x32xf32>,
    %c3_i32 = arith.constant 3 : i32
    %c8_i32_52 = arith.constant 8 : i32
    %130 = arith.muli %c3_i32, %c8_i32_52 : i32
    %131 = tpu.assume_multiple %130, 8 : i32
    %132 = arith.index_cast %131 : i32 to index
    %c0_53 = arith.constant 0 : index
    %133 = vector.load %arg15[%132, %c0_53] : memref<64x96xf32, #tpu.memory_space<vmem>>, vector<8x96xf32>
    %cst_54 = arith.constant dense<0.000000e+00> : vector<8x96xf32>
    %134 = tpu.matmul %127, %21, %cst_54 {dimension_numbers = #tpu.dot_dimension_numbers<[1], [0], [0], [1], [0, 0, 1, 1], [], []>} : vector<8x32xf32>, vector<32x96xf32>, vector<8x96xf32> -> vector<8x96xf32>
    %135 = vector.extract_strided_slice %133 {offsets = [0, 0], sizes = [8, 32], strides = [1, 1]} : vector<8x96xf32> to vector<8x32xf32>
    %136 = vector.extract_strided_slice %134 {offsets = [0, 0], sizes = [8, 32], strides = [1, 1]} : vector<8x96xf32> to vector<8x32xf32>
    %137 = arith.addf %135, %136 : vector<8x32xf32>
    %138 = arith.negf %137 : vector<8x32xf32>
    %139 = math.exp %138 : vector<8x32xf32>
    %cst_55 = arith.constant 1.000000e+00 : f32
    %140 = vector.broadcast %cst_55 : f32 to vector<8x32xf32>
    %141 = arith.addf %140, %139 : vector<8x32xf32>
    %142 = arith.divf %140, %141 : vector<8x32xf32>
    %143 = vector.extract_strided_slice %133 {offsets = [0, 32], sizes = [8, 32], strides = [1, 1]} : vector<8x96xf32> to vector<8x32xf32>
    %144 = vector.extract_strided_slice %134 {offsets = [0, 32], sizes = [8, 32], strides = [1, 1]} : vector<8x96xf32> to vector<8x32xf32>
    %145 = arith.addf %143, %144 : vector<8x32xf32>
    %146 = arith.negf %145 : vector<8x32xf32>
    %147 = math.exp %146 : vector<8x32xf32>
    %cst_56 = arith.constant 1.000000e+00 : f32
    %148 = vector.broadcast %cst_56 : f32 to vector<8x32xf32>
    %149 = arith.addf %148, %147 : vector<8x32xf32>
    %150 = arith.divf %148, %149 : vector<8x32xf32>
    %151 = vector.extract_strided_slice %133 {offsets = [0, 64], sizes = [8, 32], strides = [1, 1]} : vector<8x96xf32> to vector<8x32xf32>
    %152 = vector.extract_strided_slice %134 {offsets = [0, 64], sizes = [8, 32], strides = [1, 1]} : vector<8x96xf32> to vector<8x32xf32>
    %153 = arith.addf %152, %25 : vector<8x32xf32>
    %154 = arith.mulf %142, %153 : vector<8x32xf32>
    %155 = arith.addf %151, %154 : vector<8x32xf32>
    %156 = math.tanh %155 : vector<8x32xf32>
    %cst_57 = arith.constant 1.000000e+00 : f32
    %157 = vector.broadcast %cst_57 : f32 to vector<8x32xf32>
    %158 = arith.subf %157, %150 : vector<8x32xf32>
    %159 = arith.mulf %158, %156 : vector<8x32xf32>
    %160 = arith.mulf %150, %127 : vector<8x32xf32>
    %161 = arith.addf %159, %160 : vector<8x32xf32>
    %162 = arith.index_cast %131 : i32 to index
    %c0_58 = arith.constant 0 : index
    %163 = vector.load %arg14[%162, %c0_58] : memref<64x32xf32, #tpu.memory_space<vmem>>, vector<8x32xf32>
    tpu.vector_store %arg14[%162, %c0_58], %161 {strides = array<i32>} : memref<64x32xf32, #tpu.memory_space<vmem>>, vector<8x32xf32>,
    %c4_i32 = arith.constant 4 : i32
    %c8_i32_59 = arith.constant 8 : i32
    %164 = arith.muli %c4_i32, %c8_i32_59 : i32
    %165 = tpu.assume_multiple %164, 8 : i32
    %166 = arith.index_cast %165 : i32 to index
    %c0_60 = arith.constant 0 : index
    %167 = vector.load %arg15[%166, %c0_60] : memref<64x96xf32, #tpu.memory_space<vmem>>, vector<8x96xf32>
    %cst_61 = arith.constant dense<0.000000e+00> : vector<8x96xf32>
    %168 = tpu.matmul %161, %21, %cst_61 {dimension_numbers = #tpu.dot_dimension_numbers<[1], [0], [0], [1], [0, 0, 1, 1], [], []>} : vector<8x32xf32>, vector<32x96xf32>, vector<8x96xf32> -> vector<8x96xf32>
    %169 = vector.extract_strided_slice %167 {offsets = [0, 0], sizes = [8, 32], strides = [1, 1]} : vector<8x96xf32> to vector<8x32xf32>
    %170 = vector.extract_strided_slice %168 {offsets = [0, 0], sizes = [8, 32], strides = [1, 1]} : vector<8x96xf32> to vector<8x32xf32>
    %171 = arith.addf %169, %170 : vector<8x32xf32>
    %172 = arith.negf %171 : vector<8x32xf32>
    %173 = math.exp %172 : vector<8x32xf32>
    %cst_62 = arith.constant 1.000000e+00 : f32
    %174 = vector.broadcast %cst_62 : f32 to vector<8x32xf32>
    %175 = arith.addf %174, %173 : vector<8x32xf32>
    %176 = arith.divf %174, %175 : vector<8x32xf32>
    %177 = vector.extract_strided_slice %167 {offsets = [0, 32], sizes = [8, 32], strides = [1, 1]} : vector<8x96xf32> to vector<8x32xf32>
    %178 = vector.extract_strided_slice %168 {offsets = [0, 32], sizes = [8, 32], strides = [1, 1]} : vector<8x96xf32> to vector<8x32xf32>
    %179 = arith.addf %177, %178 : vector<8x32xf32>
    %180 = arith.negf %179 : vector<8x32xf32>
    %181 = math.exp %180 : vector<8x32xf32>
    %cst_63 = arith.constant 1.000000e+00 : f32
    %182 = vector.broadcast %cst_63 : f32 to vector<8x32xf32>
    %183 = arith.addf %182, %181 : vector<8x32xf32>
    %184 = arith.divf %182, %183 : vector<8x32xf32>
    %185 = vector.extract_strided_slice %167 {offsets = [0, 64], sizes = [8, 32], strides = [1, 1]} : vector<8x96xf32> to vector<8x32xf32>
    %186 = vector.extract_strided_slice %168 {offsets = [0, 64], sizes = [8, 32], strides = [1, 1]} : vector<8x96xf32> to vector<8x32xf32>
    %187 = arith.addf %186, %25 : vector<8x32xf32>
    %188 = arith.mulf %176, %187 : vector<8x32xf32>
    %189 = arith.addf %185, %188 : vector<8x32xf32>
    %190 = math.tanh %189 : vector<8x32xf32>
    %cst_64 = arith.constant 1.000000e+00 : f32
    %191 = vector.broadcast %cst_64 : f32 to vector<8x32xf32>
    %192 = arith.subf %191, %184 : vector<8x32xf32>
    %193 = arith.mulf %192, %190 : vector<8x32xf32>
    %194 = arith.mulf %184, %161 : vector<8x32xf32>
    %195 = arith.addf %193, %194 : vector<8x32xf32>
    %196 = arith.index_cast %165 : i32 to index
    %c0_65 = arith.constant 0 : index
    %197 = vector.load %arg14[%196, %c0_65] : memref<64x32xf32, #tpu.memory_space<vmem>>, vector<8x32xf32>
    tpu.vector_store %arg14[%196, %c0_65], %195 {strides = array<i32>} : memref<64x32xf32, #tpu.memory_space<vmem>>, vector<8x32xf32>,
    %c5_i32 = arith.constant 5 : i32
    %c8_i32_66 = arith.constant 8 : i32
    %198 = arith.muli %c5_i32, %c8_i32_66 : i32
    %199 = tpu.assume_multiple %198, 8 : i32
    %200 = arith.index_cast %199 : i32 to index
    %c0_67 = arith.constant 0 : index
    %201 = vector.load %arg15[%200, %c0_67] : memref<64x96xf32, #tpu.memory_space<vmem>>, vector<8x96xf32>
    %cst_68 = arith.constant dense<0.000000e+00> : vector<8x96xf32>
    %202 = tpu.matmul %195, %21, %cst_68 {dimension_numbers = #tpu.dot_dimension_numbers<[1], [0], [0], [1], [0, 0, 1, 1], [], []>} : vector<8x32xf32>, vector<32x96xf32>, vector<8x96xf32> -> vector<8x96xf32>
    %203 = vector.extract_strided_slice %201 {offsets = [0, 0], sizes = [8, 32], strides = [1, 1]} : vector<8x96xf32> to vector<8x32xf32>
    %204 = vector.extract_strided_slice %202 {offsets = [0, 0], sizes = [8, 32], strides = [1, 1]} : vector<8x96xf32> to vector<8x32xf32>
    %205 = arith.addf %203, %204 : vector<8x32xf32>
    %206 = arith.negf %205 : vector<8x32xf32>
    %207 = math.exp %206 : vector<8x32xf32>
    %cst_69 = arith.constant 1.000000e+00 : f32
    %208 = vector.broadcast %cst_69 : f32 to vector<8x32xf32>
    %209 = arith.addf %208, %207 : vector<8x32xf32>
    %210 = arith.divf %208, %209 : vector<8x32xf32>
    %211 = vector.extract_strided_slice %201 {offsets = [0, 32], sizes = [8, 32], strides = [1, 1]} : vector<8x96xf32> to vector<8x32xf32>
    %212 = vector.extract_strided_slice %202 {offsets = [0, 32], sizes = [8, 32], strides = [1, 1]} : vector<8x96xf32> to vector<8x32xf32>
    %213 = arith.addf %211, %212 : vector<8x32xf32>
    %214 = arith.negf %213 : vector<8x32xf32>
    %215 = math.exp %214 : vector<8x32xf32>
    %cst_70 = arith.constant 1.000000e+00 : f32
    %216 = vector.broadcast %cst_70 : f32 to vector<8x32xf32>
    %217 = arith.addf %216, %215 : vector<8x32xf32>
    %218 = arith.divf %216, %217 : vector<8x32xf32>
    %219 = vector.extract_strided_slice %201 {offsets = [0, 64], sizes = [8, 32], strides = [1, 1]} : vector<8x96xf32> to vector<8x32xf32>
    %220 = vector.extract_strided_slice %202 {offsets = [0, 64], sizes = [8, 32], strides = [1, 1]} : vector<8x96xf32> to vector<8x32xf32>
    %221 = arith.addf %220, %25 : vector<8x32xf32>
    %222 = arith.mulf %210, %221 : vector<8x32xf32>
    %223 = arith.addf %219, %222 : vector<8x32xf32>
    %224 = math.tanh %223 : vector<8x32xf32>
    %cst_71 = arith.constant 1.000000e+00 : f32
    %225 = vector.broadcast %cst_71 : f32 to vector<8x32xf32>
    %226 = arith.subf %225, %218 : vector<8x32xf32>
    %227 = arith.mulf %226, %224 : vector<8x32xf32>
    %228 = arith.mulf %218, %195 : vector<8x32xf32>
    %229 = arith.addf %227, %228 : vector<8x32xf32>
    %230 = arith.index_cast %199 : i32 to index
    %c0_72 = arith.constant 0 : index
    %231 = vector.load %arg14[%230, %c0_72] : memref<64x32xf32, #tpu.memory_space<vmem>>, vector<8x32xf32>
    tpu.vector_store %arg14[%230, %c0_72], %229 {strides = array<i32>} : memref<64x32xf32, #tpu.memory_space<vmem>>, vector<8x32xf32>,
    %c6_i32 = arith.constant 6 : i32
    %c8_i32_73 = arith.constant 8 : i32
    %232 = arith.muli %c6_i32, %c8_i32_73 : i32
    %233 = tpu.assume_multiple %232, 8 : i32
    %234 = arith.index_cast %233 : i32 to index
    %c0_74 = arith.constant 0 : index
    %235 = vector.load %arg15[%234, %c0_74] : memref<64x96xf32, #tpu.memory_space<vmem>>, vector<8x96xf32>
    %cst_75 = arith.constant dense<0.000000e+00> : vector<8x96xf32>
    %236 = tpu.matmul %229, %21, %cst_75 {dimension_numbers = #tpu.dot_dimension_numbers<[1], [0], [0], [1], [0, 0, 1, 1], [], []>} : vector<8x32xf32>, vector<32x96xf32>, vector<8x96xf32> -> vector<8x96xf32>
    %237 = vector.extract_strided_slice %235 {offsets = [0, 0], sizes = [8, 32], strides = [1, 1]} : vector<8x96xf32> to vector<8x32xf32>
    %238 = vector.extract_strided_slice %236 {offsets = [0, 0], sizes = [8, 32], strides = [1, 1]} : vector<8x96xf32> to vector<8x32xf32>
    %239 = arith.addf %237, %238 : vector<8x32xf32>
    %240 = arith.negf %239 : vector<8x32xf32>
    %241 = math.exp %240 : vector<8x32xf32>
    %cst_76 = arith.constant 1.000000e+00 : f32
    %242 = vector.broadcast %cst_76 : f32 to vector<8x32xf32>
    %243 = arith.addf %242, %241 : vector<8x32xf32>
    %244 = arith.divf %242, %243 : vector<8x32xf32>
    %245 = vector.extract_strided_slice %235 {offsets = [0, 32], sizes = [8, 32], strides = [1, 1]} : vector<8x96xf32> to vector<8x32xf32>
    %246 = vector.extract_strided_slice %236 {offsets = [0, 32], sizes = [8, 32], strides = [1, 1]} : vector<8x96xf32> to vector<8x32xf32>
    %247 = arith.addf %245, %246 : vector<8x32xf32>
    %248 = arith.negf %247 : vector<8x32xf32>
    %249 = math.exp %248 : vector<8x32xf32>
    %cst_77 = arith.constant 1.000000e+00 : f32
    %250 = vector.broadcast %cst_77 : f32 to vector<8x32xf32>
    %251 = arith.addf %250, %249 : vector<8x32xf32>
    %252 = arith.divf %250, %251 : vector<8x32xf32>
    %253 = vector.extract_strided_slice %235 {offsets = [0, 64], sizes = [8, 32], strides = [1, 1]} : vector<8x96xf32> to vector<8x32xf32>
    %254 = vector.extract_strided_slice %236 {offsets = [0, 64], sizes = [8, 32], strides = [1, 1]} : vector<8x96xf32> to vector<8x32xf32>
    %255 = arith.addf %254, %25 : vector<8x32xf32>
    %256 = arith.mulf %244, %255 : vector<8x32xf32>
    %257 = arith.addf %253, %256 : vector<8x32xf32>
    %258 = math.tanh %257 : vector<8x32xf32>
    %cst_78 = arith.constant 1.000000e+00 : f32
    %259 = vector.broadcast %cst_78 : f32 to vector<8x32xf32>
    %260 = arith.subf %259, %252 : vector<8x32xf32>
    %261 = arith.mulf %260, %258 : vector<8x32xf32>
    %262 = arith.mulf %252, %229 : vector<8x32xf32>
    %263 = arith.addf %261, %262 : vector<8x32xf32>
    %264 = arith.index_cast %233 : i32 to index
    %c0_79 = arith.constant 0 : index
    %265 = vector.load %arg14[%264, %c0_79] : memref<64x32xf32, #tpu.memory_space<vmem>>, vector<8x32xf32>
    tpu.vector_store %arg14[%264, %c0_79], %263 {strides = array<i32>} : memref<64x32xf32, #tpu.memory_space<vmem>>, vector<8x32xf32>,
    %c7_i32 = arith.constant 7 : i32
    %c8_i32_80 = arith.constant 8 : i32
    %266 = arith.muli %c7_i32, %c8_i32_80 : i32
    %267 = tpu.assume_multiple %266, 8 : i32
    %268 = arith.index_cast %267 : i32 to index
    %c0_81 = arith.constant 0 : index
    %269 = vector.load %arg15[%268, %c0_81] : memref<64x96xf32, #tpu.memory_space<vmem>>, vector<8x96xf32>
    %cst_82 = arith.constant dense<0.000000e+00> : vector<8x96xf32>
    %270 = tpu.matmul %263, %21, %cst_82 {dimension_numbers = #tpu.dot_dimension_numbers<[1], [0], [0], [1], [0, 0, 1, 1], [], []>} : vector<8x32xf32>, vector<32x96xf32>, vector<8x96xf32> -> vector<8x96xf32>
    %271 = vector.extract_strided_slice %269 {offsets = [0, 0], sizes = [8, 32], strides = [1, 1]} : vector<8x96xf32> to vector<8x32xf32>
    %272 = vector.extract_strided_slice %270 {offsets = [0, 0], sizes = [8, 32], strides = [1, 1]} : vector<8x96xf32> to vector<8x32xf32>
    %273 = arith.addf %271, %272 : vector<8x32xf32>
    %274 = arith.negf %273 : vector<8x32xf32>
    %275 = math.exp %274 : vector<8x32xf32>
    %cst_83 = arith.constant 1.000000e+00 : f32
    %276 = vector.broadcast %cst_83 : f32 to vector<8x32xf32>
    %277 = arith.addf %276, %275 : vector<8x32xf32>
    %278 = arith.divf %276, %277 : vector<8x32xf32>
    %279 = vector.extract_strided_slice %269 {offsets = [0, 32], sizes = [8, 32], strides = [1, 1]} : vector<8x96xf32> to vector<8x32xf32>
    %280 = vector.extract_strided_slice %270 {offsets = [0, 32], sizes = [8, 32], strides = [1, 1]} : vector<8x96xf32> to vector<8x32xf32>
    %281 = arith.addf %279, %280 : vector<8x32xf32>
    %282 = arith.negf %281 : vector<8x32xf32>
    %283 = math.exp %282 : vector<8x32xf32>
    %cst_84 = arith.constant 1.000000e+00 : f32
    %284 = vector.broadcast %cst_84 : f32 to vector<8x32xf32>
    %285 = arith.addf %284, %283 : vector<8x32xf32>
    %286 = arith.divf %284, %285 : vector<8x32xf32>
    %287 = vector.extract_strided_slice %269 {offsets = [0, 64], sizes = [8, 32], strides = [1, 1]} : vector<8x96xf32> to vector<8x32xf32>
    %288 = vector.extract_strided_slice %270 {offsets = [0, 64], sizes = [8, 32], strides = [1, 1]} : vector<8x96xf32> to vector<8x32xf32>
    %289 = arith.addf %288, %25 : vector<8x32xf32>
    %290 = arith.mulf %278, %289 : vector<8x32xf32>
    %291 = arith.addf %287, %290 : vector<8x32xf32>
    %292 = math.tanh %291 : vector<8x32xf32>
    %cst_85 = arith.constant 1.000000e+00 : f32
    %293 = vector.broadcast %cst_85 : f32 to vector<8x32xf32>
    %294 = arith.subf %293, %286 : vector<8x32xf32>
    %295 = arith.mulf %294, %292 : vector<8x32xf32>
    %296 = arith.mulf %286, %263 : vector<8x32xf32>
    %297 = arith.addf %295, %296 : vector<8x32xf32>
    %298 = arith.index_cast %267 : i32 to index
    %c0_86 = arith.constant 0 : index
    %299 = vector.load %arg14[%298, %c0_86] : memref<64x32xf32, #tpu.memory_space<vmem>>, vector<8x32xf32>
    tpu.vector_store %arg14[%298, %c0_86], %297 {strides = array<i32>} : memref<64x32xf32, #tpu.memory_space<vmem>>, vector<8x32xf32>,
    %c8_i32_87 = arith.constant 8 : i32
    %c0_88 = arith.constant 0 : index
    %c0_89 = arith.constant 0 : index
    %c0_90 = arith.constant 0 : index
    %c0_91 = arith.constant 0 : index
    %300 = vector.load %arg13[%c0_88, %c0_89, %c0_90, %c0_91] : memref<1x2x8x32xf32, #tpu.memory_space<vmem>>, vector<1x1x8x32xf32>
    %301 = vector.shape_cast %300 : vector<1x1x8x32xf32> to vector<8x32xf32>
    %302 = vector.shape_cast %297 : vector<8x32xf32> to vector<1x1x8x32xf32>
    tpu.vector_store %arg13[%c0_88, %c0_89, %c0_90, %c0_91], %302 {strides = array<i32>} : memref<1x2x8x32xf32, #tpu.memory_space<vmem>>, vector<1x1x8x32xf32>,
    %c0_92 = arith.constant 0 : index
    %c0_93 = arith.constant 0 : index
    %303 = vector.load %arg14[%c0_92, %c0_93] : memref<64x32xf32, #tpu.memory_space<vmem>>, vector<64x32xf32>
    %c1 = arith.constant 1 : index
    %c0_94 = arith.constant 0 : index
    %c0_95 = arith.constant 0 : index
    %304 = vector.load %arg6[%c1, %c0_94, %c0_95] : memref<2x32x96xf32, #tpu.memory_space<vmem>>, vector<1x32x96xf32>
    %305 = vector.shape_cast %304 : vector<1x32x96xf32> to vector<32x96xf32>
    %cst_96 = arith.constant dense<0.000000e+00> : vector<64x96xf32>
    %306 = tpu.matmul %303, %305, %cst_96 {dimension_numbers = #tpu.dot_dimension_numbers<[1], [0], [0], [1], [0, 0, 1, 1], [], []>} : vector<64x32xf32>, vector<32x96xf32>, vector<64x96xf32> -> vector<64x96xf32>
    %c1_97 = arith.constant 1 : index
    %c0_98 = arith.constant 0 : index
    %c0_99 = arith.constant 0 : index
    %307 = vector.load %arg8[%c1_97, %c0_98, %c0_99] : memref<2x1x96xf32, #tpu.memory_space<vmem>>, vector<1x1x96xf32>
    %308 = vector.shape_cast %307 : vector<1x1x96xf32> to vector<1x96xf32>
    %309 = vector.broadcast %308 : vector<1x96xf32> to vector<64x96xf32>
    %310 = arith.addf %306, %309 : vector<64x96xf32>
    %c0_100 = arith.constant 0 : index
    %c0_101 = arith.constant 0 : index
    %311 = vector.load %arg15[%c0_100, %c0_101] : memref<64x96xf32, #tpu.memory_space<vmem>>, vector<64x96xf32>
    tpu.vector_store %arg15[%c0_100, %c0_101], %310 {strides = array<i32>} : memref<64x96xf32, #tpu.memory_space<vmem>>, vector<64x96xf32>,
    %c1_102 = arith.constant 1 : index
    %c0_103 = arith.constant 0 : index
    %c0_104 = arith.constant 0 : index
    %312 = vector.load %arg7[%c1_102, %c0_103, %c0_104] : memref<2x32x96xf32, #tpu.memory_space<vmem>>, vector<1x32x96xf32>
    %313 = vector.shape_cast %312 : vector<1x32x96xf32> to vector<32x96xf32>
    %c1_105 = arith.constant 1 : index
    %c0_106 = arith.constant 0 : index
    %c0_107 = arith.constant 0 : index
    %314 = vector.load %arg9[%c1_105, %c0_106, %c0_107] : memref<2x1x32xf32, #tpu.memory_space<vmem>>, vector<1x1x32xf32>
    %315 = vector.shape_cast %314 : vector<1x1x32xf32> to vector<1x32xf32>
    %316 = vector.shape_cast %315 : vector<1x32xf32> to vector<1x32xf32>
    %317 = vector.broadcast %316 : vector<1x32xf32> to vector<8x32xf32>
    %c0_108 = arith.constant 0 : index
    %c1_109 = arith.constant 1 : index
    %c0_110 = arith.constant 0 : index
    %c0_111 = arith.constant 0 : index
    %318 = vector.load %arg3[%c0_108, %c1_109, %c0_110, %c0_111] : memref<1x2x8x32xf32, #tpu.memory_space<vmem>>, vector<1x1x8x32xf32>
    %319 = vector.shape_cast %318 : vector<1x1x8x32xf32> to vector<8x32xf32>
    %c0_i32_112 = arith.constant 0 : i32
    %c8_i32_113 = arith.constant 8 : i32
    %320 = arith.muli %c0_i32_112, %c8_i32_113 : i32
    %321 = tpu.assume_multiple %320, 8 : i32
    %322 = arith.index_cast %321 : i32 to index
    %c0_114 = arith.constant 0 : index
    %323 = vector.load %arg15[%322, %c0_114] : memref<64x96xf32, #tpu.memory_space<vmem>>, vector<8x96xf32>
    %cst_115 = arith.constant dense<0.000000e+00> : vector<8x96xf32>
    %324 = tpu.matmul %319, %313, %cst_115 {dimension_numbers = #tpu.dot_dimension_numbers<[1], [0], [0], [1], [0, 0, 1, 1], [], []>} : vector<8x32xf32>, vector<32x96xf32>, vector<8x96xf32> -> vector<8x96xf32>
    %325 = vector.extract_strided_slice %323 {offsets = [0, 0], sizes = [8, 32], strides = [1, 1]} : vector<8x96xf32> to vector<8x32xf32>
    %326 = vector.extract_strided_slice %324 {offsets = [0, 0], sizes = [8, 32], strides = [1, 1]} : vector<8x96xf32> to vector<8x32xf32>
    %327 = arith.addf %325, %326 : vector<8x32xf32>
    %328 = arith.negf %327 : vector<8x32xf32>
    %329 = math.exp %328 : vector<8x32xf32>
    %cst_116 = arith.constant 1.000000e+00 : f32
    %330 = vector.broadcast %cst_116 : f32 to vector<8x32xf32>
    %331 = arith.addf %330, %329 : vector<8x32xf32>
    %332 = arith.divf %330, %331 : vector<8x32xf32>
    %333 = vector.extract_strided_slice %323 {offsets = [0, 32], sizes = [8, 32], strides = [1, 1]} : vector<8x96xf32> to vector<8x32xf32>
    %334 = vector.extract_strided_slice %324 {offsets = [0, 32], sizes = [8, 32], strides = [1, 1]} : vector<8x96xf32> to vector<8x32xf32>
    %335 = arith.addf %333, %334 : vector<8x32xf32>
    %336 = arith.negf %335 : vector<8x32xf32>
    %337 = math.exp %336 : vector<8x32xf32>
    %cst_117 = arith.constant 1.000000e+00 : f32
    %338 = vector.broadcast %cst_117 : f32 to vector<8x32xf32>
    %339 = arith.addf %338, %337 : vector<8x32xf32>
    %340 = arith.divf %338, %339 : vector<8x32xf32>
    %341 = vector.extract_strided_slice %323 {offsets = [0, 64], sizes = [8, 32], strides = [1, 1]} : vector<8x96xf32> to vector<8x32xf32>
    %342 = vector.extract_strided_slice %324 {offsets = [0, 64], sizes = [8, 32], strides = [1, 1]} : vector<8x96xf32> to vector<8x32xf32>
    %343 = arith.addf %342, %317 : vector<8x32xf32>
    %344 = arith.mulf %332, %343 : vector<8x32xf32>
    %345 = arith.addf %341, %344 : vector<8x32xf32>
    %346 = math.tanh %345 : vector<8x32xf32>
    %cst_118 = arith.constant 1.000000e+00 : f32
    %347 = vector.broadcast %cst_118 : f32 to vector<8x32xf32>
    %348 = arith.subf %347, %340 : vector<8x32xf32>
    %349 = arith.mulf %348, %346 : vector<8x32xf32>
    %350 = arith.mulf %340, %319 : vector<8x32xf32>
    %351 = arith.addf %349, %350 : vector<8x32xf32>
    %352 = arith.index_cast %321 : i32 to index
    %c0_119 = arith.constant 0 : index
    %353 = vector.load %arg14[%352, %c0_119] : memref<64x32xf32, #tpu.memory_space<vmem>>, vector<8x32xf32>
    tpu.vector_store %arg14[%352, %c0_119], %351 {strides = array<i32>} : memref<64x32xf32, #tpu.memory_space<vmem>>, vector<8x32xf32>,
    %c1_i32_120 = arith.constant 1 : i32
    %c8_i32_121 = arith.constant 8 : i32
    %354 = arith.muli %c1_i32_120, %c8_i32_121 : i32
    %355 = tpu.assume_multiple %354, 8 : i32
    %356 = arith.index_cast %355 : i32 to index
    %c0_122 = arith.constant 0 : index
    %357 = vector.load %arg15[%356, %c0_122] : memref<64x96xf32, #tpu.memory_space<vmem>>, vector<8x96xf32>
    %cst_123 = arith.constant dense<0.000000e+00> : vector<8x96xf32>
    %358 = tpu.matmul %351, %313, %cst_123 {dimension_numbers = #tpu.dot_dimension_numbers<[1], [0], [0], [1], [0, 0, 1, 1], [], []>} : vector<8x32xf32>, vector<32x96xf32>, vector<8x96xf32> -> vector<8x96xf32>
    %359 = vector.extract_strided_slice %357 {offsets = [0, 0], sizes = [8, 32], strides = [1, 1]} : vector<8x96xf32> to vector<8x32xf32>
    %360 = vector.extract_strided_slice %358 {offsets = [0, 0], sizes = [8, 32], strides = [1, 1]} : vector<8x96xf32> to vector<8x32xf32>
    %361 = arith.addf %359, %360 : vector<8x32xf32>
    %362 = arith.negf %361 : vector<8x32xf32>
    %363 = math.exp %362 : vector<8x32xf32>
    %cst_124 = arith.constant 1.000000e+00 : f32
    %364 = vector.broadcast %cst_124 : f32 to vector<8x32xf32>
    %365 = arith.addf %364, %363 : vector<8x32xf32>
    %366 = arith.divf %364, %365 : vector<8x32xf32>
    %367 = vector.extract_strided_slice %357 {offsets = [0, 32], sizes = [8, 32], strides = [1, 1]} : vector<8x96xf32> to vector<8x32xf32>
    %368 = vector.extract_strided_slice %358 {offsets = [0, 32], sizes = [8, 32], strides = [1, 1]} : vector<8x96xf32> to vector<8x32xf32>
    %369 = arith.addf %367, %368 : vector<8x32xf32>
    %370 = arith.negf %369 : vector<8x32xf32>
    %371 = math.exp %370 : vector<8x32xf32>
    %cst_125 = arith.constant 1.000000e+00 : f32
    %372 = vector.broadcast %cst_125 : f32 to vector<8x32xf32>
    %373 = arith.addf %372, %371 : vector<8x32xf32>
    %374 = arith.divf %372, %373 : vector<8x32xf32>
    %375 = vector.extract_strided_slice %357 {offsets = [0, 64], sizes = [8, 32], strides = [1, 1]} : vector<8x96xf32> to vector<8x32xf32>
    %376 = vector.extract_strided_slice %358 {offsets = [0, 64], sizes = [8, 32], strides = [1, 1]} : vector<8x96xf32> to vector<8x32xf32>
    %377 = arith.addf %376, %317 : vector<8x32xf32>
    %378 = arith.mulf %366, %377 : vector<8x32xf32>
    %379 = arith.addf %375, %378 : vector<8x32xf32>
    %380 = math.tanh %379 : vector<8x32xf32>
    %cst_126 = arith.constant 1.000000e+00 : f32
    %381 = vector.broadcast %cst_126 : f32 to vector<8x32xf32>
    %382 = arith.subf %381, %374 : vector<8x32xf32>
    %383 = arith.mulf %382, %380 : vector<8x32xf32>
    %384 = arith.mulf %374, %351 : vector<8x32xf32>
    %385 = arith.addf %383, %384 : vector<8x32xf32>
    %386 = arith.index_cast %355 : i32 to index
    %c0_127 = arith.constant 0 : index
    %387 = vector.load %arg14[%386, %c0_127] : memref<64x32xf32, #tpu.memory_space<vmem>>, vector<8x32xf32>
    tpu.vector_store %arg14[%386, %c0_127], %385 {strides = array<i32>} : memref<64x32xf32, #tpu.memory_space<vmem>>, vector<8x32xf32>,
    %c2_i32_128 = arith.constant 2 : i32
    %c8_i32_129 = arith.constant 8 : i32
    %388 = arith.muli %c2_i32_128, %c8_i32_129 : i32
    %389 = tpu.assume_multiple %388, 8 : i32
    %390 = arith.index_cast %389 : i32 to index
    %c0_130 = arith.constant 0 : index
    %391 = vector.load %arg15[%390, %c0_130] : memref<64x96xf32, #tpu.memory_space<vmem>>, vector<8x96xf32>
    %cst_131 = arith.constant dense<0.000000e+00> : vector<8x96xf32>
    %392 = tpu.matmul %385, %313, %cst_131 {dimension_numbers = #tpu.dot_dimension_numbers<[1], [0], [0], [1], [0, 0, 1, 1], [], []>} : vector<8x32xf32>, vector<32x96xf32>, vector<8x96xf32> -> vector<8x96xf32>
    %393 = vector.extract_strided_slice %391 {offsets = [0, 0], sizes = [8, 32], strides = [1, 1]} : vector<8x96xf32> to vector<8x32xf32>
    %394 = vector.extract_strided_slice %392 {offsets = [0, 0], sizes = [8, 32], strides = [1, 1]} : vector<8x96xf32> to vector<8x32xf32>
    %395 = arith.addf %393, %394 : vector<8x32xf32>
    %396 = arith.negf %395 : vector<8x32xf32>
    %397 = math.exp %396 : vector<8x32xf32>
    %cst_132 = arith.constant 1.000000e+00 : f32
    %398 = vector.broadcast %cst_132 : f32 to vector<8x32xf32>
    %399 = arith.addf %398, %397 : vector<8x32xf32>
    %400 = arith.divf %398, %399 : vector<8x32xf32>
    %401 = vector.extract_strided_slice %391 {offsets = [0, 32], sizes = [8, 32], strides = [1, 1]} : vector<8x96xf32> to vector<8x32xf32>
    %402 = vector.extract_strided_slice %392 {offsets = [0, 32], sizes = [8, 32], strides = [1, 1]} : vector<8x96xf32> to vector<8x32xf32>
    %403 = arith.addf %401, %402 : vector<8x32xf32>
    %404 = arith.negf %403 : vector<8x32xf32>
    %405 = math.exp %404 : vector<8x32xf32>
    %cst_133 = arith.constant 1.000000e+00 : f32
    %406 = vector.broadcast %cst_133 : f32 to vector<8x32xf32>
    %407 = arith.addf %406, %405 : vector<8x32xf32>
    %408 = arith.divf %406, %407 : vector<8x32xf32>
    %409 = vector.extract_strided_slice %391 {offsets = [0, 64], sizes = [8, 32], strides = [1, 1]} : vector<8x96xf32> to vector<8x32xf32>
    %410 = vector.extract_strided_slice %392 {offsets = [0, 64], sizes = [8, 32], strides = [1, 1]} : vector<8x96xf32> to vector<8x32xf32>
    %411 = arith.addf %410, %317 : vector<8x32xf32>
    %412 = arith.mulf %400, %411 : vector<8x32xf32>
    %413 = arith.addf %409, %412 : vector<8x32xf32>
    %414 = math.tanh %413 : vector<8x32xf32>
    %cst_134 = arith.constant 1.000000e+00 : f32
    %415 = vector.broadcast %cst_134 : f32 to vector<8x32xf32>
    %416 = arith.subf %415, %408 : vector<8x32xf32>
    %417 = arith.mulf %416, %414 : vector<8x32xf32>
    %418 = arith.mulf %408, %385 : vector<8x32xf32>
    %419 = arith.addf %417, %418 : vector<8x32xf32>
    %420 = arith.index_cast %389 : i32 to index
    %c0_135 = arith.constant 0 : index
    %421 = vector.load %arg14[%420, %c0_135] : memref<64x32xf32, #tpu.memory_space<vmem>>, vector<8x32xf32>
    tpu.vector_store %arg14[%420, %c0_135], %419 {strides = array<i32>} : memref<64x32xf32, #tpu.memory_space<vmem>>, vector<8x32xf32>,
    %c3_i32_136 = arith.constant 3 : i32
    %c8_i32_137 = arith.constant 8 : i32
    %422 = arith.muli %c3_i32_136, %c8_i32_137 : i32
    %423 = tpu.assume_multiple %422, 8 : i32
    %424 = arith.index_cast %423 : i32 to index
    %c0_138 = arith.constant 0 : index
    %425 = vector.load %arg15[%424, %c0_138] : memref<64x96xf32, #tpu.memory_space<vmem>>, vector<8x96xf32>
    %cst_139 = arith.constant dense<0.000000e+00> : vector<8x96xf32>
    %426 = tpu.matmul %419, %313, %cst_139 {dimension_numbers = #tpu.dot_dimension_numbers<[1], [0], [0], [1], [0, 0, 1, 1], [], []>} : vector<8x32xf32>, vector<32x96xf32>, vector<8x96xf32> -> vector<8x96xf32>
    %427 = vector.extract_strided_slice %425 {offsets = [0, 0], sizes = [8, 32], strides = [1, 1]} : vector<8x96xf32> to vector<8x32xf32>
    %428 = vector.extract_strided_slice %426 {offsets = [0, 0], sizes = [8, 32], strides = [1, 1]} : vector<8x96xf32> to vector<8x32xf32>
    %429 = arith.addf %427, %428 : vector<8x32xf32>
    %430 = arith.negf %429 : vector<8x32xf32>
    %431 = math.exp %430 : vector<8x32xf32>
    %cst_140 = arith.constant 1.000000e+00 : f32
    %432 = vector.broadcast %cst_140 : f32 to vector<8x32xf32>
    %433 = arith.addf %432, %431 : vector<8x32xf32>
    %434 = arith.divf %432, %433 : vector<8x32xf32>
    %435 = vector.extract_strided_slice %425 {offsets = [0, 32], sizes = [8, 32], strides = [1, 1]} : vector<8x96xf32> to vector<8x32xf32>
    %436 = vector.extract_strided_slice %426 {offsets = [0, 32], sizes = [8, 32], strides = [1, 1]} : vector<8x96xf32> to vector<8x32xf32>
    %437 = arith.addf %435, %436 : vector<8x32xf32>
    %438 = arith.negf %437 : vector<8x32xf32>
    %439 = math.exp %438 : vector<8x32xf32>
    %cst_141 = arith.constant 1.000000e+00 : f32
    %440 = vector.broadcast %cst_141 : f32 to vector<8x32xf32>
    %441 = arith.addf %440, %439 : vector<8x32xf32>
    %442 = arith.divf %440, %441 : vector<8x32xf32>
    %443 = vector.extract_strided_slice %425 {offsets = [0, 64], sizes = [8, 32], strides = [1, 1]} : vector<8x96xf32> to vector<8x32xf32>
    %444 = vector.extract_strided_slice %426 {offsets = [0, 64], sizes = [8, 32], strides = [1, 1]} : vector<8x96xf32> to vector<8x32xf32>
    %445 = arith.addf %444, %317 : vector<8x32xf32>
    %446 = arith.mulf %434, %445 : vector<8x32xf32>
    %447 = arith.addf %443, %446 : vector<8x32xf32>
    %448 = math.tanh %447 : vector<8x32xf32>
    %cst_142 = arith.constant 1.000000e+00 : f32
    %449 = vector.broadcast %cst_142 : f32 to vector<8x32xf32>
    %450 = arith.subf %449, %442 : vector<8x32xf32>
    %451 = arith.mulf %450, %448 : vector<8x32xf32>
    %452 = arith.mulf %442, %419 : vector<8x32xf32>
    %453 = arith.addf %451, %452 : vector<8x32xf32>
    %454 = arith.index_cast %423 : i32 to index
    %c0_143 = arith.constant 0 : index
    %455 = vector.load %arg14[%454, %c0_143] : memref<64x32xf32, #tpu.memory_space<vmem>>, vector<8x32xf32>
    tpu.vector_store %arg14[%454, %c0_143], %453 {strides = array<i32>} : memref<64x32xf32, #tpu.memory_space<vmem>>, vector<8x32xf32>,
    %c4_i32_144 = arith.constant 4 : i32
    %c8_i32_145 = arith.constant 8 : i32
    %456 = arith.muli %c4_i32_144, %c8_i32_145 : i32
    %457 = tpu.assume_multiple %456, 8 : i32
    %458 = arith.index_cast %457 : i32 to index
    %c0_146 = arith.constant 0 : index
    %459 = vector.load %arg15[%458, %c0_146] : memref<64x96xf32, #tpu.memory_space<vmem>>, vector<8x96xf32>
    %cst_147 = arith.constant dense<0.000000e+00> : vector<8x96xf32>
    %460 = tpu.matmul %453, %313, %cst_147 {dimension_numbers = #tpu.dot_dimension_numbers<[1], [0], [0], [1], [0, 0, 1, 1], [], []>} : vector<8x32xf32>, vector<32x96xf32>, vector<8x96xf32> -> vector<8x96xf32>
    %461 = vector.extract_strided_slice %459 {offsets = [0, 0], sizes = [8, 32], strides = [1, 1]} : vector<8x96xf32> to vector<8x32xf32>
    %462 = vector.extract_strided_slice %460 {offsets = [0, 0], sizes = [8, 32], strides = [1, 1]} : vector<8x96xf32> to vector<8x32xf32>
    %463 = arith.addf %461, %462 : vector<8x32xf32>
    %464 = arith.negf %463 : vector<8x32xf32>
    %465 = math.exp %464 : vector<8x32xf32>
    %cst_148 = arith.constant 1.000000e+00 : f32
    %466 = vector.broadcast %cst_148 : f32 to vector<8x32xf32>
    %467 = arith.addf %466, %465 : vector<8x32xf32>
    %468 = arith.divf %466, %467 : vector<8x32xf32>
    %469 = vector.extract_strided_slice %459 {offsets = [0, 32], sizes = [8, 32], strides = [1, 1]} : vector<8x96xf32> to vector<8x32xf32>
    %470 = vector.extract_strided_slice %460 {offsets = [0, 32], sizes = [8, 32], strides = [1, 1]} : vector<8x96xf32> to vector<8x32xf32>
    %471 = arith.addf %469, %470 : vector<8x32xf32>
    %472 = arith.negf %471 : vector<8x32xf32>
    %473 = math.exp %472 : vector<8x32xf32>
    %cst_149 = arith.constant 1.000000e+00 : f32
    %474 = vector.broadcast %cst_149 : f32 to vector<8x32xf32>
    %475 = arith.addf %474, %473 : vector<8x32xf32>
    %476 = arith.divf %474, %475 : vector<8x32xf32>
    %477 = vector.extract_strided_slice %459 {offsets = [0, 64], sizes = [8, 32], strides = [1, 1]} : vector<8x96xf32> to vector<8x32xf32>
    %478 = vector.extract_strided_slice %460 {offsets = [0, 64], sizes = [8, 32], strides = [1, 1]} : vector<8x96xf32> to vector<8x32xf32>
    %479 = arith.addf %478, %317 : vector<8x32xf32>
    %480 = arith.mulf %468, %479 : vector<8x32xf32>
    %481 = arith.addf %477, %480 : vector<8x32xf32>
    %482 = math.tanh %481 : vector<8x32xf32>
    %cst_150 = arith.constant 1.000000e+00 : f32
    %483 = vector.broadcast %cst_150 : f32 to vector<8x32xf32>
    %484 = arith.subf %483, %476 : vector<8x32xf32>
    %485 = arith.mulf %484, %482 : vector<8x32xf32>
    %486 = arith.mulf %476, %453 : vector<8x32xf32>
    %487 = arith.addf %485, %486 : vector<8x32xf32>
    %488 = arith.index_cast %457 : i32 to index
    %c0_151 = arith.constant 0 : index
    %489 = vector.load %arg14[%488, %c0_151] : memref<64x32xf32, #tpu.memory_space<vmem>>, vector<8x32xf32>
    tpu.vector_store %arg14[%488, %c0_151], %487 {strides = array<i32>} : memref<64x32xf32, #tpu.memory_space<vmem>>, vector<8x32xf32>,
    %c5_i32_152 = arith.constant 5 : i32
    %c8_i32_153 = arith.constant 8 : i32
    %490 = arith.muli %c5_i32_152, %c8_i32_153 : i32
    %491 = tpu.assume_multiple %490, 8 : i32
    %492 = arith.index_cast %491 : i32 to index
    %c0_154 = arith.constant 0 : index
    %493 = vector.load %arg15[%492, %c0_154] : memref<64x96xf32, #tpu.memory_space<vmem>>, vector<8x96xf32>
    %cst_155 = arith.constant dense<0.000000e+00> : vector<8x96xf32>
    %494 = tpu.matmul %487, %313, %cst_155 {dimension_numbers = #tpu.dot_dimension_numbers<[1], [0], [0], [1], [0, 0, 1, 1], [], []>} : vector<8x32xf32>, vector<32x96xf32>, vector<8x96xf32> -> vector<8x96xf32>
    %495 = vector.extract_strided_slice %493 {offsets = [0, 0], sizes = [8, 32], strides = [1, 1]} : vector<8x96xf32> to vector<8x32xf32>
    %496 = vector.extract_strided_slice %494 {offsets = [0, 0], sizes = [8, 32], strides = [1, 1]} : vector<8x96xf32> to vector<8x32xf32>
    %497 = arith.addf %495, %496 : vector<8x32xf32>
    %498 = arith.negf %497 : vector<8x32xf32>
    %499 = math.exp %498 : vector<8x32xf32>
    %cst_156 = arith.constant 1.000000e+00 : f32
    %500 = vector.broadcast %cst_156 : f32 to vector<8x32xf32>
    %501 = arith.addf %500, %499 : vector<8x32xf32>
    %502 = arith.divf %500, %501 : vector<8x32xf32>
    %503 = vector.extract_strided_slice %493 {offsets = [0, 32], sizes = [8, 32], strides = [1, 1]} : vector<8x96xf32> to vector<8x32xf32>
    %504 = vector.extract_strided_slice %494 {offsets = [0, 32], sizes = [8, 32], strides = [1, 1]} : vector<8x96xf32> to vector<8x32xf32>
    %505 = arith.addf %503, %504 : vector<8x32xf32>
    %506 = arith.negf %505 : vector<8x32xf32>
    %507 = math.exp %506 : vector<8x32xf32>
    %cst_157 = arith.constant 1.000000e+00 : f32
    %508 = vector.broadcast %cst_157 : f32 to vector<8x32xf32>
    %509 = arith.addf %508, %507 : vector<8x32xf32>
    %510 = arith.divf %508, %509 : vector<8x32xf32>
    %511 = vector.extract_strided_slice %493 {offsets = [0, 64], sizes = [8, 32], strides = [1, 1]} : vector<8x96xf32> to vector<8x32xf32>
    %512 = vector.extract_strided_slice %494 {offsets = [0, 64], sizes = [8, 32], strides = [1, 1]} : vector<8x96xf32> to vector<8x32xf32>
    %513 = arith.addf %512, %317 : vector<8x32xf32>
    %514 = arith.mulf %502, %513 : vector<8x32xf32>
    %515 = arith.addf %511, %514 : vector<8x32xf32>
    %516 = math.tanh %515 : vector<8x32xf32>
    %cst_158 = arith.constant 1.000000e+00 : f32
    %517 = vector.broadcast %cst_158 : f32 to vector<8x32xf32>
    %518 = arith.subf %517, %510 : vector<8x32xf32>
    %519 = arith.mulf %518, %516 : vector<8x32xf32>
    %520 = arith.mulf %510, %487 : vector<8x32xf32>
    %521 = arith.addf %519, %520 : vector<8x32xf32>
    %522 = arith.index_cast %491 : i32 to index
    %c0_159 = arith.constant 0 : index
    %523 = vector.load %arg14[%522, %c0_159] : memref<64x32xf32, #tpu.memory_space<vmem>>, vector<8x32xf32>
    tpu.vector_store %arg14[%522, %c0_159], %521 {strides = array<i32>} : memref<64x32xf32, #tpu.memory_space<vmem>>, vector<8x32xf32>,
    %c6_i32_160 = arith.constant 6 : i32
    %c8_i32_161 = arith.constant 8 : i32
    %524 = arith.muli %c6_i32_160, %c8_i32_161 : i32
    %525 = tpu.assume_multiple %524, 8 : i32
    %526 = arith.index_cast %525 : i32 to index
    %c0_162 = arith.constant 0 : index
    %527 = vector.load %arg15[%526, %c0_162] : memref<64x96xf32, #tpu.memory_space<vmem>>, vector<8x96xf32>
    %cst_163 = arith.constant dense<0.000000e+00> : vector<8x96xf32>
    %528 = tpu.matmul %521, %313, %cst_163 {dimension_numbers = #tpu.dot_dimension_numbers<[1], [0], [0], [1], [0, 0, 1, 1], [], []>} : vector<8x32xf32>, vector<32x96xf32>, vector<8x96xf32> -> vector<8x96xf32>
    %529 = vector.extract_strided_slice %527 {offsets = [0, 0], sizes = [8, 32], strides = [1, 1]} : vector<8x96xf32> to vector<8x32xf32>
    %530 = vector.extract_strided_slice %528 {offsets = [0, 0], sizes = [8, 32], strides = [1, 1]} : vector<8x96xf32> to vector<8x32xf32>
    %531 = arith.addf %529, %530 : vector<8x32xf32>
    %532 = arith.negf %531 : vector<8x32xf32>
    %533 = math.exp %532 : vector<8x32xf32>
    %cst_164 = arith.constant 1.000000e+00 : f32
    %534 = vector.broadcast %cst_164 : f32 to vector<8x32xf32>
    %535 = arith.addf %534, %533 : vector<8x32xf32>
    %536 = arith.divf %534, %535 : vector<8x32xf32>
    %537 = vector.extract_strided_slice %527 {offsets = [0, 32], sizes = [8, 32], strides = [1, 1]} : vector<8x96xf32> to vector<8x32xf32>
    %538 = vector.extract_strided_slice %528 {offsets = [0, 32], sizes = [8, 32], strides = [1, 1]} : vector<8x96xf32> to vector<8x32xf32>
    %539 = arith.addf %537, %538 : vector<8x32xf32>
    %540 = arith.negf %539 : vector<8x32xf32>
    %541 = math.exp %540 : vector<8x32xf32>
    %cst_165 = arith.constant 1.000000e+00 : f32
    %542 = vector.broadcast %cst_165 : f32 to vector<8x32xf32>
    %543 = arith.addf %542, %541 : vector<8x32xf32>
    %544 = arith.divf %542, %543 : vector<8x32xf32>
    %545 = vector.extract_strided_slice %527 {offsets = [0, 64], sizes = [8, 32], strides = [1, 1]} : vector<8x96xf32> to vector<8x32xf32>
    %546 = vector.extract_strided_slice %528 {offsets = [0, 64], sizes = [8, 32], strides = [1, 1]} : vector<8x96xf32> to vector<8x32xf32>
    %547 = arith.addf %546, %317 : vector<8x32xf32>
    %548 = arith.mulf %536, %547 : vector<8x32xf32>
    %549 = arith.addf %545, %548 : vector<8x32xf32>
    %550 = math.tanh %549 : vector<8x32xf32>
    %cst_166 = arith.constant 1.000000e+00 : f32
    %551 = vector.broadcast %cst_166 : f32 to vector<8x32xf32>
    %552 = arith.subf %551, %544 : vector<8x32xf32>
    %553 = arith.mulf %552, %550 : vector<8x32xf32>
    %554 = arith.mulf %544, %521 : vector<8x32xf32>
    %555 = arith.addf %553, %554 : vector<8x32xf32>
    %556 = arith.index_cast %525 : i32 to index
    %c0_167 = arith.constant 0 : index
    %557 = vector.load %arg14[%556, %c0_167] : memref<64x32xf32, #tpu.memory_space<vmem>>, vector<8x32xf32>
    tpu.vector_store %arg14[%556, %c0_167], %555 {strides = array<i32>} : memref<64x32xf32, #tpu.memory_space<vmem>>, vector<8x32xf32>,
    %c7_i32_168 = arith.constant 7 : i32
    %c8_i32_169 = arith.constant 8 : i32
    %558 = arith.muli %c7_i32_168, %c8_i32_169 : i32
    %559 = tpu.assume_multiple %558, 8 : i32
    %560 = arith.index_cast %559 : i32 to index
    %c0_170 = arith.constant 0 : index
    %561 = vector.load %arg15[%560, %c0_170] : memref<64x96xf32, #tpu.memory_space<vmem>>, vector<8x96xf32>
    %cst_171 = arith.constant dense<0.000000e+00> : vector<8x96xf32>
    %562 = tpu.matmul %555, %313, %cst_171 {dimension_numbers = #tpu.dot_dimension_numbers<[1], [0], [0], [1], [0, 0, 1, 1], [], []>} : vector<8x32xf32>, vector<32x96xf32>, vector<8x96xf32> -> vector<8x96xf32>
    %563 = vector.extract_strided_slice %561 {offsets = [0, 0], sizes = [8, 32], strides = [1, 1]} : vector<8x96xf32> to vector<8x32xf32>
    %564 = vector.extract_strided_slice %562 {offsets = [0, 0], sizes = [8, 32], strides = [1, 1]} : vector<8x96xf32> to vector<8x32xf32>
    %565 = arith.addf %563, %564 : vector<8x32xf32>
    %566 = arith.negf %565 : vector<8x32xf32>
    %567 = math.exp %566 : vector<8x32xf32>
    %cst_172 = arith.constant 1.000000e+00 : f32
    %568 = vector.broadcast %cst_172 : f32 to vector<8x32xf32>
    %569 = arith.addf %568, %567 : vector<8x32xf32>
    %570 = arith.divf %568, %569 : vector<8x32xf32>
    %571 = vector.extract_strided_slice %561 {offsets = [0, 32], sizes = [8, 32], strides = [1, 1]} : vector<8x96xf32> to vector<8x32xf32>
    %572 = vector.extract_strided_slice %562 {offsets = [0, 32], sizes = [8, 32], strides = [1, 1]} : vector<8x96xf32> to vector<8x32xf32>
    %573 = arith.addf %571, %572 : vector<8x32xf32>
    %574 = arith.negf %573 : vector<8x32xf32>
    %575 = math.exp %574 : vector<8x32xf32>
    %cst_173 = arith.constant 1.000000e+00 : f32
    %576 = vector.broadcast %cst_173 : f32 to vector<8x32xf32>
    %577 = arith.addf %576, %575 : vector<8x32xf32>
    %578 = arith.divf %576, %577 : vector<8x32xf32>
    %579 = vector.extract_strided_slice %561 {offsets = [0, 64], sizes = [8, 32], strides = [1, 1]} : vector<8x96xf32> to vector<8x32xf32>
    %580 = vector.extract_strided_slice %562 {offsets = [0, 64], sizes = [8, 32], strides = [1, 1]} : vector<8x96xf32> to vector<8x32xf32>
    %581 = arith.addf %580, %317 : vector<8x32xf32>
    %582 = arith.mulf %570, %581 : vector<8x32xf32>
    %583 = arith.addf %579, %582 : vector<8x32xf32>
    %584 = math.tanh %583 : vector<8x32xf32>
    %cst_174 = arith.constant 1.000000e+00 : f32
    %585 = vector.broadcast %cst_174 : f32 to vector<8x32xf32>
    %586 = arith.subf %585, %578 : vector<8x32xf32>
    %587 = arith.mulf %586, %584 : vector<8x32xf32>
    %588 = arith.mulf %578, %555 : vector<8x32xf32>
    %589 = arith.addf %587, %588 : vector<8x32xf32>
    %590 = arith.index_cast %559 : i32 to index
    %c0_175 = arith.constant 0 : index
    %591 = vector.load %arg14[%590, %c0_175] : memref<64x32xf32, #tpu.memory_space<vmem>>, vector<8x32xf32>
    tpu.vector_store %arg14[%590, %c0_175], %589 {strides = array<i32>} : memref<64x32xf32, #tpu.memory_space<vmem>>, vector<8x32xf32>,
    %c8_i32_176 = arith.constant 8 : i32
    %c0_177 = arith.constant 0 : index
    %c1_178 = arith.constant 1 : index
    %c0_179 = arith.constant 0 : index
    %c0_180 = arith.constant 0 : index
    %592 = vector.load %arg13[%c0_177, %c1_178, %c0_179, %c0_180] : memref<1x2x8x32xf32, #tpu.memory_space<vmem>>, vector<1x1x8x32xf32>
    %593 = vector.shape_cast %592 : vector<1x1x8x32xf32> to vector<8x32xf32>
    %594 = vector.shape_cast %589 : vector<8x32xf32> to vector<1x1x8x32xf32>
    tpu.vector_store %arg13[%c0_177, %c1_178, %c0_179, %c0_180], %594 {strides = array<i32>} : memref<1x2x8x32xf32, #tpu.memory_space<vmem>>, vector<1x1x8x32xf32>,
    %c0_181 = arith.constant 0 : index
    %c0_182 = arith.constant 0 : index
    %595 = vector.load %arg14[%c0_181, %c0_182] : memref<64x32xf32, #tpu.memory_space<vmem>>, vector<64x32xf32>
    %c0_183 = arith.constant 0 : index
    %c0_184 = arith.constant 0 : index
    %596 = vector.load %arg10[%c0_183, %c0_184] : memref<32x128xf32, #tpu.memory_space<vmem>>, vector<32x128xf32>
    %cst_185 = arith.constant dense<0.000000e+00> : vector<64x128xf32>
    %597 = tpu.matmul %595, %596, %cst_185 {dimension_numbers = #tpu.dot_dimension_numbers<[1], [0], [0], [1], [0, 0, 1, 1], [], []>} : vector<64x32xf32>, vector<32x128xf32>, vector<64x128xf32> -> vector<64x128xf32>
    %c0_186 = arith.constant 0 : index
    %c0_187 = arith.constant 0 : index
    %598 = vector.load %arg11[%c0_186, %c0_187] : memref<1x128xf32, #tpu.memory_space<vmem>>, vector<1x128xf32>
    %599 = vector.broadcast %598 : vector<1x128xf32> to vector<64x128xf32>
    %600 = arith.addf %597, %599 : vector<64x128xf32>
    %c0_188 = arith.constant 0 : index
    %c0_189 = arith.constant 0 : index
    %c0_190 = arith.constant 0 : index
    %601 = vector.load %arg12[%c0_188, %c0_189, %c0_190] : memref<1x64x128xf32, #tpu.memory_space<vmem>>, vector<1x64x128xf32>
    %602 = vector.shape_cast %601 : vector<1x64x128xf32> to vector<64x128xf32>
    %603 = vector.shape_cast %600 : vector<64x128xf32> to vector<1x64x128xf32>
    tpu.vector_store %arg12[%c0_188, %c0_189, %c0_190], %603 {strides = array<i32>} : memref<1x64x128xf32, #tpu.memory_space<vmem>>, vector<1x64x128xf32>,
    return
  }
  func.func @transform_0(%arg0: i32) -> (i32, i32, i32) {
    %c0_i32 = arith.constant 0 : i32
    %c0_i32_0 = arith.constant 0 : i32
    %c0_i32_1 = arith.constant 0 : i32
    return %arg0, %c0_i32, %c0_i32_0 : i32, i32, i32
  }
  func.func @transform_1(%arg0: i32) -> (i32, i32, i32) {
    %c0_i32 = arith.constant 0 : i32
    %c0_i32_0 = arith.constant 0 : i32
    %c0_i32_1 = arith.constant 0 : i32
    return %arg0, %c0_i32, %c0_i32_0 : i32, i32, i32
  }
  func.func @transform_2(%arg0: i32) -> (i32, i32, i32, i32) {
    %c0_i32 = arith.constant 0 : i32
    %c0_i32_0 = arith.constant 0 : i32
    %c0_i32_1 = arith.constant 0 : i32
    %c0_i32_2 = arith.constant 0 : i32
    return %arg0, %c0_i32, %c0_i32_0, %c0_i32_1 : i32, i32, i32, i32
  }
  func.func @transform_3(%arg0: i32) -> (i32, i32) {
    %c0_i32 = arith.constant 0 : i32
    %c0_i32_0 = arith.constant 0 : i32
    %c0_i32_1 = arith.constant 0 : i32
    return %c0_i32, %c0_i32_0 : i32, i32
  }
  func.func @transform_4(%arg0: i32) -> (i32, i32) {
    %c0_i32 = arith.constant 0 : i32
    %c0_i32_0 = arith.constant 0 : i32
    %c0_i32_1 = arith.constant 0 : i32
    return %c0_i32, %c0_i32_0 : i32, i32
  }
  func.func @transform_5(%arg0: i32) -> (i32, i32, i32) {
    %c0_i32 = arith.constant 0 : i32
    %c0_i32_0 = arith.constant 0 : i32
    %c0_i32_1 = arith.constant 0 : i32
    %c0_i32_2 = arith.constant 0 : i32
    return %c0_i32, %c0_i32_0, %c0_i32_1 : i32, i32, i32
  }
  func.func @transform_6(%arg0: i32) -> (i32, i32, i32) {
    %c0_i32 = arith.constant 0 : i32
    %c0_i32_0 = arith.constant 0 : i32
    %c0_i32_1 = arith.constant 0 : i32
    %c0_i32_2 = arith.constant 0 : i32
    return %c0_i32, %c0_i32_0, %c0_i32_1 : i32, i32, i32
  }
  func.func @transform_7(%arg0: i32) -> (i32, i32, i32) {
    %c0_i32 = arith.constant 0 : i32
    %c0_i32_0 = arith.constant 0 : i32
    %c0_i32_1 = arith.constant 0 : i32
    %c0_i32_2 = arith.constant 0 : i32
    return %c0_i32, %c0_i32_0, %c0_i32_1 : i32, i32, i32
  }
  func.func @transform_8(%arg0: i32) -> (i32, i32, i32) {
    %c0_i32 = arith.constant 0 : i32
    %c0_i32_0 = arith.constant 0 : i32
    %c0_i32_1 = arith.constant 0 : i32
    %c0_i32_2 = arith.constant 0 : i32
    return %c0_i32, %c0_i32_0, %c0_i32_1 : i32, i32, i32
  }
  func.func @transform_9(%arg0: i32) -> (i32, i32) {
    %c0_i32 = arith.constant 0 : i32
    %c0_i32_0 = arith.constant 0 : i32
    %c0_i32_1 = arith.constant 0 : i32
    return %c0_i32, %c0_i32_0 : i32, i32
  }
  func.func @transform_10(%arg0: i32) -> (i32, i32) {
    %c0_i32 = arith.constant 0 : i32
    %c0_i32_0 = arith.constant 0 : i32
    %c0_i32_1 = arith.constant 0 : i32
    return %c0_i32, %c0_i32_0 : i32, i32
  }
  func.func @transform_11(%arg0: i32) -> (i32, i32, i32) {
    %c0_i32 = arith.constant 0 : i32
    %c0_i32_0 = arith.constant 0 : i32
    %c0_i32_1 = arith.constant 0 : i32
    return %arg0, %c0_i32, %c0_i32_0 : i32, i32, i32
  }
  func.func @transform_12(%arg0: i32) -> (i32, i32, i32, i32) {
    %c0_i32 = arith.constant 0 : i32
    %c0_i32_0 = arith.constant 0 : i32
    %c0_i32_1 = arith.constant 0 : i32
    %c0_i32_2 = arith.constant 0 : i32
    return %arg0, %c0_i32, %c0_i32_0, %c0_i32_1 : i32, i32, i32, i32
  }
}

</mosaic_0001>

<bundles_post_ra>
// kernel: tpu_custom_call.1
= control target key start
LH: loop header
LB: loop body
LE: loop exit
PB: predicated region body
PF: predicated region fallthrough
CT: control target
= control target key end

     0   :  { %18 = vsyncpa [#allocation5], 0  ;;  %s2609_s0 = inlined_call_operand.vmem [shape: f32[1,64,24], index: 0, kind: input, shape index: {}]   ;;  %s2610_s1 = inlined_call_operand.vmem [shape: f32[1,64,32], index: 1, kind: input, shape index: {}]   ;;  %s2611_s2 = inlined_call_operand.hbm [shape: f32[1,2,8,32], index: 2, kind: input, shape index: {}]   ;;  %s2612_s3 = inlined_call_operand.hbm [shape: f32[24,32], index: 3, kind: input, shape index: {}]   ;;  %s2613_s4 = inlined_call_operand.hbm [shape: f32[1,32], index: 4, kind: input, shape index: {}]   ;;  %s2614_s5 = inlined_call_operand.vmem [shape: f32[2,32,96], index: 5, kind: input, shape index: {}]   ;;  %s2615_s6 = inlined_call_operand.vmem [shape: f32[2,32,96], index: 6, kind: input, shape index: {}]   ;;  %s2616_s7 = inlined_call_operand.hbm [shape: f32[2,1,96], index: 7, kind: input, shape index: {}]   ;;  %s2617_s8 = inlined_call_operand.hbm [shape: f32[2,1,32], index: 8, kind: input, shape index: {}]   ;;  %s2618_s9 = inlined_call_operand.vmem [shape: f32[32,128], index: 9, kind: input, shape index: {}]   ;;  %s2619_s10 = inlined_call_operand.hbm [shape: f32[1,128], index: 10, kind: input, shape index: {}]   ;;  %s2620_s11 = inlined_call_operand.hbm [shape: f32[1,64,128], index: 11, kind: output, shape index: {0}]   ;;  %s2621_s12 = inlined_call_operand.hbm [shape: f32[1,2,8,32], index: 12, kind: output, shape index: {1}]  }
   0x1   :  { %19 = vsyncpa [#allocation8], 0 }
   0x2   :  { %20 = vsyncpa [#allocation11], 0 }
   0x3   :  { %21 = vsyncpa [#allocation14], 0 }
   0x4   :  { %22 = vsyncpa [#allocation6], 0 }
   0x5   :  { %23 = vsyncpa [#allocation17], 0  ;;  %s45_s23 = sshll.u32 %s2612_s3, 4  ;;  %s2087_s24 = smov [#allocation7]   ;;  %s46_s23 = int_to_ptr.hbm [resolvable:$true] %s45_s23 }
   0x6   :  { %s47_s25 = sshll.u32 %s2087_s24, 4  ;;  %s73_s28 = sshll.u32 %s2616_s7, 4  ;;  %s48_s25 = int_to_ptr.vmem [resolvable:$true] %s47_s25  ;;  %s74_s28 = int_to_ptr.hbm [resolvable:$true] %s73_s28 }
   0x7   :  { %s2088_s29 = smov 128   ;;  %s2089_s30 = smov 8  }
   0x8   :  { %53 = dma.hbm_to_vmem [thread:$0]  %s46_s23, 384, %s48_s25, [#allocation8], %s2088_s29, %s2088_s29, %s2089_s30  }
   0x9   :  { %s2090_s13 = smov [#allocation10]   ;;  %s2091_s15 = smov 16  }
   0xa   :  { %s75_s14 = sshll.u32 %s2090_s13, 4  ;;  %s2092_s3 = smov 1   ;;  %s76_s14 = int_to_ptr.vmem [resolvable:$true] %s75_s14 }
   0xb   :  { %81 = dma.hbm_to_vmem [thread:$0]  %s74_s28, 32, %s76_s14, [#allocation11], %s2091_s15, %s2091_s15, %s2092_s3  }
   0xc   :  { %s32_s18 = sshll.u32 %s2611_s2, 4  ;;  %s2093_s19 = smov [#allocation4]   ;;  %s33_s18 = int_to_ptr.hbm [resolvable:$true] %s32_s18 }
   0xd   :  { %s34_s7 = sshll.u32 %s2093_s19, 4  ;;  %s59_s22 = sshll.u32 %s2613_s4, 4  ;;  %s35_s7 = int_to_ptr.vmem [resolvable:$true] %s34_s7  ;;  %s60_s22 = int_to_ptr.hbm [resolvable:$true] %s59_s22 }
   0xe   :  { %40 = dma.hbm_to_vmem [thread:$0]  %s33_s18, 256, %s35_s7, [#allocation5], %s2088_s29, %s2088_s29, %s2089_s30  }
   0xf   :  { %s2094_s23 = smov [#allocation9]   ;;  %s86_s27 = sshll.u32 %s2617_s8, 4  ;;  %s87_s27 = int_to_ptr.hbm [resolvable:$true] %s86_s27 }
  0x10   :  { %s61_s24 = sshll.u32 %s2094_s23, 4  ;;  %s102_s13 = sshll.u32 %s2619_s10, 4  ;;  %s62_s24 = int_to_ptr.vmem [resolvable:$true] %s61_s24  ;;  %s103_s13 = int_to_ptr.hbm [resolvable:$true] %s102_s13 }
  0x11   :  { %64 = dma.hbm_to_vmem [thread:$0]  %s60_s22, 16, %s62_s24, [#allocation8]  }
  0x12   :  { %s2095_s14 = smov [#allocation12]   ;;  %s2096_s16 = smov [#allocation13]  }
  0x13   :  { %s88_s4 = sshll.u32 %s2095_s14, 4  ;;  %s104_s17 = sshll.u32 %s2096_s16, 4  ;;  %s89_s4 = int_to_ptr.vmem [resolvable:$true] %s88_s4  ;;  %s105_s17 = int_to_ptr.vmem [resolvable:$true] %s104_s17 }
  0x14   :  { %94 = dma.hbm_to_vmem [thread:$0]  %s87_s27, 32, %s89_s4, [#allocation11], %s2091_s15, %s2091_s15, %s2092_s3  }
  0x15   :  { %107 = dma.hbm_to_vmem [thread:$0]  %s103_s13, 16, %s105_s17, [#allocation14]  }
  0x16   :  { %2075 = dma.done.wait [#allocation5], 256  }
  0x17   :  { %2076 = vsyncadd [#allocation5], 4294967040 }
  0x18   :  { %2077 = dma.done.wait [#allocation8], 400  }
  0x19   :  { %2078 = vsyncadd [#allocation8], 4294966896 }
  0x1a   :  { %2079 = dma.done.wait [#allocation11], 64  }
  0x1b   :  { %2080 = vsyncadd [#allocation11], 4294967232 }
  0x1c   :  { %2081 = dma.done.wait [#allocation14], 16  }
  0x1d   :  { %2082 = vsyncadd [#allocation14], 4294967280  ;;  %v142_v0 = vld [vmem:[#allocation7 + $0x10] sm:$0xff]  ;;  %v141_v1 = vld [vmem:[#allocation7 + $0x8] sm:$0xff]  ;;  %vm147_vm0 = vcmask 195584   ;;  %s2097_s25 = smov 64  }
  0x1e   :  { %185 = vmatpush.msra.mxu0 %v142_v0  ;;  %v2194_v2 = vld [vmem:[%s2615_s6 + $0x18] sm:$0xff]  ;;  %v2199_v3 = vld [vmem:[%s2615_s6 + $0x10] sm:$0xff]  ;;  %v132_v5 = vld [vmem:[%s2609_s0] sm:$0xff]  ;;  %vm229_vm1 = vcmask 261120   ;;  %s2098_s4 = smov 32   ;;  %vm319_vm2 = vcmask 785408  }
  0x1f   :  { %v140_v4 = vld [vmem:[#allocation7] sm:$0xff]  ;;  %352 = vmatpush.msra.mxu2 %v2194_v2  ;;  %v2208_v6 = vld [vmem:[%s2615_s6 + $0x8] sm:$0xff]  ;;  %v249_v8 = vld [vmem:[%s2614_s5 + $0x18] sm:$0xff]  ;;  %s1665_s22 = sshll.u32 %s2621_s12, 4  ;;  %s1652_s27 = sshll.u32 %s2620_s11, 4  ;;  %s1666_s22 = int_to_ptr.hbm [resolvable:$true] %s1665_s22  ;;  %s1653_s27 = int_to_ptr.hbm [resolvable:$true] %s1652_s27 }
  0x20   :  { %186 = vmatpush.msra.mxu0 %v141_v1  ;;  %v1781_v7 = vld [vmem:[#allocation12] ss:$0 sm:$0xff]  ;;  %1758 = vmatpush.msra.mxu1 %v249_v8  ;;  %v2217_v9 = vld [vmem:[%s2615_s6] sm:$0xff]  ;;  %v248_v11 = vld [vmem:[%s2614_s5 + $0x10] sm:$0xff] }
  0x21   :  { %353 = vmatpush.msra.mxu2 %v2199_v3  ;;  %380 = vrot.lane.b32.xlu0 %v1781_v7, %s2097_s25  ;;  %v335_v10 = vld [vmem:[#allocation4] sm:$0xff]  ;;  %v247_v12 = vld [vmem:[%s2614_s5 + $0x8] sm:$0xff]  ;;  %v134_v14 = vld [vmem:[%s2609_s0 + $0x10] sm:$0xff] }
  0x22   :  { %187 = vmatpush.msra.mxu0 %v140_v4  ;;  %1760 = vmatpush.msra.mxu1 %v248_v11  ;;  %v133_v13 = vld [vmem:[%s2609_s0 + $0x8] sm:$0xff]  ;;  %v246_v15 = vld [vmem:[%s2614_s5] sm:$0xff]  ;;  %v135_v16 = vld [vmem:[%s2609_s0 + $0x18] sm:$0xff] }
  0x23   :  { %1686 = vmatmul.msk.f32.vlgmr.msra.gmra.mxu0 %vm147_vm0, %v132_v5  ;;  %354 = vmatpush.msra.mxu2 %v2208_v6  ;;  %v136_v17 = vld [vmem:[%s2609_s0 + $0x20] sm:$0xff]  ;;  %v137_v18 = vld [vmem:[%s2609_s0 + $0x28] sm:$0xff]  ;;  %v138_v19 = vld [vmem:[%s2609_s0 + $0x30] sm:$0xff] }
  0x24   :  { %290 = vmatpush.msrb.mxu0 %v249_v8  ;;  %1759 = vmatpush.msra.mxu3 %v249_v8  ;;  %v139_v20 = vld [vmem:[%s2609_s0 + $0x38] sm:$0xff]  ;;  %v1782_v21 = vld [vmem:[#allocation9] ss:$0 sm:$0xff]  ;;  %v213_v23 = vld [vmem:[%s2610_s1] sm:$0xff] }
  0x25   :  { %355 = vmatpush.msra.mxu2 %v2217_v9  ;;  %1762 = vmatpush.msra.mxu1 %v247_v12  ;;  %v214_v28 = vld [vmem:[%s2610_s1 + $0x8] sm:$0xff]  ;;  %v215_v35 = vld [vmem:[%s2610_s1 + $0x10] sm:$0xff]  ;;  %v216_v40 = vld [vmem:[%s2610_s1 + $0x18] sm:$0xff] }
  0x26   :  { %1702 = vmatmul.msk.f32.vlgmr.msra.gmra.mxu2 %vm229_vm1, %v335_v10  ;;  %291 = vmatpush.msrb.mxu0 %v248_v11  ;;  %v217_v45 = vld [vmem:[%s2610_s1 + $0x20] sm:$0xff]  ;;  %v218_v50 = vld [vmem:[%s2610_s1 + $0x28] sm:$0xff]  ;;  %v219_v55 = vld [vmem:[%s2610_s1 + $0x30] sm:$0xff] }
  0x27   :  { %1761 = vmatpush.msra.mxu3 %v248_v11  ;;  %497 = vmatpush.msrb.mxu2 %v2194_v2  ;;  %v220_v61 = vld [vmem:[%s2610_s1 + $0x38] sm:$0xff]  ;;  %v1783_v1 = vld [vmem:[#allocation10] ss:$0 sm:$0xff]  ;;  %s2099_s1 = smov 96  }
  0x28   :  { %292 = vmatpush.msrb.mxu0 %v247_v12  ;;  %401 = vrot.lane.b32.xlu2 %v335_v10, %s2098_s4 }
  0x29   :  { %1763 = vmatpush.msra.mxu3 %v247_v12  ;;  %498 = vmatpush.msrb.mxu2 %v2199_v3 }
  0x2a   :  { %293 = vmatpush.msrb.mxu0 %v246_v15  ;;  %1764 = vmatpush.msra.mxu1 %v246_v15 }
  0x2b   :  { %1687 = vmatmul.msk.f32.gmra.mxu0 %vm147_vm0, %v133_v13  ;;  %499 = vmatpush.msrb.mxu2 %v2208_v6 }
  0x2c   :  { %1765 = vmatpush.msra.mxu3 %v246_v15 }
  0x2d   :  { %500 = vmatpush.msrb.mxu2 %v2217_v9 }
  0x2e   :  { %427 = vmatpush.msrb.mxu3 %v2194_v2 }
  0x2f   :  { %637 = vmatpush.msra.mxu2 %v2194_v2 }
  0x30   :  { %428 = vmatpush.msrb.mxu3 %v2199_v3 }
  0x31   :  { %638 = vmatpush.msra.mxu2 %v2199_v3 }
  0x32   :  { %429 = vmatpush.msrb.mxu3 %v2208_v6 }
  0x33   :  { %1688 = vmatmul.msk.f32.gmra.mxu0 %vm147_vm0, %v134_v14  ;;  %639 = vmatpush.msra.mxu2 %v2208_v6 }
  0x34   :  { %430 = vmatpush.msrb.mxu3 %v2217_v9 }
  0x35   :  { %640 = vmatpush.msra.mxu2 %v2217_v9 }
  0x3b   :  { %1689 = vmatmul.msk.f32.gmra.mxu0 %vm147_vm0, %v135_v16 }
  0x43   :  { %1690 = vmatmul.msk.f32.gmra.mxu0 %vm147_vm0, %v136_v17 }
  0x4b   :  { %1691 = vmatmul.msk.f32.gmra.mxu0 %vm147_vm0, %v137_v18 }
  0x53   :  { %1692 = vmatmul.msk.f32.gmra.mxu0 %vm147_vm0, %v138_v19 }
  0x5b   :  { %1693 = vmatmul.msk.f32.gmra.mxu0 %vm147_vm0, %v139_v20 }
  0x93   :  { %v2278_v26 = vpop.permute.xlu0 %380 }
  0xa0   :  { %v189_v22 = vpop.f32.mrf.mxu0 }
  0xa1   :  { %v190_v24 = vadd.f32 %v1782_v21, %v189_v22 }
  0xa3   :  { %v221_v25 = vadd.f32 %v213_v23, %v190_v24 }
  0xa5   :  { %230 = vst.msk [vmem:[#allocation2] sm:$0xff] %vm229_vm1, %v221_v25 }
  0xa8   :  { %v192_v27 = vpop.f32.mrf.mxu0 }
  0xa9   :  { %v357_v29 = vpop.f32.mrf.mxu2  ;;  %v193_v30 = vadd.f32 %v1782_v21, %v192_v27 }
  0xaa   :  { %v383_v31 = vadd.f32 %v2278_v26, %v357_v29 }
  0xab   :  { %v222_v32 = vadd.f32 %v214_v28, %v193_v30 }
  0xac   :  { %v238_v33 = vld [vmem:[#allocation2] sm:$0xff]  ;;  %385 = vrot.lane.b32.xlu0 %v383_v31, %s2097_s25 }
  0xad   :  { %1694 = vmatmul.msk.f32.vlgmr.msrb.gmra.mxu0 %vm229_vm1, %v238_v33  ;;  %231 = vst.msk [vmem:[#allocation2 + $0x8] sm:$0xff] %vm229_vm1, %v222_v32 }
  0xb0   :  { %v195_v34 = vpop.f32.mrf.mxu0 }
  0xb1   :  { %v196_v36 = vadd.f32 %v1782_v21, %v195_v34 }
  0xb3   :  { %v223_v37 = vadd.f32 %v215_v35, %v196_v36 }
  0xb4   :  { %v239_v38 = vld [vmem:[#allocation2 + $0x8] sm:$0xff] }
  0xb5   :  { %232 = vst.msk [vmem:[#allocation2 + $0x10] sm:$0xff] %vm229_vm1, %v223_v37  ;;  %1695 = vmatmul.msk.f32.gmra.mxu0 %vm229_vm1, %v239_v38 }
  0xb8   :  { %v198_v39 = vpop.f32.mrf.mxu0 }
  0xb9   :  { %v199_v41 = vadd.f32 %v1782_v21, %v198_v39 }
  0xbb   :  { %v224_v42 = vadd.f32 %v216_v40, %v199_v41 }
  0xbc   :  { %v240_v43 = vld [vmem:[#allocation2 + $0x10] sm:$0xff] }
  0xbd   :  { %233 = vst.msk [vmem:[#allocation2 + $0x18] sm:$0xff] %vm229_vm1, %v224_v42  ;;  %1696 = vmatmul.msk.f32.vlgmr.msra.gmra.mxu1 %vm229_vm1, %v240_v43  ;;  %v402_v43 = vpop.permute.xlu2 %401 }
  0xc0   :  { %v201_v44 = vpop.f32.mrf.mxu0 }
  0xc1   :  { %v202_v46 = vadd.f32 %v1782_v21, %v201_v44 }
  0xc3   :  { %v225_v47 = vadd.f32 %v217_v45, %v202_v46 }
  0xc4   :  { %v241_v48 = vld [vmem:[#allocation2 + $0x18] sm:$0xff] }
  0xc5   :  { %234 = vst.msk [vmem:[#allocation2 + $0x20] sm:$0xff] %vm229_vm1, %v225_v47  ;;  %1697 = vmatmul.msk.f32.gmra.mxu1 %vm229_vm1, %v241_v48 }
  0xc8   :  { %v204_v49 = vpop.f32.mrf.mxu0 }
  0xc9   :  { %v205_v51 = vadd.f32 %v1782_v21, %v204_v49 }
  0xcb   :  { %v226_v52 = vadd.f32 %v218_v50, %v205_v51 }
  0xcc   :  { %v242_v53 = vld [vmem:[#allocation2 + $0x20] sm:$0xff] }
  0xcd   :  { %235 = vst.msk [vmem:[#allocation2 + $0x28] sm:$0xff] %vm229_vm1, %v226_v52  ;;  %1698 = vmatmul.msk.f32.gmra.mxu1 %vm229_vm1, %v242_v53 }
  0xd0   :  { %v207_v54 = vpop.f32.mrf.mxu0 }
  0xd1   :  { %v208_v56 = vadd.f32 %v1782_v21, %v207_v54 }
  0xd3   :  { %v227_v57 = vadd.f32 %v219_v55, %v208_v56 }
  0xd4   :  { %v243_v58 = vld [vmem:[#allocation2 + $0x28] sm:$0xff] }
  0xd5   :  { %236 = vst.msk [vmem:[#allocation2 + $0x30] sm:$0xff] %vm229_vm1, %v227_v57  ;;  %1699 = vmatmul.msk.f32.vlgmr.msra.gmra.mxu3 %vm229_vm1, %v243_v58 }
  0xd6   :  { %567 = vmatpush.msra.mxu3 %v2194_v2 }
  0xd8   :  { %568 = vmatpush.msra.mxu3 %v2199_v3  ;;  %v210_v60 = vpop.f32.mrf.mxu0 }
  0xd9   :  { %v211_v62 = vadd.f32 %v1782_v21, %v210_v60 }
  0xda   :  { %569 = vmatpush.msra.mxu3 %v2208_v6 }
  0xdb   :  { %v228_v63 = vadd.f32 %v220_v61, %v211_v62 }
  0xdc   :  { %570 = vmatpush.msra.mxu3 %v2217_v9  ;;  %v244_v59 = vld [vmem:[#allocation2 + $0x30] sm:$0xff] }
  0xdd   :  { %1700 = vmatmul.msk.f32.gmra.mxu3 %vm229_vm1, %v244_v59  ;;  %237 = vst.msk [vmem:[#allocation2 + $0x38] sm:$0xff] %vm229_vm1, %v228_v63 }
  0xe4   :  { %v245_v0 = vld [vmem:[#allocation2 + $0x38] sm:$0xff] }
  0xe5   :  { %1701 = vmatmul.msk.f32.gmra.mxu3 %vm229_vm1, %v245_v0 }
 0x11e   :  { %v386_v30 = vpop.permute.xlu0 %385 }
 0x12a   :  { %v295_v4 = vpop.f32.mrf.mxu0 }
 0x12b   :  { %v296_v5 = vadd.f32 %v1783_v1, %v295_v4 }
 0x12d   :  { %320 = vst.msk [vmem:[#allocation3] sm:$0xff] %vm319_vm2, %v296_v5 }
 0x132   :  { %v298_v10 = vpop.f32.mrf.mxu0 }
 0x133   :  { %v299_v11 = vadd.f32 %v1783_v1, %v298_v10 }
 0x134   :  { %v336_v7 = vld [vmem:[#allocation3] sm:$0xff] }
 0x135   :  { %v360_v8 = vadd.f32 %v357_v29, %v336_v7  ;;  %321 = vst.msk [vmem:[#allocation3 + $0x8] sm:$0xff] %vm319_vm2, %v299_v11 }
 0x137   :  { %v1703_v12 = vmul.f32 -1.442695, %v360_v8 }
 0x139   :  { %1787 = vpow2.f32 %v1703_v12 }
 0x13a   :  { %v301_v13 = vpop.f32.mrf.mxu1 }
 0x13b   :  { %v302_v14 = vadd.f32 %v1783_v1, %v301_v13 }
 0x13c   :  { %v412_v52 = vld [vmem:[#allocation3 + $0x8] sm:$0xff] }
 0x13d   :  { %322 = vst.msk [vmem:[#allocation3 + $0x10] sm:$0xff] %vm319_vm2, %v302_v14 }
 0x13f   :  { %v1788_v15 = vpop.eup %1787 }
 0x140   :  { %v364_v16 = vadd.f32 1.0, %v1788_v15 }
 0x142   :  { %1789 = vrcp.f32 %v364_v16  ;;  %v304_v17 = vpop.f32.mrf.mxu1  ;;  %v376_v24 = vand.u32 2147483648, %v364_v16  ;;  %v374_v27 = vand.u32 2147483647, %v364_v16  ;;  %vm370_vm4 = vweird.f32 %v364_v16 }
 0x143   :  { %v305_v18 = vadd.f32 %v1783_v1, %v304_v17 }
 0x144   :  { %v377_v29 = vor.u32 1.1754944e-38, %v376_v24  ;;  %vm375_vm6 = vcmp.eq.f32.partialorder %v374_v27, 8.507059e+37 }
 0x145   :  { %323 = vst.msk [vmem:[#allocation3 + $0x18] sm:$0xff] %vm319_vm2, %v305_v18 }
 0x148   :  { %v1790_v19 = vpop.eup %1789 }
 0x149   :  { %v366_v20 = vmul.f32 %v1790_v19, %v364_v16  ;;  %vm371_vm3 = vweird.f32 %v1790_v19 }
 0x14a   :  { %v307_v21 = vpop.f32.mrf.mxu1  ;;  %vm372_vm5 = vmor %vm370_vm4, %vm371_vm3 }
 0x14b   :  { %v367_v22 = vsub.f32 1.0, %v366_v20  ;;  %v308_v23 = vadd.f32 %v1783_v1, %v307_v21  ;;  %v482_v20 = vld [vmem:[#allocation3 + $0x10] sm:$0xff] }
 0x14d   :  { %v368_v25 = vmul.f32 %v1790_v19, %v367_v22  ;;  %324 = vst.msk [vmem:[#allocation3 + $0x20] sm:$0xff] %vm319_vm2, %v308_v23 }
 0x14f   :  { %v369_v28 = vadd.f32 %v1790_v19, %v368_v25 }
 0x151   :  { %v373_v31 = vsel %vm372_vm5, %v1790_v19, %v369_v28 }
 0x152   :  { %v378_v32 = vsel %vm375_vm6, %v377_v29, %v373_v31 }
 0x153   :  { %v388_v33 = vmul.f32 %v386_v30, %v378_v32  ;;  %v395_v44 = vsub.f32 1.0, %v378_v32  ;;  %v404_v46 = vmul.f32 %v402_v43, %v378_v32 }
 0x155   :  { %390 = vrot.lane.b32.xlu1 %v388_v33, %s2097_s25 }
 0x158   :  { %v310_v34 = vpop.f32.mrf.mxu3 }
 0x159   :  { %v311_v35 = vadd.f32 %v1783_v1, %v310_v34 }
 0x15b   :  { %325 = vst.msk [vmem:[#allocation3 + $0x28] sm:$0xff] %vm319_vm2, %v311_v35 }
 0x160   :  { %v313_v36 = vpop.f32.mrf.mxu3 }
 0x161   :  { %v314_v37 = vadd.f32 %v1783_v1, %v313_v36 }
 0x163   :  { %326 = vst.msk [vmem:[#allocation3 + $0x30] sm:$0xff] %vm319_vm2, %v314_v37 }
 0x168   :  { %v316_v38 = vpop.f32.mrf.mxu3 }
 0x169   :  { %v317_v39 = vadd.f32 %v1783_v1, %v316_v38 }
 0x16b   :  { %327 = vst.msk [vmem:[#allocation3 + $0x38] sm:$0xff] %vm319_vm2, %v317_v39 }
 0x1c7   :  { %v391_v40 = vpop.permute.xlu1 %390 }
 0x1c8   :  { %v393_v41 = vadd.f32 %v391_v40, %v336_v7 }
 0x1ca   :  { %1791 = vtanh.f32 %v393_v41 }
 0x1d0   :  { %v1792_v42 = vpop.eup %1791 }
 0x1d1   :  { %397 = vrot.lane.b32.xlu1 %v1792_v42, %s2099_s1 }
 0x243   :  { %v398_v45 = vpop.permute.xlu1 %397 }
 0x244   :  { %v400_v47 = vmul.f32 %v398_v45, %v395_v44 }
 0x246   :  { %v405_v48 = vadd.f32 %v404_v46, %v400_v47 }
 0x248   :  { %407 = vrot.lane.b32.xlu2 %v405_v48, %s2099_s1 }
 0x2a2   :  { %v408_v49 = vpop.permute.xlu2 %407 }
 0x2a3   :  { %410 = vst.msk [vmem:[#allocation2] sm:$0xff] %vm229_vm1, %v408_v49  ;;  %1704 = vmatmul.msk.f32.vlgmr.msrb.gmra.mxu3 %vm229_vm1, %v408_v49  ;;  %v552_v49 = vld [vmem:[#allocation3 + $0x18] sm:$0xff] }
 0x2a4   :  { %707 = vmatpush.msrb.mxu3 %v2194_v2 }
 0x2a6   :  { %708 = vmatpush.msrb.mxu3 %v2199_v3 }
 0x2a8   :  { %709 = vmatpush.msrb.mxu3 %v2208_v6 }
 0x2aa   :  { %710 = vmatpush.msrb.mxu3 %v2217_v9 }
 0x326   :  { %v432_v50 = vpop.f32.mrf.mxu3 }
 0x327   :  { %v455_v51 = vadd.f32 %v432_v50, %v2278_v26  ;;  %v435_v53 = vadd.f32 %v432_v50, %v412_v52 }
 0x329   :  { %457 = vrot.lane.b32.xlu0 %v455_v51, %s2097_s25  ;;  %v1705_v54 = vmul.f32 -1.442695, %v435_v53 }
 0x32b   :  { %1793 = vpow2.f32 %v1705_v54 }
 0x331   :  { %v1794_v55 = vpop.eup %1793 }
 0x332   :  { %v439_v56 = vadd.f32 1.0, %v1794_v55 }
 0x334   :  { %1795 = vrcp.f32 %v439_v56  ;;  %v451_v62 = vand.u32 2147483648, %v439_v56  ;;  %vm445_vm8 = vweird.f32 %v439_v56  ;;  %v449_v63 = vand.u32 2147483647, %v439_v56 }
 0x336   :  { %v452_v1 = vor.u32 1.1754944e-38, %v451_v62  ;;  %vm450_vm10 = vcmp.eq.f32.partialorder %v449_v63, 8.507059e+37 }
 0x33a   :  { %v1796_v57 = vpop.eup %1795 }
 0x33b   :  { %v441_v58 = vmul.f32 %v1796_v57, %v439_v56  ;;  %vm446_vm7 = vweird.f32 %v1796_v57 }
 0x33c   :  { %vm447_vm9 = vmor %vm445_vm8, %vm446_vm7 }
 0x33d   :  { %v442_v59 = vsub.f32 1.0, %v441_v58 }
 0x33f   :  { %v443_v60 = vmul.f32 %v1796_v57, %v442_v59 }
 0x341   :  { %v444_v61 = vadd.f32 %v1796_v57, %v443_v60 }
 0x343   :  { %v448_v0 = vsel %vm447_vm9, %v1796_v57, %v444_v61 }
 0x344   :  { %v453_v5 = vsel %vm450_vm10, %v452_v1, %v448_v0 }
 0x345   :  { %v467_v12 = vsub.f32 1.0, %v453_v5  ;;  %v473_v14 = vmul.f32 %v453_v5, %v405_v48 }
 0x39b   :  { %v458_v4 = vpop.permute.xlu0 %457 }
 0x39c   :  { %v460_v7 = vmul.f32 %v458_v4, %v453_v5 }
 0x39e   :  { %462 = vrot.lane.b32.xlu1 %v460_v7, %s2097_s25 }
 0x410   :  { %v463_v8 = vpop.permute.xlu1 %462 }
 0x411   :  { %v465_v10 = vadd.f32 %v463_v8, %v412_v52 }
 0x413   :  { %1797 = vtanh.f32 %v465_v10 }
 0x419   :  { %v1798_v11 = vpop.eup %1797 }
 0x41a   :  { %469 = vrot.lane.b32.xlu2 %v1798_v11, %s2099_s1 }
 0x474   :  { %v470_v13 = vpop.permute.xlu2 %469 }
 0x475   :  { %v472_v15 = vmul.f32 %v470_v13, %v467_v12  ;;  %v622_v13 = vld [vmem:[#allocation3 + $0x20] sm:$0xff] }
 0x477   :  { %v474_v16 = vadd.f32 %v473_v14, %v472_v15 }
 0x479   :  { %476 = vrot.lane.b32.xlu0 %v474_v16, %s2099_s1 }
 0x4eb   :  { %v477_v17 = vpop.permute.xlu0 %476 }
 0x4ec   :  { %480 = vst.msk [vmem:[#allocation2 + $0x8] sm:$0xff] %vm229_vm1, %v477_v17  ;;  %1706 = vmatmul.msk.f32.vlgmr.msrb.gmra.mxu2 %vm229_vm1, %v477_v17 }
 0x4ed   :  { %777 = vmatpush.msrb.mxu2 %v2194_v2 }
 0x4ef   :  { %778 = vmatpush.msrb.mxu2 %v2199_v3 }
 0x4f1   :  { %779 = vmatpush.msrb.mxu2 %v2208_v6 }
 0x4f3   :  { %780 = vmatpush.msrb.mxu2 %v2217_v9 }
 0x56f   :  { %v502_v18 = vpop.f32.mrf.mxu2 }
 0x570   :  { %v525_v19 = vadd.f32 %v502_v18, %v2278_v26  ;;  %v505_v21 = vadd.f32 %v502_v18, %v482_v20 }
 0x572   :  { %527 = vrot.lane.b32.xlu1 %v525_v19, %s2097_s25  ;;  %v1707_v22 = vmul.f32 -1.442695, %v505_v21 }
 0x574   :  { %1799 = vpow2.f32 %v1707_v22 }
 0x57a   :  { %v1800_v23 = vpop.eup %1799 }
 0x57b   :  { %v509_v24 = vadd.f32 1.0, %v1800_v23 }
 0x57d   :  { %1801 = vrcp.f32 %v509_v24  ;;  %v521_v31 = vand.u32 2147483648, %v509_v24  ;;  %vm515_vm12 = vweird.f32 %v509_v24  ;;  %v519_v32 = vand.u32 2147483647, %v509_v24 }
 0x57f   :  { %v522_v34 = vor.u32 1.1754944e-38, %v521_v31  ;;  %vm520_vm14 = vcmp.eq.f32.partialorder %v519_v32, 8.507059e+37 }
 0x583   :  { %v1802_v25 = vpop.eup %1801 }
 0x584   :  { %v511_v27 = vmul.f32 %v1802_v25, %v509_v24  ;;  %vm516_vm11 = vweird.f32 %v1802_v25 }
 0x585   :  { %vm517_vm13 = vmor %vm515_vm12, %vm516_vm11 }
 0x586   :  { %v512_v28 = vsub.f32 1.0, %v511_v27 }
 0x588   :  { %v513_v29 = vmul.f32 %v1802_v25, %v512_v28 }
 0x58a   :  { %v514_v30 = vadd.f32 %v1802_v25, %v513_v29 }
 0x58c   :  { %v518_v33 = vsel %vm517_vm13, %v1802_v25, %v514_v30 }
 0x58d   :  { %v523_v36 = vsel %vm520_vm14, %v522_v34, %v518_v33 }
 0x58e   :  { %v537_v41 = vsub.f32 1.0, %v523_v36  ;;  %v543_v43 = vmul.f32 %v523_v36, %v474_v16 }
 0x5e4   :  { %v528_v35 = vpop.permute.xlu1 %527 }
 0x5e5   :  { %v530_v37 = vmul.f32 %v528_v35, %v523_v36 }
 0x5e7   :  { %532 = vrot.lane.b32.xlu2 %v530_v37, %s2097_s25 }
 0x641   :  { %v533_v38 = vpop.permute.xlu2 %532 }
 0x642   :  { %v535_v39 = vadd.f32 %v533_v38, %v482_v20 }
 0x644   :  { %1803 = vtanh.f32 %v535_v39 }
 0x64a   :  { %v1804_v40 = vpop.eup %1803 }
 0x64b   :  { %539 = vrot.lane.b32.xlu0 %v1804_v40, %s2099_s1 }
 0x6bd   :  { %v540_v42 = vpop.permute.xlu0 %539 }
 0x6be   :  { %v542_v44 = vmul.f32 %v540_v42, %v537_v41  ;;  %v692_v42 = vld [vmem:[#allocation3 + $0x28] sm:$0xff] }
 0x6c0   :  { %v544_v45 = vadd.f32 %v543_v43, %v542_v44 }
 0x6c2   :  { %546 = vrot.lane.b32.xlu1 %v544_v45, %s2099_s1 }
 0x734   :  { %v547_v46 = vpop.permute.xlu1 %546 }
 0x735   :  { %550 = vst.msk [vmem:[#allocation2 + $0x10] sm:$0xff] %vm229_vm1, %v547_v46  ;;  %1708 = vmatmul.msk.f32.vlgmr.msra.gmra.mxu3 %vm229_vm1, %v547_v46 }
 0x736   :  { %847 = vmatpush.msra.mxu3 %v2194_v2 }
 0x738   :  { %848 = vmatpush.msra.mxu3 %v2199_v3 }
 0x73a   :  { %849 = vmatpush.msra.mxu3 %v2208_v6 }
 0x73c   :  { %850 = vmatpush.msra.mxu3 %v2217_v9 }
 0x7b8   :  { %v572_v47 = vpop.f32.mrf.mxu3 }
 0x7b9   :  { %v595_v48 = vadd.f32 %v572_v47, %v2278_v26  ;;  %v575_v50 = vadd.f32 %v572_v47, %v552_v49 }
 0x7bb   :  { %597 = vrot.lane.b32.xlu2 %v595_v48, %s2097_s25  ;;  %v1709_v51 = vmul.f32 -1.442695, %v575_v50 }
 0x7bd   :  { %1805 = vpow2.f32 %v1709_v51 }
 0x7c3   :  { %v1806_v52 = vpop.eup %1805 }
 0x7c4   :  { %v579_v53 = vadd.f32 1.0, %v1806_v52 }
 0x7c6   :  { %1807 = vrcp.f32 %v579_v53  ;;  %v591_v6 = vand.u32 2147483648, %v579_v53  ;;  %vm585_vm0 = vweird.f32 %v579_v53  ;;  %v589_v9 = vand.u32 2147483647, %v579_v53 }
 0x7c8   :  { %v592_v58 = vor.u32 1.1754944e-38, %v591_v6  ;;  %vm590_vm4 = vcmp.eq.f32.partialorder %v589_v9, 8.507059e+37 }
 0x7cc   :  { %v1808_v54 = vpop.eup %1807 }
 0x7cd   :  { %v581_v2 = vmul.f32 %v1808_v54, %v579_v53  ;;  %vm586_vm15 = vweird.f32 %v1808_v54 }
 0x7ce   :  { %vm587_vm3 = vmor %vm585_vm0, %vm586_vm15 }
 0x7cf   :  { %v582_v55 = vsub.f32 1.0, %v581_v2 }
 0x7d1   :  { %v583_v3 = vmul.f32 %v1808_v54, %v582_v55 }
 0x7d3   :  { %v584_v56 = vadd.f32 %v1808_v54, %v583_v3 }
 0x7d5   :  { %v588_v57 = vsel %vm587_vm3, %v1808_v54, %v584_v56 }
 0x7d6   :  { %v593_v60 = vsel %vm590_vm4, %v592_v58, %v588_v57 }
 0x7d7   :  { %v607_v1 = vsub.f32 1.0, %v593_v60  ;;  %v613_v5 = vmul.f32 %v593_v60, %v544_v45 }
 0x815   :  { %v598_v59 = vpop.permute.xlu2 %597 }
 0x816   :  { %v600_v61 = vmul.f32 %v598_v59, %v593_v60 }
 0x818   :  { %602 = vrot.lane.b32.xlu0 %v600_v61, %s2097_s25 }
 0x88a   :  { %v603_v62 = vpop.permute.xlu0 %602 }
 0x88b   :  { %v605_v63 = vadd.f32 %v603_v62, %v552_v49 }
 0x88d   :  { %1809 = vtanh.f32 %v605_v63  ;;  %v1721_v63 = vld [vmem:[%s2614_s5 + $0x38] sm:$0xff] }
 0x893   :  { %v1810_v0 = vpop.eup %1809 }
 0x894   :  { %609 = vrot.lane.b32.xlu1 %v1810_v0, %s2099_s1  ;;  %v1720_v0 = vld [vmem:[%s2614_s5 + $0x30] sm:$0xff] }
 0x906   :  { %v610_v4 = vpop.permute.xlu1 %609 }
 0x907   :  { %v612_v7 = vmul.f32 %v610_v4, %v607_v1  ;;  %v1719_v1 = vld [vmem:[%s2614_s5 + $0x28] sm:$0xff]  ;;  %v1718_v4 = vld [vmem:[%s2614_s5 + $0x20] sm:$0xff] }
 0x909   :  { %v614_v8 = vadd.f32 %v613_v5, %v612_v7  ;;  %v902_v7 = vld [vmem:[#allocation2] sm:$0xff] }
 0x90b   :  { %616 = vrot.lane.b32.xlu2 %v614_v8, %s2099_s1 }
 0x965   :  { %v617_v10 = vpop.permute.xlu2 %616 }
 0x966   :  { %620 = vst.msk [vmem:[#allocation2 + $0x18] sm:$0xff] %vm229_vm1, %v617_v10  ;;  %1710 = vmatmul.msk.f32.vlgmr.msra.gmra.mxu2 %vm229_vm1, %v617_v10  ;;  %v904_v10 = vld [vmem:[#allocation2 + $0x10] sm:$0xff] }
 0x967   :  { %956 = vmatpush.msra.mxu2 %v1721_v63 }
 0x969   :  { %957 = vmatpush.msra.mxu2 %v1720_v0 }
 0x96b   :  { %958 = vmatpush.msra.mxu2 %v1719_v1 }
 0x96d   :  { %959 = vmatpush.msra.mxu2 %v1718_v4 }
 0x9e9   :  { %v642_v11 = vpop.f32.mrf.mxu2 }
 0x9ea   :  { %v665_v12 = vadd.f32 %v642_v11, %v2278_v26  ;;  %v645_v14 = vadd.f32 %v642_v11, %v622_v13  ;;  %v905_v11 = vld [vmem:[#allocation2 + $0x18] sm:$0xff] }
 0x9ec   :  { %667 = vrot.lane.b32.xlu0 %v665_v12, %s2097_s25  ;;  %v1711_v15 = vmul.f32 -1.442695, %v645_v14 }
 0x9ee   :  { %1811 = vpow2.f32 %v1711_v15 }
 0x9f4   :  { %v1812_v16 = vpop.eup %1811 }
 0x9f5   :  { %v649_v17 = vadd.f32 1.0, %v1812_v16  ;;  %v2405_v16 = vld [vmem:[#allocation10 + $0x1] ss:$0 sm:$0xff] }
 0x9f7   :  { %1813 = vrcp.f32 %v649_v17  ;;  %v661_v23 = vand.u32 2147483648, %v649_v17  ;;  %vm655_vm6 = vweird.f32 %v649_v17  ;;  %v659_v24 = vand.u32 2147483647, %v649_v17 }
 0x9f9   :  { %v662_v27 = vor.u32 1.1754944e-38, %v661_v23  ;;  %vm660_vm8 = vcmp.eq.f32.partialorder %v659_v24, 8.507059e+37 }
 0x9fd   :  { %v1814_v18 = vpop.eup %1813 }
 0x9fe   :  { %v651_v19 = vmul.f32 %v1814_v18, %v649_v17  ;;  %vm656_vm5 = vweird.f32 %v1814_v18 }
 0x9ff   :  { %vm657_vm7 = vmor %vm655_vm6, %vm656_vm5 }
 0xa00   :  { %v652_v20 = vsub.f32 1.0, %v651_v19 }
 0xa02   :  { %v653_v21 = vmul.f32 %v1814_v18, %v652_v20 }
 0xa04   :  { %v654_v22 = vadd.f32 %v1814_v18, %v653_v21 }
 0xa06   :  { %v658_v25 = vsel %vm657_vm7, %v1814_v18, %v654_v22 }
 0xa07   :  { %v663_v29 = vsel %vm660_vm8, %v662_v27, %v658_v25 }
 0xa08   :  { %v677_v34 = vsub.f32 1.0, %v663_v29  ;;  %v683_v36 = vmul.f32 %v663_v29, %v614_v8  ;;  %v903_v8 = vld [vmem:[#allocation2 + $0x8] sm:$0xff] }
 0xa5e   :  { %v668_v28 = vpop.permute.xlu0 %667 }
 0xa5f   :  { %v670_v30 = vmul.f32 %v668_v28, %v663_v29  ;;  %v762_v28 = vld [vmem:[#allocation3 + $0x30] sm:$0xff] }
 0xa61   :  { %672 = vrot.lane.b32.xlu1 %v670_v30, %s2097_s25 }
 0xad3   :  { %v673_v31 = vpop.permute.xlu1 %672 }
 0xad4   :  { %v675_v32 = vadd.f32 %v673_v31, %v622_v13 }
 0xad6   :  { %1815 = vtanh.f32 %v675_v32 }
 0xadc   :  { %v1816_v33 = vpop.eup %1815 }
 0xadd   :  { %679 = vrot.lane.b32.xlu2 %v1816_v33, %s2099_s1 }
 0xb37   :  { %v680_v35 = vpop.permute.xlu2 %679 }
 0xb38   :  { %v682_v37 = vmul.f32 %v680_v35, %v677_v34 }
 0xb3a   :  { %v684_v38 = vadd.f32 %v683_v36, %v682_v37 }
 0xb3c   :  { %686 = vrot.lane.b32.xlu0 %v684_v38, %s2099_s1 }
 0xbae   :  { %v687_v39 = vpop.permute.xlu0 %686 }
 0xbaf   :  { %690 = vst.msk [vmem:[#allocation2 + $0x20] sm:$0xff] %vm229_vm1, %v687_v39  ;;  %1712 = vmatmul.msk.f32.vlgmr.msrb.gmra.mxu3 %vm229_vm1, %v687_v39 }
 0xbb6   :  { %v906_v12 = vld [vmem:[#allocation2 + $0x20] sm:$0xff] }
 0xc32   :  { %v712_v40 = vpop.f32.mrf.mxu3 }
 0xc33   :  { %v735_v41 = vadd.f32 %v712_v40, %v2278_v26  ;;  %v715_v43 = vadd.f32 %v712_v40, %v692_v42 }
 0xc35   :  { %737 = vrot.lane.b32.xlu1 %v735_v41, %s2097_s25  ;;  %v1713_v44 = vmul.f32 -1.442695, %v715_v43 }
 0xc37   :  { %1817 = vpow2.f32 %v1713_v44 }
 0xc3d   :  { %v1818_v45 = vpop.eup %1817 }
 0xc3e   :  { %v719_v46 = vadd.f32 1.0, %v1818_v45 }
 0xc40   :  { %1819 = vrcp.f32 %v719_v46  ;;  %v731_v52 = vand.u32 2147483648, %v719_v46  ;;  %vm725_vm10 = vweird.f32 %v719_v46  ;;  %v729_v53 = vand.u32 2147483647, %v719_v46 }
 0xc42   :  { %v732_v2 = vor.u32 1.1754944e-38, %v731_v52  ;;  %vm730_vm12 = vcmp.eq.f32.partialorder %v729_v53, 8.507059e+37 }
 0xc46   :  { %v1820_v47 = vpop.eup %1819 }
 0xc47   :  { %v721_v48 = vmul.f32 %v1820_v47, %v719_v46  ;;  %vm726_vm9 = vweird.f32 %v1820_v47 }
 0xc48   :  { %vm727_vm11 = vmor %vm725_vm10, %vm726_vm9 }
 0xc49   :  { %v722_v49 = vsub.f32 1.0, %v721_v48 }
 0xc4b   :  { %v723_v50 = vmul.f32 %v1820_v47, %v722_v49 }
 0xc4d   :  { %v724_v51 = vadd.f32 %v1820_v47, %v723_v50 }
 0xc4f   :  { %v728_v54 = vsel %vm727_vm11, %v1820_v47, %v724_v51 }
 0xc50   :  { %v733_v3 = vsel %vm730_vm12, %v732_v2, %v728_v54  ;;  %v2429_v2 = vld [vmem:[%s2615_s6 + $0x38] sm:$0xff] }
 0xc51   :  { %v747_v58 = vsub.f32 1.0, %v733_v3  ;;  %v753_v60 = vmul.f32 %v733_v3, %v684_v38  ;;  %1020 = vmatpush.msrb.mxu3 %v2429_v2  ;;  %1298 = vmatpush.msra.mxu0 %v2429_v2 }
 0xc52   :  { %1366 = vmatpush.msrb.mxu1 %v2429_v2 }
 0xca7   :  { %v738_v55 = vpop.permute.xlu1 %737 }
 0xca8   :  { %v740_v56 = vmul.f32 %v738_v55, %v733_v3  ;;  %v2434_v55 = vld [vmem:[%s2615_s6 + $0x30] sm:$0xff]  ;;  %v2441_v3 = vld [vmem:[%s2615_s6 + $0x28] sm:$0xff] }
 0xca9   :  { %1021 = vmatpush.msrb.mxu3 %v2434_v55  ;;  %1299 = vmatpush.msra.mxu0 %v2434_v55 }
 0xcaa   :  { %742 = vrot.lane.b32.xlu2 %v740_v56, %s2097_s25  ;;  %v2449_v56 = vld [vmem:[%s2615_s6 + $0x20] sm:$0xff]  ;;  %1367 = vmatpush.msrb.mxu1 %v2434_v55 }
 0xcab   :  { %1022 = vmatpush.msrb.mxu3 %v2441_v3  ;;  %1300 = vmatpush.msra.mxu0 %v2441_v3 }
 0xcac   :  { %1368 = vmatpush.msrb.mxu1 %v2441_v3 }
 0xcad   :  { %1023 = vmatpush.msrb.mxu3 %v2449_v56  ;;  %1301 = vmatpush.msra.mxu0 %v2449_v56 }
 0xcae   :  { %1369 = vmatpush.msrb.mxu1 %v2449_v56 }
 0xcaf   :  { %1502 = vmatpush.msrb.mxu0 %v2429_v2 }
 0xcb1   :  { %1503 = vmatpush.msrb.mxu0 %v2434_v55 }
 0xcb3   :  { %1504 = vmatpush.msrb.mxu0 %v2441_v3 }
 0xcb5   :  { %1505 = vmatpush.msrb.mxu0 %v2449_v56 }
 0xd04   :  { %v743_v6 = vpop.permute.xlu2 %742 }
 0xd05   :  { %v745_v9 = vadd.f32 %v743_v6, %v692_v42  ;;  %v1785_v6 = vld [vmem:[#allocation12 + $0x1] ss:$0 sm:$0xff] }
 0xd07   :  { %1821 = vtanh.f32 %v745_v9 }
 0xd0d   :  { %v1822_v57 = vpop.eup %1821 }
 0xd0e   :  { %749 = vrot.lane.b32.xlu0 %v1822_v57, %s2099_s1  ;;  %v1003_v57 = vld [vmem:[#allocation4 + $0x8] sm:$0xff] }
 0xd80   :  { %v750_v59 = vpop.permute.xlu0 %749 }
 0xd81   :  { %v752_v61 = vmul.f32 %v750_v59, %v747_v58 }
 0xd83   :  { %v2379_v62 = vadd.f32 %v753_v60, %v752_v61 }
 0xd85   :  { %756 = vrot.lane.b32.xlu1 %v2379_v62, %s2099_s1 }
 0xdf7   :  { %v757_v5 = vpop.permute.xlu1 %756 }
 0xdf8   :  { %760 = vst.msk [vmem:[#allocation2 + $0x28] sm:$0xff] %vm229_vm1, %v757_v5  ;;  %1714 = vmatmul.msk.f32.vlgmr.msrb.gmra.mxu2 %vm229_vm1, %v757_v5 }
 0xdff   :  { %v907_v13 = vld [vmem:[#allocation2 + $0x28] sm:$0xff] }
 0xe00   :  { %1722 = vmatmul.msk.f32.vlgmr.msra.gmra.mxu2 %vm229_vm1, %v902_v7 }
 0xe08   :  { %1723 = vmatmul.msk.f32.gmra.mxu2 %vm229_vm1, %v903_v8 }
 0xe10   :  { %1724 = vmatmul.msk.f32.gmra.mxu2 %vm229_vm1, %v904_v10 }
 0xe18   :  { %1725 = vmatmul.msk.f32.gmra.mxu2 %vm229_vm1, %v905_v11 }
 0xe20   :  { %1726 = vmatmul.msk.f32.gmra.mxu2 %vm229_vm1, %v906_v12 }
 0xe28   :  { %1727 = vmatmul.msk.f32.gmra.mxu2 %vm229_vm1, %v907_v13 }
 0xe7b   :  { %v782_v14 = vpop.f32.mrf.mxu2 }
 0xe7c   :  { %v805_v15 = vadd.f32 %v782_v14, %v2278_v26  ;;  %v785_v29 = vadd.f32 %v782_v14, %v762_v28 }
 0xe7e   :  { %807 = vrot.lane.b32.xlu2 %v805_v15, %s2097_s25  ;;  %v1715_v30 = vmul.f32 -1.442695, %v785_v29 }
 0xe80   :  { %1823 = vpow2.f32 %v1715_v30 }
 0xe83   :  { %v961_v17 = vpop.f32.mrf.mxu2 }
 0xe84   :  { %v962_v18 = vadd.f32 %v2405_v16, %v961_v17 }
 0xe86   :  { %985 = vst.msk [vmem:[#allocation3] sm:$0xff] %vm319_vm2, %v962_v18  ;;  %v1824_v33 = vpop.eup %1823 }
 0xe87   :  { %v789_v34 = vadd.f32 1.0, %v1824_v33 }
 0xe89   :  { %1825 = vrcp.f32 %v789_v34  ;;  %v801_v40 = vand.u32 2147483648, %v789_v34  ;;  %vm795_vm14 = vweird.f32 %v789_v34  ;;  %v799_v41 = vand.u32 2147483647, %v789_v34 }
 0xe8b   :  { %v964_v19 = vpop.f32.mrf.mxu2  ;;  %v802_v43 = vor.u32 1.1754944e-38, %v801_v40  ;;  %vm800_vm0 = vcmp.eq.f32.partialorder %v799_v41, 8.507059e+37 }
 0xe8c   :  { %v965_v20 = vadd.f32 %v2405_v16, %v964_v19 }
 0xe8d   :  { %v1004_v1 = vld [vmem:[#allocation3] sm:$0xff] }
 0xe8e   :  { %986 = vst.msk [vmem:[#allocation3 + $0x8] sm:$0xff] %vm319_vm2, %v965_v20 }
 0xe8f   :  { %v1826_v35 = vpop.eup %1825 }
 0xe90   :  { %v791_v36 = vmul.f32 %v1826_v35, %v789_v34  ;;  %vm796_vm13 = vweird.f32 %v1826_v35 }
 0xe91   :  { %vm797_vm15 = vmor %vm795_vm14, %vm796_vm13 }
 0xe92   :  { %v792_v37 = vsub.f32 1.0, %v791_v36 }
 0xe93   :  { %v967_v21 = vpop.f32.mrf.mxu2 }
 0xe94   :  { %v968_v22 = vadd.f32 %v2405_v16, %v967_v21  ;;  %v793_v38 = vmul.f32 %v1826_v35, %v792_v37 }
 0xe95   :  { %v1079_v36 = vld [vmem:[#allocation3 + $0x8] sm:$0xff] }
 0xe96   :  { %987 = vst.msk [vmem:[#allocation3 + $0x10] sm:$0xff] %vm319_vm2, %v968_v22  ;;  %v794_v39 = vadd.f32 %v1826_v35, %v793_v38 }
 0xe98   :  { %v798_v42 = vsel %vm797_vm15, %v1826_v35, %v794_v39 }
 0xe99   :  { %v803_v45 = vsel %vm800_vm0, %v802_v43, %v798_v42 }
 0xe9a   :  { %v817_v50 = vsub.f32 1.0, %v803_v45  ;;  %v823_v52 = vmul.f32 %v803_v45, %v2379_v62 }
 0xe9b   :  { %v970_v23 = vpop.f32.mrf.mxu2 }
 0xe9c   :  { %v971_v24 = vadd.f32 %v2405_v16, %v970_v23 }
 0xe9e   :  { %988 = vst.msk [vmem:[#allocation3 + $0x18] sm:$0xff] %vm319_vm2, %v971_v24 }
 0xea3   :  { %v973_v25 = vpop.f32.mrf.mxu2 }
 0xea4   :  { %v974_v27 = vadd.f32 %v2405_v16, %v973_v25 }
 0xea6   :  { %989 = vst.msk [vmem:[#allocation3 + $0x20] sm:$0xff] %vm319_vm2, %v974_v27 }
 0xeab   :  { %v976_v31 = vpop.f32.mrf.mxu2 }
 0xeac   :  { %v977_v32 = vadd.f32 %v2405_v16, %v976_v31 }
 0xeae   :  { %990 = vst.msk [vmem:[#allocation3 + $0x28] sm:$0xff] %vm319_vm2, %v977_v32 }
 0xed8   :  { %v808_v44 = vpop.permute.xlu2 %807 }
 0xed9   :  { %v810_v46 = vmul.f32 %v808_v44, %v803_v45 }
 0xedb   :  { %812 = vrot.lane.b32.xlu0 %v810_v46, %s2097_s25 }
 0xee3   :  { %1048 = vrot.lane.b32.xlu0 %v1785_v6, %s2097_s25 }
 0xf4d   :  { %v813_v47 = vpop.permute.xlu0 %812 }
 0xf4e   :  { %v815_v48 = vadd.f32 %v813_v47, %v762_v28 }
 0xf50   :  { %1827 = vtanh.f32 %v815_v48 }
 0xf55   :  { %v2477_v60 = vpop.permute.xlu0 %1048 }
 0xf56   :  { %v1828_v49 = vpop.eup %1827 }
 0xf57   :  { %819 = vrot.lane.b32.xlu1 %v1828_v49, %s2099_s1 }
 0xfc9   :  { %v820_v51 = vpop.permute.xlu1 %819 }
 0xfca   :  { %v822_v53 = vmul.f32 %v820_v51, %v817_v50 }
 0xfcc   :  { %v2422_v54 = vadd.f32 %v823_v52, %v822_v53 }
 0xfce   :  { %826 = vrot.lane.b32.xlu2 %v2422_v54, %s2099_s1 }
0x1028   :  { %v827_v9 = vpop.permute.xlu2 %826 }
0x1029   :  { %830 = vst.msk [vmem:[#allocation2 + $0x30] sm:$0xff] %vm229_vm1, %v827_v9  ;;  %1716 = vmatmul.msk.f32.vlgmr.msra.gmra.mxu3 %vm229_vm1, %v827_v9 }
0x102a   :  { %1094 = vmatpush.msra.mxu3 %v2429_v2 }
0x102c   :  { %1095 = vmatpush.msra.mxu3 %v2434_v55 }
0x102e   :  { %1096 = vmatpush.msra.mxu3 %v2441_v3 }
0x1030   :  { %v908_v58 = vld [vmem:[#allocation2 + $0x30] sm:$0xff]  ;;  %1097 = vmatpush.msra.mxu3 %v2449_v56 }
0x1031   :  { %1728 = vmatmul.msk.f32.gmra.mxu2 %vm229_vm1, %v908_v58  ;;  %1734 = vmatmul.msk.f32.vlgmr.msrb.gmra.mxu3 %vm229_vm1, %v1003_v57 }
0x1032   :  { %1162 = vmatpush.msrb.mxu3 %v2429_v2 }
0x1034   :  { %1163 = vmatpush.msrb.mxu3 %v2434_v55 }
0x1036   :  { %1164 = vmatpush.msrb.mxu3 %v2441_v3 }
0x1038   :  { %1165 = vmatpush.msrb.mxu3 %v2449_v56 }
0x10ac   :  { %v2475_v59 = vpop.f32.mrf.mxu3 }
0x10b4   :  { %v1025_v61 = vpop.f32.mrf.mxu3  ;;  %v979_v62 = vpop.f32.mrf.mxu2 }
0x10b5   :  { %v980_v63 = vadd.f32 %v2405_v16, %v979_v62  ;;  %v1051_v0 = vadd.f32 %v2477_v60, %v1025_v61  ;;  %v1028_v4 = vadd.f32 %v1025_v61, %v1004_v1 }
0x10b7   :  { %991 = vst.msk [vmem:[#allocation3 + $0x30] sm:$0xff] %vm319_vm2, %v980_v63  ;;  %1053 = vrot.lane.b32.xlu1 %v1051_v0, %s2097_s25  ;;  %v1735_v5 = vmul.f32 -1.442695, %v1028_v4 }
0x10b9   :  { %1829 = vpow2.f32 %v1735_v5  ;;  %v1147_v5 = vld [vmem:[#allocation3 + $0x10] sm:$0xff] }
0x10bf   :  { %1069 = vrot.lane.b32.xlu1 %v1003_v57, %s2098_s4  ;;  %v1830_v7 = vpop.eup %1829 }
0x10c0   :  { %v1032_v8 = vadd.f32 1.0, %v1830_v7 }
0x10c2   :  { %1831 = vrcp.f32 %v1032_v8  ;;  %v1044_v15 = vand.u32 2147483648, %v1032_v8  ;;  %vm1038_vm4 = vweird.f32 %v1032_v8  ;;  %v1042_v17 = vand.u32 2147483647, %v1032_v8 }
0x10c4   :  { %v1045_v19 = vor.u32 1.1754944e-38, %v1044_v15  ;;  %vm1043_vm6 = vcmp.eq.f32.partialorder %v1042_v17, 8.507059e+37 }
0x10c8   :  { %v1832_v10 = vpop.eup %1831 }
0x10c9   :  { %v1034_v11 = vmul.f32 %v1832_v10, %v1032_v8  ;;  %vm1039_vm3 = vweird.f32 %v1832_v10 }
0x10ca   :  { %vm1040_vm5 = vmor %vm1038_vm4, %vm1039_vm3 }
0x10cb   :  { %v1035_v12 = vsub.f32 1.0, %v1034_v11 }
0x10cd   :  { %v1036_v13 = vmul.f32 %v1832_v10, %v1035_v12 }
0x10cf   :  { %v1037_v14 = vadd.f32 %v1832_v10, %v1036_v13 }
0x10d1   :  { %v1041_v18 = vsel %vm1040_vm5, %v1832_v10, %v1037_v14 }
0x10d2   :  { %v1046_v21 = vsel %vm1043_vm6, %v1045_v19, %v1041_v18 }
0x10d3   :  { %v1063_v28 = vsub.f32 1.0, %v1046_v21 }
0x1129   :  { %v1054_v20 = vpop.permute.xlu1 %1053 }
0x112a   :  { %v1056_v22 = vmul.f32 %v1054_v20, %v1046_v21 }
0x112c   :  { %1058 = vrot.lane.b32.xlu2 %v1056_v22, %s2097_s25 }
0x1131   :  { %v1070_v27 = vpop.permute.xlu1 %1069 }
0x1132   :  { %v1072_v30 = vmul.f32 %v1070_v27, %v1046_v21 }
0x1186   :  { %v1059_v23 = vpop.permute.xlu2 %1058 }
0x1187   :  { %v1061_v24 = vadd.f32 %v1059_v23, %v1004_v1 }
0x1189   :  { %1833 = vtanh.f32 %v1061_v24 }
0x118f   :  { %v1834_v25 = vpop.eup %1833 }
0x1190   :  { %1065 = vrot.lane.b32.xlu0 %v1834_v25, %s2099_s1 }
0x1202   :  { %v1066_v29 = vpop.permute.xlu0 %1065 }
0x1203   :  { %v1068_v31 = vmul.f32 %v1066_v29, %v1063_v28 }
0x1205   :  { %v1073_v32 = vadd.f32 %v1072_v30, %v1068_v31 }
0x1207   :  { %1075 = vrot.lane.b32.xlu2 %v1073_v32, %s2099_s1 }
0x1261   :  { %v1076_v33 = vpop.permute.xlu2 %1075 }
0x1262   :  { %1078 = vst.msk [vmem:[#allocation2] sm:$0xff] %vm229_vm1, %v1076_v33  ;;  %1736 = vmatmul.msk.f32.vlgmr.msra.gmra.mxu3 %vm229_vm1, %v1076_v33  ;;  %v1215_v33 = vld [vmem:[#allocation3 + $0x18] sm:$0xff] }
0x1263   :  { %1230 = vmatpush.msra.mxu3 %v2429_v2 }
0x1265   :  { %1231 = vmatpush.msra.mxu3 %v2434_v55 }
0x1267   :  { %1232 = vmatpush.msra.mxu3 %v2441_v3 }
0x1269   :  { %1233 = vmatpush.msra.mxu3 %v2449_v56 }
0x12e5   :  { %v1099_v34 = vpop.f32.mrf.mxu3 }
0x12e6   :  { %v1122_v35 = vadd.f32 %v1099_v34, %v2477_v60  ;;  %v1102_v37 = vadd.f32 %v1099_v34, %v1079_v36 }
0x12e8   :  { %1124 = vrot.lane.b32.xlu0 %v1122_v35, %s2097_s25  ;;  %v1737_v38 = vmul.f32 -1.442695, %v1102_v37 }
0x12ea   :  { %1835 = vpow2.f32 %v1737_v38 }
0x12f0   :  { %v1836_v39 = vpop.eup %1835 }
0x12f1   :  { %v1106_v40 = vadd.f32 1.0, %v1836_v39 }
0x12f3   :  { %1837 = vrcp.f32 %v1106_v40  ;;  %v1118_v46 = vand.u32 2147483648, %v1106_v40  ;;  %vm1112_vm8 = vweird.f32 %v1106_v40  ;;  %v1116_v47 = vand.u32 2147483647, %v1106_v40 }
0x12f5   :  { %v1119_v49 = vor.u32 1.1754944e-38, %v1118_v46  ;;  %vm1117_vm10 = vcmp.eq.f32.partialorder %v1116_v47, 8.507059e+37 }
0x12f9   :  { %v1838_v41 = vpop.eup %1837 }
0x12fa   :  { %v1108_v42 = vmul.f32 %v1838_v41, %v1106_v40  ;;  %vm1113_vm7 = vweird.f32 %v1838_v41 }
0x12fb   :  { %vm1114_vm9 = vmor %vm1112_vm8, %vm1113_vm7 }
0x12fc   :  { %v1109_v43 = vsub.f32 1.0, %v1108_v42 }
0x12fe   :  { %v1110_v44 = vmul.f32 %v1838_v41, %v1109_v43 }
0x1300   :  { %v1111_v45 = vadd.f32 %v1838_v41, %v1110_v44 }
0x1302   :  { %v1115_v48 = vsel %vm1114_vm9, %v1838_v41, %v1111_v45 }
0x1303   :  { %v1120_v51 = vsel %vm1117_vm10, %v1119_v49, %v1115_v48 }
0x1304   :  { %v1134_v57 = vsub.f32 1.0, %v1120_v51  ;;  %v1140_v61 = vmul.f32 %v1120_v51, %v1073_v32 }
0x135a   :  { %v1125_v50 = vpop.permute.xlu0 %1124 }
0x135b   :  { %v1127_v52 = vmul.f32 %v1125_v50, %v1120_v51 }
0x135d   :  { %1129 = vrot.lane.b32.xlu1 %v1127_v52, %s2097_s25 }
0x13cf   :  { %v1130_v53 = vpop.permute.xlu1 %1129 }
0x13d0   :  { %v1132_v6 = vadd.f32 %v1130_v53, %v1079_v36 }
0x13d2   :  { %1839 = vtanh.f32 %v1132_v6 }
0x13d8   :  { %v1840_v9 = vpop.eup %1839 }
0x13d9   :  { %1136 = vrot.lane.b32.xlu2 %v1840_v9, %s2099_s1 }
0x1433   :  { %v1137_v58 = vpop.permute.xlu2 %1136 }
0x1434   :  { %v1139_v62 = vmul.f32 %v1137_v58, %v1134_v57 }
0x1436   :  { %v1141_v63 = vadd.f32 %v1140_v61, %v1139_v62 }
0x1438   :  { %1143 = vrot.lane.b32.xlu0 %v1141_v63, %s2099_s1 }
0x14aa   :  { %v1144_v0 = vpop.permute.xlu0 %1143 }
0x14ab   :  { %1146 = vst.msk [vmem:[#allocation2 + $0x8] sm:$0xff] %vm229_vm1, %v1144_v0  ;;  %1738 = vmatmul.msk.f32.vlgmr.msrb.gmra.mxu3 %vm229_vm1, %v1144_v0  ;;  %v1283_v0 = vld [vmem:[#allocation3 + $0x20] sm:$0xff] }
0x14ac   :  { %1434 = vmatpush.msrb.mxu3 %v2429_v2 }
0x14ae   :  { %1435 = vmatpush.msrb.mxu3 %v2434_v55 }
0x14b0   :  { %1436 = vmatpush.msrb.mxu3 %v2441_v3 }
0x14b2   :  { %1437 = vmatpush.msrb.mxu3 %v2449_v56 }
0x152e   :  { %v1167_v1 = vpop.f32.mrf.mxu3 }
0x152f   :  { %v1190_v4 = vadd.f32 %v1167_v1, %v2477_v60  ;;  %v1170_v7 = vadd.f32 %v1167_v1, %v1147_v5 }
0x1531   :  { %1192 = vrot.lane.b32.xlu1 %v1190_v4, %s2097_s25  ;;  %v1739_v8 = vmul.f32 -1.442695, %v1170_v7 }
0x1533   :  { %1841 = vpow2.f32 %v1739_v8 }
0x1539   :  { %v1842_v10 = vpop.eup %1841 }
0x153a   :  { %v1174_v11 = vadd.f32 1.0, %v1842_v10 }
0x153c   :  { %1843 = vrcp.f32 %v1174_v11  ;;  %v1186_v3 = vand.u32 2147483648, %v1174_v11  ;;  %vm1180_vm12 = vweird.f32 %v1174_v11  ;;  %v1184_v56 = vand.u32 2147483647, %v1174_v11 }
0x153e   :  { %v1187_v17 = vor.u32 1.1754944e-38, %v1186_v3  ;;  %vm1185_vm14 = vcmp.eq.f32.partialorder %v1184_v56, 8.507059e+37 }
0x1542   :  { %v1844_v12 = vpop.eup %1843 }
0x1543   :  { %v1176_v2 = vmul.f32 %v1844_v12, %v1174_v11  ;;  %vm1181_vm11 = vweird.f32 %v1844_v12 }
0x1544   :  { %vm1182_vm13 = vmor %vm1180_vm12, %vm1181_vm11 }
0x1545   :  { %v1177_v13 = vsub.f32 1.0, %v1176_v2 }
0x1547   :  { %v1178_v55 = vmul.f32 %v1844_v12, %v1177_v13 }
0x1549   :  { %v1179_v14 = vadd.f32 %v1844_v12, %v1178_v55 }
0x154b   :  { %v1183_v15 = vsel %vm1182_vm13, %v1844_v12, %v1179_v14 }
0x154c   :  { %v1188_v19 = vsel %vm1185_vm14, %v1187_v17, %v1183_v15 }
0x154d   :  { %v1202_v24 = vsub.f32 1.0, %v1188_v19  ;;  %v1208_v27 = vmul.f32 %v1188_v19, %v1141_v63 }
0x15a3   :  { %v1193_v18 = vpop.permute.xlu1 %1192 }
0x15a4   :  { %v1195_v20 = vmul.f32 %v1193_v18, %v1188_v19 }
0x15a6   :  { %1197 = vrot.lane.b32.xlu2 %v1195_v20, %s2097_s25 }
0x1600   :  { %v1198_v21 = vpop.permute.xlu2 %1197 }
0x1601   :  { %v1200_v22 = vadd.f32 %v1198_v21, %v1147_v5 }
0x1603   :  { %1845 = vtanh.f32 %v1200_v22 }
0x1609   :  { %v1846_v23 = vpop.eup %1845 }
0x160a   :  { %1204 = vrot.lane.b32.xlu0 %v1846_v23, %s2099_s1 }
0x167c   :  { %v1205_v25 = vpop.permute.xlu0 %1204 }
0x167d   :  { %v1207_v28 = vmul.f32 %v1205_v25, %v1202_v24 }
0x167f   :  { %v1209_v29 = vadd.f32 %v1208_v27, %v1207_v28  ;;  %v1568_v27 = vld [vmem:[%s2618_s9 + $0x18] sm:$0xff]  ;;  %v1567_v28 = vld [vmem:[%s2618_s9 + $0x10] sm:$0xff] }
0x1680   :  { %1609 = vmatpush.msra.mxu1 %v1568_v27 }
0x1681   :  { %1211 = vrot.lane.b32.xlu1 %v1209_v29, %s2099_s1 }
0x1682   :  { %1610 = vmatpush.msra.mxu1 %v1567_v28 }
0x16f3   :  { %v1212_v30 = vpop.permute.xlu1 %1211 }
0x16f4   :  { %1214 = vst.msk [vmem:[#allocation2 + $0x10] sm:$0xff] %vm229_vm1, %v1212_v30  ;;  %1740 = vmatmul.msk.f32.vlgmr.msra.gmra.mxu3 %vm229_vm1, %v1212_v30  ;;  %v1565_v30 = vld [vmem:[%s2618_s9] sm:$0xff] }
0x1777   :  { %v1235_v31 = vpop.f32.mrf.mxu3 }
0x1778   :  { %v1258_v32 = vadd.f32 %v1235_v31, %v2477_v60  ;;  %v1238_v34 = vadd.f32 %v1235_v31, %v1215_v33 }
0x177a   :  { %1260 = vrot.lane.b32.xlu2 %v1258_v32, %s2097_s25  ;;  %v1741_v35 = vmul.f32 -1.442695, %v1238_v34  ;;  %v1557_v32 = vld [vmem:[#allocation2] sm:$0xff]  ;;  %v1559_v34 = vld [vmem:[#allocation2 + $0x10] sm:$0xff] }
0x177c   :  { %1847 = vpow2.f32 %v1741_v35 }
0x1782   :  { %v1848_v36 = vpop.eup %1847 }
0x1783   :  { %v1242_v37 = vadd.f32 1.0, %v1848_v36 }
0x1785   :  { %1849 = vrcp.f32 %v1242_v37  ;;  %v1254_v43 = vand.u32 2147483648, %v1242_v37  ;;  %vm1248_vm0 = vweird.f32 %v1242_v37  ;;  %v1252_v44 = vand.u32 2147483647, %v1242_v37 }
0x1787   :  { %v1255_v46 = vor.u32 1.1754944e-38, %v1254_v43  ;;  %vm1253_vm4 = vcmp.eq.f32.partialorder %v1252_v44, 8.507059e+37 }
0x178b   :  { %v1850_v38 = vpop.eup %1849 }
0x178c   :  { %v1244_v39 = vmul.f32 %v1850_v38, %v1242_v37  ;;  %vm1249_vm15 = vweird.f32 %v1850_v38 }
0x178d   :  { %vm1250_vm3 = vmor %vm1248_vm0, %vm1249_vm15 }
0x178e   :  { %v1245_v40 = vsub.f32 1.0, %v1244_v39  ;;  %v2547_v39 = vld [vmem:[#allocation13] ss:$0 sm:$0xff] }
0x1790   :  { %v1246_v41 = vmul.f32 %v1850_v38, %v1245_v40 }
0x1792   :  { %v1247_v42 = vadd.f32 %v1850_v38, %v1246_v41 }
0x1794   :  { %v1251_v45 = vsel %vm1250_vm3, %v1850_v38, %v1247_v42 }
0x1795   :  { %v1256_v48 = vsel %vm1253_vm4, %v1255_v46, %v1251_v45 }
0x1796   :  { %v1270_v53 = vsub.f32 1.0, %v1256_v48  ;;  %v1276_v9 = vmul.f32 %v1256_v48, %v1209_v29  ;;  %v1566_v29 = vld [vmem:[%s2618_s9 + $0x8] sm:$0xff]  ;;  %s2100_s9 = smov [#allocation16]  }
0x1797   :  { %1611 = vmatpush.msra.mxu1 %v1566_v29 }
0x1799   :  { %1612 = vmatpush.msra.mxu1 %v1565_v30 }
0x17d4   :  { %v1261_v47 = vpop.permute.xlu2 %1260 }
0x17d5   :  { %v1263_v49 = vmul.f32 %v1261_v47, %v1256_v48 }
0x17d7   :  { %1265 = vrot.lane.b32.xlu0 %v1263_v49, %s2097_s25 }
0x1849   :  { %v1266_v50 = vpop.permute.xlu0 %1265 }
0x184a   :  { %v1268_v51 = vadd.f32 %v1266_v50, %v1215_v33  ;;  %v1558_v33 = vld [vmem:[#allocation2 + $0x8] sm:$0xff] }
0x184b   :  { %v1351_v50 = vld [vmem:[#allocation3 + $0x28] sm:$0xff] }
0x184c   :  { %1851 = vtanh.f32 %v1268_v51 }
0x1852   :  { %v1852_v52 = vpop.eup %1851 }
0x1853   :  { %1272 = vrot.lane.b32.xlu1 %v1852_v52, %s2099_s1 }
0x18c5   :  { %v1273_v6 = vpop.permute.xlu1 %1272 }
0x18c6   :  { %v1275_v57 = vmul.f32 %v1273_v6, %v1270_v53 }
0x18c8   :  { %v1277_v58 = vadd.f32 %v1276_v9, %v1275_v57 }
0x18ca   :  { %1279 = vrot.lane.b32.xlu2 %v1277_v58, %s2099_s1 }
0x1924   :  { %v1280_v61 = vpop.permute.xlu2 %1279 }
0x1925   :  { %1282 = vst.msk [vmem:[#allocation2 + $0x18] sm:$0xff] %vm229_vm1, %v1280_v61  ;;  %1742 = vmatmul.msk.f32.vlgmr.msra.gmra.mxu0 %vm229_vm1, %v1280_v61 }
0x192c   :  { %v1560_v35 = vld [vmem:[#allocation2 + $0x18] sm:$0xff] }
0x19a2   :  { %v1303_v62 = vpop.f32.mrf.mxu0 }
0x19a3   :  { %v1326_v63 = vadd.f32 %v1303_v62, %v2477_v60  ;;  %v1306_v1 = vadd.f32 %v1303_v62, %v1283_v0 }
0x19a5   :  { %1328 = vrot.lane.b32.xlu0 %v1326_v63, %s2097_s25  ;;  %v1743_v4 = vmul.f32 -1.442695, %v1306_v1 }
0x19a7   :  { %1853 = vpow2.f32 %v1743_v4 }
0x19ad   :  { %v1854_v5 = vpop.eup %1853 }
0x19ae   :  { %v1310_v7 = vadd.f32 1.0, %v1854_v5 }
0x19b0   :  { %1855 = vrcp.f32 %v1310_v7  ;;  %v1322_v13 = vand.u32 2147483648, %v1310_v7  ;;  %vm1316_vm6 = vweird.f32 %v1310_v7  ;;  %v1320_v55 = vand.u32 2147483647, %v1310_v7 }
0x19b2   :  { %v1323_v3 = vor.u32 1.1754944e-38, %v1322_v13  ;;  %vm1321_vm8 = vcmp.eq.f32.partialorder %v1320_v55, 8.507059e+37  ;;  %v832_v13 = vld [vmem:[#allocation3 + $0x38] sm:$0xff] }
0x19b3   :  { %v855_v55 = vadd.f32 %v2475_v59, %v832_v13 }
0x19b6   :  { %v1856_v8 = vpop.eup %1855 }
0x19b7   :  { %v1312_v10 = vmul.f32 %v1856_v8, %v1310_v7  ;;  %vm1317_vm5 = vweird.f32 %v1856_v8 }
0x19b8   :  { %vm1318_vm7 = vmor %vm1316_vm6, %vm1317_vm5 }
0x19b9   :  { %v1313_v11 = vsub.f32 1.0, %v1312_v10  ;;  %v875_v10 = vadd.f32 %v2475_v59, %v2278_v26 }
0x19bb   :  { %v1314_v12 = vmul.f32 %v1856_v8, %v1313_v11 }
0x19bd   :  { %v1315_v2 = vadd.f32 %v1856_v8, %v1314_v12 }
0x19bf   :  { %v1319_v14 = vsel %vm1318_vm7, %v1856_v8, %v1315_v2 }
0x19c0   :  { %v1324_v15 = vsel %vm1321_vm8, %v1323_v3, %v1319_v14  ;;  %v1717_v14 = vmul.f32 -1.442695, %v855_v55 }
0x19c1   :  { %v1338_v21 = vsub.f32 1.0, %v1324_v15  ;;  %v1344_v23 = vmul.f32 %v1324_v15, %v1277_v58 }
0x1a17   :  { %v1329_v56 = vpop.permute.xlu0 %1328 }
0x1a18   :  { %v1331_v17 = vmul.f32 %v1329_v56, %v1324_v15 }
0x1a1a   :  { %1333 = vrot.lane.b32.xlu1 %v1331_v17, %s2097_s25 }
0x1a8c   :  { %v1334_v18 = vpop.permute.xlu1 %1333 }
0x1a8d   :  { %v1336_v19 = vadd.f32 %v1334_v18, %v1283_v0 }
0x1a8f   :  { %1857 = vtanh.f32 %v1336_v19 }
0x1a95   :  { %v1858_v20 = vpop.eup %1857 }
0x1a96   :  { %1340 = vrot.lane.b32.xlu2 %v1858_v20, %s2099_s1 }
0x1af0   :  { %v1341_v22 = vpop.permute.xlu2 %1340 }
0x1af1   :  { %v1343_v24 = vmul.f32 %v1341_v22, %v1338_v21 }
0x1af3   :  { %v2522_v25 = vadd.f32 %v1344_v23, %v1343_v24 }
0x1af5   :  { %1347 = vrot.lane.b32.xlu0 %v2522_v25, %s2099_s1 }
0x1b67   :  { %v1348_v31 = vpop.permute.xlu0 %1347 }
0x1b68   :  { %1350 = vst.msk [vmem:[#allocation2 + $0x20] sm:$0xff] %vm229_vm1, %v1348_v31  ;;  %1744 = vmatmul.msk.f32.vlgmr.msrb.gmra.mxu1 %vm229_vm1, %v1348_v31 }
0x1b6f   :  { %v1561_v36 = vld [vmem:[#allocation2 + $0x20] sm:$0xff] }
0x1b70   :  { %1750 = vmatmul.msk.f32.vlgmr.msra.gmra.mxu1 %vm229_vm1, %v1557_v32 }
0x1b78   :  { %1751 = vmatmul.msk.f32.gmra.mxu1 %vm229_vm1, %v1558_v33 }
0x1b80   :  { %1752 = vmatmul.msk.f32.gmra.mxu1 %vm229_vm1, %v1559_v34 }
0x1b88   :  { %1753 = vmatmul.msk.f32.gmra.mxu1 %vm229_vm1, %v1560_v35 }
0x1b90   :  { %1754 = vmatmul.msk.f32.gmra.mxu1 %vm229_vm1, %v1561_v36 }
0x1be5   :  { %v1371_v37 = vpop.f32.mrf.mxu1 }
0x1be6   :  { %v1394_v38 = vadd.f32 %v1371_v37, %v2477_v60  ;;  %v1374_v51 = vadd.f32 %v1371_v37, %v1351_v50 }
0x1be8   :  { %1396 = vrot.lane.b32.xlu1 %v1394_v38, %s2097_s25  ;;  %v1745_v52 = vmul.f32 -1.442695, %v1374_v51 }
0x1bea   :  { %1859 = vpow2.f32 %v1745_v52 }
0x1bed   :  { %v1614_v40 = vpop.f32.mrf.mxu1 }
0x1bee   :  { %v1615_v41 = vadd.f32 %v2547_v39, %v1614_v40 }
0x1bf0   :  { %1638 = vst [vmem:[#allocation15] sm:$0xff] %v1615_v41  ;;  %v1860_v53 = vpop.eup %1859 }
0x1bf1   :  { %v1378_v6 = vadd.f32 1.0, %v1860_v53 }
0x1bf3   :  { %1861 = vrcp.f32 %v1378_v6  ;;  %v1390_v63 = vand.u32 2147483648, %v1378_v6  ;;  %vm1384_vm10 = vweird.f32 %v1378_v6  ;;  %v1388_v0 = vand.u32 2147483647, %v1378_v6 }
0x1bf5   :  { %v1617_v42 = vpop.f32.mrf.mxu1  ;;  %v1391_v4 = vor.u32 1.1754944e-38, %v1390_v63  ;;  %vm1389_vm12 = vcmp.eq.f32.partialorder %v1388_v0, 8.507059e+37 }
0x1bf6   :  { %v1618_v43 = vadd.f32 %v2547_v39, %v1617_v42  ;;  %v1419_v42 = vld [vmem:[#allocation3 + $0x30] sm:$0xff] }
0x1bf8   :  { %1639 = vst [vmem:[#allocation15 + $0x8] sm:$0xff] %v1618_v43 }
0x1bf9   :  { %v1862_v9 = vpop.eup %1861 }
0x1bfa   :  { %v1380_v57 = vmul.f32 %v1862_v9, %v1378_v6  ;;  %vm1385_vm9 = vweird.f32 %v1862_v9 }
0x1bfb   :  { %vm1386_vm11 = vmor %vm1384_vm10, %vm1385_vm9 }
0x1bfc   :  { %v1381_v58 = vsub.f32 1.0, %v1380_v57 }
0x1bfd   :  { %v1620_v44 = vpop.f32.mrf.mxu1 }
0x1bfe   :  { %v1621_v45 = vadd.f32 %v2547_v39, %v1620_v44  ;;  %v1382_v61 = vmul.f32 %v1862_v9, %v1381_v58 }
0x1c00   :  { %1640 = vst [vmem:[#allocation15 + $0x10] sm:$0xff] %v1621_v45  ;;  %v1383_v62 = vadd.f32 %v1862_v9, %v1382_v61 }
0x1c02   :  { %v1387_v1 = vsel %vm1386_vm11, %v1862_v9, %v1383_v62 }
0x1c03   :  { %v1392_v7 = vsel %vm1389_vm12, %v1391_v4, %v1387_v1 }
0x1c04   :  { %v1406_v19 = vsub.f32 1.0, %v1392_v7  ;;  %v1412_v21 = vmul.f32 %v1392_v7, %v2522_v25 }
0x1c05   :  { %v1623_v46 = vpop.f32.mrf.mxu1 }
0x1c06   :  { %v1624_v47 = vadd.f32 %v2547_v39, %v1623_v46 }
0x1c08   :  { %1641 = vst [vmem:[#allocation15 + $0x18] sm:$0xff] %v1624_v47 }
0x1c0d   :  { %v1626_v48 = vpop.f32.mrf.mxu1 }
0x1c0e   :  { %v1627_v49 = vadd.f32 %v2547_v39, %v1626_v48 }
0x1c10   :  { %1642 = vst [vmem:[#allocation15 + $0x20] sm:$0xff] %v1627_v49 }
0x1c5a   :  { %v1397_v5 = vpop.permute.xlu1 %1396 }
0x1c5b   :  { %v1399_v8 = vmul.f32 %v1397_v5, %v1392_v7 }
0x1c5d   :  { %1401 = vrot.lane.b32.xlu2 %v1399_v8, %s2097_s25 }
0x1c65   :  { %877 = vrot.lane.b32.xlu2 %v875_v10, %s2097_s25 }
0x1cb7   :  { %v1402_v11 = vpop.permute.xlu2 %1401 }
0x1cb8   :  { %v1404_v12 = vadd.f32 %v1402_v11, %v1351_v50 }
0x1cba   :  { %1863 = vtanh.f32 %v1404_v12 }
0x1cbb   :  { %1865 = vpow2.f32 %v1717_v14 }
0x1cbf   :  { %v878_v30 = vpop.permute.xlu2 %877 }
0x1cc0   :  { %v1864_v2 = vpop.eup %1863 }
0x1cc1   :  { %1408 = vrot.lane.b32.xlu0 %v1864_v2, %s2099_s1  ;;  %v1866_v3 = vpop.eup %1865 }
0x1cc2   :  { %v859_v56 = vadd.f32 1.0, %v1866_v3 }
0x1cc4   :  { %1867 = vrcp.f32 %v859_v56  ;;  %v871_v27 = vand.u32 2147483648, %v859_v56  ;;  %vm865_vm14 = vweird.f32 %v859_v56  ;;  %v869_v59 = vand.u32 2147483647, %v859_v56 }
0x1cc6   :  { %v872_v29 = vor.u32 1.1754944e-38, %v871_v27  ;;  %vm870_vm0 = vcmp.eq.f32.partialorder %v869_v59, 8.507059e+37 }
0x1cca   :  { %v1868_v15 = vpop.eup %1867 }
0x1ccb   :  { %v861_v17 = vmul.f32 %v1868_v15, %v859_v56  ;;  %vm866_vm13 = vweird.f32 %v1868_v15 }
0x1ccc   :  { %vm867_vm15 = vmor %vm865_vm14, %vm866_vm13 }
0x1ccd   :  { %v862_v18 = vsub.f32 1.0, %v861_v17 }
0x1ccf   :  { %v863_v26 = vmul.f32 %v1868_v15, %v862_v18 }
0x1cd1   :  { %v864_v23 = vadd.f32 %v1868_v15, %v863_v26 }
0x1cd3   :  { %v868_v28 = vsel %vm867_vm15, %v1868_v15, %v864_v23 }
0x1cd4   :  { %v873_v31 = vsel %vm870_vm0, %v872_v29, %v868_v28 }
0x1cd5   :  { %v880_v32 = vmul.f32 %v878_v30, %v873_v31  ;;  %v887_v62 = vsub.f32 1.0, %v873_v31  ;;  %v893_v0 = vmul.f32 %v873_v31, %v2422_v54 }
0x1d33   :  { %v1409_v20 = vpop.permute.xlu0 %1408 }
0x1d34   :  { %v1411_v22 = vmul.f32 %v1409_v20, %v1406_v19 }
0x1d36   :  { %v2561_v24 = vadd.f32 %v1412_v21, %v1411_v22 }
0x1d38   :  { %1415 = vrot.lane.b32.xlu1 %v2561_v24, %s2099_s1 }
0x1d40   :  { %882 = vrot.lane.b32.xlu1 %v880_v32, %s2097_s25 }
0x1daa   :  { %v1416_v25 = vpop.permute.xlu1 %1415 }
0x1dab   :  { %1418 = vst.msk [vmem:[#allocation2 + $0x28] sm:$0xff] %vm229_vm1, %v1416_v25  ;;  %1746 = vmatmul.msk.f32.vlgmr.msrb.gmra.mxu3 %vm229_vm1, %v1416_v25 }
0x1db2   :  { %v1562_v33 = vld [vmem:[#allocation2 + $0x28] sm:$0xff]  ;;  %v883_v34 = vpop.permute.xlu1 %882 }
0x1db3   :  { %1755 = vmatmul.msk.f32.gmra.mxu1 %vm229_vm1, %v1562_v33  ;;  %v885_v35 = vadd.f32 %v883_v34, %v832_v13 }
0x1db5   :  { %1869 = vtanh.f32 %v885_v35 }
0x1dbb   :  { %v1870_v41 = vpop.eup %1869 }
0x1e2e   :  { %v1439_v36 = vpop.f32.mrf.mxu3 }
0x1e2f   :  { %v1462_v37 = vadd.f32 %v1439_v36, %v2477_v60  ;;  %v1442_v43 = vadd.f32 %v1439_v36, %v1419_v42 }
0x1e30   :  { %v1629_v38 = vpop.f32.mrf.mxu1 }
0x1e31   :  { %v1630_v40 = vadd.f32 %v2547_v39, %v1629_v38  ;;  %1464 = vrot.lane.b32.xlu0 %v1462_v37, %s2097_s25  ;;  %v1747_v44 = vmul.f32 -1.442695, %v1442_v43 }
0x1e33   :  { %1643 = vst [vmem:[#allocation15 + $0x28] sm:$0xff] %v1630_v40  ;;  %1871 = vpow2.f32 %v1747_v44 }
0x1e39   :  { %889 = vrot.lane.b32.xlu0 %v1870_v41, %s2099_s1  ;;  %v1872_v45 = vpop.eup %1871 }
0x1e3a   :  { %v1446_v46 = vadd.f32 1.0, %v1872_v45 }
0x1e3c   :  { %1873 = vrcp.f32 %v1446_v46  ;;  %v1458_v52 = vand.u32 2147483648, %v1446_v46  ;;  %vm1452_vm4 = vweird.f32 %v1446_v46  ;;  %v1456_v53 = vand.u32 2147483647, %v1446_v46 }
0x1e3e   :  { %v1459_v9 = vor.u32 1.1754944e-38, %v1458_v52  ;;  %vm1457_vm6 = vcmp.eq.f32.partialorder %v1456_v53, 8.507059e+37 }
0x1e42   :  { %v1874_v47 = vpop.eup %1873 }
0x1e43   :  { %v1448_v48 = vmul.f32 %v1874_v47, %v1446_v46  ;;  %vm1453_vm3 = vweird.f32 %v1874_v47 }
0x1e44   :  { %vm1454_vm5 = vmor %vm1452_vm4, %vm1453_vm3 }
0x1e45   :  { %v1449_v49 = vsub.f32 1.0, %v1448_v48 }
0x1e47   :  { %v1450_v50 = vmul.f32 %v1874_v47, %v1449_v49 }
0x1e49   :  { %v1451_v51 = vadd.f32 %v1874_v47, %v1450_v50 }
0x1e4b   :  { %v1455_v6 = vsel %vm1454_vm5, %v1874_v47, %v1451_v51 }
0x1e4c   :  { %v1460_v58 = vsel %vm1457_vm6, %v1459_v9, %v1455_v6 }
0x1e4d   :  { %v1474_v12 = vsub.f32 1.0, %v1460_v58  ;;  %v1480_v2 = vmul.f32 %v1460_v58, %v2561_v24 }
0x1ea3   :  { %v1465_v57 = vpop.permute.xlu0 %1464 }
0x1ea4   :  { %v1467_v61 = vmul.f32 %v1465_v57, %v1460_v58 }
0x1ea6   :  { %1469 = vrot.lane.b32.xlu2 %v1467_v61, %s2097_s25 }
0x1eab   :  { %v890_v63 = vpop.permute.xlu0 %889 }
0x1eac   :  { %v892_v1 = vmul.f32 %v890_v63, %v887_v62 }
0x1eae   :  { %v894_v4 = vadd.f32 %v893_v0, %v892_v1 }
0x1eb0   :  { %896 = vrot.lane.b32.xlu2 %v894_v4, %s2099_s1 }
0x1f00   :  { %v1470_v5 = vpop.permute.xlu2 %1469 }
0x1f01   :  { %v1472_v7 = vadd.f32 %v1470_v5, %v1419_v42 }
0x1f03   :  { %1875 = vtanh.f32 %v1472_v7 }
0x1f09   :  { %v1876_v8 = vpop.eup %1875 }
0x1f0a   :  { %1476 = vrot.lane.b32.xlu1 %v1876_v8, %s2099_s1  ;;  %v897_v10 = vpop.permute.xlu2 %896 }
0x1f0b   :  { %900 = vst.msk [vmem:[#allocation2 + $0x38] sm:$0xff] %vm229_vm1, %v897_v10 }
0x1f0c   :  { %901 = vst.msk [vmem:[#allocation16] sm:$0xff] %vm229_vm1, %v897_v10 }
0x1f12   :  { %v909_v11 = vld [vmem:[#allocation2 + $0x38] sm:$0xff] }
0x1f13   :  { %1729 = vmatmul.msk.f32.gmra.mxu2 %vm229_vm1, %v909_v11 }
0x1f7c   :  { %v1477_v54 = vpop.permute.xlu1 %1476 }
0x1f7d   :  { %v1479_v13 = vmul.f32 %v1477_v54, %v1474_v12 }
0x1f7f   :  { %v1481_v55 = vadd.f32 %v1480_v2, %v1479_v13 }
0x1f81   :  { %1483 = vrot.lane.b32.xlu0 %v1481_v55, %s2099_s1 }
0x1f96   :  { %v982_v14 = vpop.f32.mrf.mxu2 }
0x1f97   :  { %v983_v3 = vadd.f32 %v2405_v16, %v982_v14 }
0x1f99   :  { %992 = vst.msk [vmem:[#allocation3 + $0x38] sm:$0xff] %vm319_vm2, %v983_v3 }
0x1fa0   :  { %v1487_v16 = vld [vmem:[#allocation3 + $0x38] sm:$0xff] }
0x1ff3   :  { %v1484_v56 = vpop.permute.xlu0 %1483 }
0x1ff4   :  { %1486 = vst.msk [vmem:[#allocation2 + $0x30] sm:$0xff] %vm229_vm1, %v1484_v56  ;;  %1748 = vmatmul.msk.f32.vlgmr.msrb.gmra.mxu0 %vm229_vm1, %v1484_v56 }
0x1ffb   :  { %v1563_v15 = vld [vmem:[#allocation2 + $0x30] sm:$0xff] }
0x1ffc   :  { %1756 = vmatmul.msk.f32.gmra.mxu1 %vm229_vm1, %v1563_v15 }
0x2071   :  { %v1507_v17 = vpop.f32.mrf.mxu0 }
0x2072   :  { %v1530_v18 = vadd.f32 %v1507_v17, %v2477_v60  ;;  %v1510_v20 = vadd.f32 %v1507_v17, %v1487_v16 }
0x2074   :  { %1532 = vrot.lane.b32.xlu1 %v1530_v18, %s2097_s25  ;;  %v1749_v21 = vmul.f32 -1.442695, %v1510_v20 }
0x2076   :  { %1877 = vpow2.f32 %v1749_v21 }
0x2079   :  { %v1632_v26 = vpop.f32.mrf.mxu1 }
0x207a   :  { %v1633_v19 = vadd.f32 %v2547_v39, %v1632_v26 }
0x207c   :  { %1644 = vst [vmem:[#allocation15 + $0x30] sm:$0xff] %v1633_v19  ;;  %v1878_v22 = vpop.eup %1877 }
0x207d   :  { %v1514_v23 = vadd.f32 1.0, %v1878_v22 }
0x207f   :  { %1879 = vrcp.f32 %v1514_v23  ;;  %v1526_v60 = vand.u32 2147483648, %v1514_v23  ;;  %vm1520_vm7 = vweird.f32 %v1514_v23  ;;  %v1524_v30 = vand.u32 2147483647, %v1514_v23 }
0x2081   :  { %v1527_v32 = vor.u32 1.1754944e-38, %v1526_v60  ;;  %vm1525_vm9 = vcmp.eq.f32.partialorder %v1524_v30, 8.507059e+37 }
0x2085   :  { %v1880_v24 = vpop.eup %1879 }
0x2086   :  { %v1516_v27 = vmul.f32 %v1880_v24, %v1514_v23  ;;  %vm1521_vm2 = vweird.f32 %v1880_v24 }
0x2087   :  { %vm1522_vm8 = vmor %vm1520_vm7, %vm1521_vm2 }
0x2088   :  { %v1517_v59 = vsub.f32 1.0, %v1516_v27 }
0x208a   :  { %v1518_v28 = vmul.f32 %v1880_v24, %v1517_v59 }
0x208c   :  { %v1519_v29 = vadd.f32 %v1880_v24, %v1518_v28 }
0x208e   :  { %v1523_v31 = vsel %vm1522_vm8, %v1880_v24, %v1519_v29 }
0x208f   :  { %v1528_v33 = vsel %vm1525_vm9, %v1527_v32, %v1523_v31 }
0x2090   :  { %v1542_v38 = vsub.f32 1.0, %v1528_v33  ;;  %v1548_v41 = vmul.f32 %v1528_v33, %v1481_v55 }
0x20e6   :  { %v1533_v25 = vpop.permute.xlu1 %1532 }
0x20e7   :  { %v1535_v34 = vmul.f32 %v1533_v25, %v1528_v33 }
0x20e9   :  { %1537 = vrot.lane.b32.xlu2 %v1535_v34, %s2097_s25  ;;  %s1663_s25 = sshll.u32 %s2100_s9, 4  ;;  %s1664_s25 = int_to_ptr.vmem [resolvable:$true] %s1663_s25 }
0x2143   :  { %v1538_v35 = vpop.permute.xlu2 %1537 }
0x2144   :  { %v1540_v36 = vadd.f32 %v1538_v35, %v1487_v16 }
0x2146   :  { %1881 = vtanh.f32 %v1540_v36 }
0x214c   :  { %v1882_v37 = vpop.eup %1881 }
0x214d   :  { %1544 = vrot.lane.b32.xlu0 %v1882_v37, %s2099_s1 }
0x21bf   :  { %v1545_v40 = vpop.permute.xlu0 %1544 }
0x21c0   :  { %v1547_v42 = vmul.f32 %v1545_v40, %v1542_v38 }
0x21c2   :  { %v1549_v43 = vadd.f32 %v1548_v41, %v1547_v42 }
0x21c4   :  { %1551 = vrot.lane.b32.xlu1 %v1549_v43, %s2099_s1  ;;  %s2101_s1 = smov [#allocation15]  }
0x21c5   :  { %s1650_s23 = sshll.u32 %s2101_s1, 4  ;;  %s1651_s23 = int_to_ptr.vmem [resolvable:$true] %s1650_s23 }
0x2236   :  { %v1552_v44 = vpop.permute.xlu1 %1551 }
0x2237   :  { %1554 = vst.msk [vmem:[#allocation2 + $0x38] sm:$0xff] %vm229_vm1, %v1552_v44 }
0x2238   :  { %1556 = vst.msk [vmem:[#allocation16 + $0x8] sm:$0xff] %vm229_vm1, %v1552_v44 }
0x2239   :  { %1671 = dma.vmem_to_hbm [thread:$0]  %s1664_s25, 256, %s1666_s22, [#allocation17], %s2088_s29, %s2088_s29, %s2089_s30  }
0x223e   :  { %v1564_v45 = vld [vmem:[#allocation2 + $0x38] sm:$0xff] }
0x223f   :  { %1757 = vmatmul.msk.f32.gmra.mxu1 %vm229_vm1, %v1564_v45 }
0x22bc   :  { %v1635_v46 = vpop.f32.mrf.mxu1 }
0x22bd   :  { %v1636_v47 = vadd.f32 %v2547_v39, %v1635_v46 }
0x22bf   :  { %1645 = vst [vmem:[#allocation15 + $0x38] sm:$0xff] %v1636_v47 }
0x22c0   :  { %1658 = dma.vmem_to_hbm [thread:$0]  %s1651_s23, 1024, %s1653_s27, [#allocation6], %s2088_s29, %s2088_s29, %s2089_s30  }
0x22c1   :  { %2083 = dma.done.wait [#allocation6], 1024  }
0x22c2   :  { %2084 = vsyncadd [#allocation6], 4294966272 }
0x22c3   :  { %2085 = dma.done.wait [#allocation17], 256  }
0x22c4   :  { %2086 = vsyncadd [#allocation17], 4294967040 }
0x22c5   :  { %1680 = vsyncpa [#allocation5], 1 }
0x22c6   :  { %1681 = vsyncpa [#allocation8], 1 }
0x22c7   :  { %1682 = vsyncpa [#allocation11], 1 }
0x22c8   :  { %1683 = vsyncpa [#allocation14], 1 }
0x22c9   :  { %1684 = vsyncpa [#allocation6], 1 }
0x22ca   :  { %1685 = vsyncpa [#allocation17], 1 }

</bundles_post_ra>
